<compile_context>
chip_gen: v6e
topology: v6e:2x2x1
jax: 0.10.0
libtpu: 0.0.40
codegen_flags: <defaults>
</compile_context>

<pallas_src>
import functools

import jax
import jax.numpy as jnp
from jax import lax
from jax.experimental import pallas as pl
from jax.experimental.pallas import tpu as pltpu

C_MID = 256  # both conv layers emit 256 channels (matches the nn.Module)

# Clipped-range index used by an (outer 3x3 tap, inner 3x3 tap) pair; the same table
# applies to rows (kh, k1h) and columns (kw, k1w).  Half-open ranges over length L:
#   0: [0, L-2)   1: [0, L-1)   2: [0, L)   3: [1, L)   4: [2, L)
_RANGE_IDX = ((0, 1, 3),
              (1, 2, 3),
              (1, 3, 4))


def scheduler_kernel(f1_ref, f2_ref, w1_ref, w2_ref, b2_ref, wfc_ref, bfc_ref,
                     out_ref, *, n, h, w, cin):
    hw = h * w

    # ---- 25 clipped-rectangle sums of d = f1 - f2 per batch (conv1 bias cancels) ----
    # rects[b][a][c] : (1, cin) sum of d over row-range a x column-range c.
    rects = []
    for b in range(n):
        db = f1_ref[b] - f2_ref[b]                       # (H*W, cin), pixels row-major

        # Row-range partial images (W, cin): total image minus border image rows.
        # (Plain 2-D slices at 8-aligned offsets + adds; no masks, no gathers.)
        p2 = db[:w, :]
        for r in range(1, h):
            p2 = p2 + db[r * w:(r + 1) * w, :]           # rows [0, H)
        p1 = p2 - db[(h - 1) * w:, :]                    # rows [0, H-1)
        p0 = p1 - db[(h - 2) * w:(h - 1) * w, :]         # rows [0, H-2)
        p3 = p2 - db[:w, :]                              # rows [1, H)
        p4 = p3 - db[w:2 * w, :]                         # rows [2, H)

        rect_b = []
        for pa in (p0, p1, p2, p3, p4):
            c2 = jnp.sum(pa, axis=0, keepdims=True)      # cols [0, W)        (1, cin)
            c1 = c2 - pa[w - 1:w, :]                     # cols [0, W-1)
            c0 = c1 - pa[w - 2:w - 1, :]                 # cols [0, W-2)
            c3 = c2 - pa[0:1, :]                         # cols [1, W)
            c4 = c3 - pa[1:2, :]                         # cols [2, W)
            rect_b.append((c0, c1, c2, c3, c4))
        rects.append(rect_b)

    # ---- conv1 folded onto the pooled windows: one micro-matmul per conv2 tap ----
    # S[kh,kw] = sum of conv1(d) over the (kh,kw)-shifted pooling window
    #          = [rectangle sum of d, one per conv1 tap] @ w1_flat.
    s_parts = []
    for kh in range(3):
        for kw in range(3):
            rows = [
                jnp.concatenate(
                    [rects[b][_RANGE_IDX[kh][k1h]][_RANGE_IDX[kw][k1w]]
                     for k1h in range(3) for k1w in range(3)], axis=1)    # (1, 9*cin)
                for b in range(n)
            ]
            lhs = jnp.concatenate(rows, axis=0).astype(jnp.bfloat16)      # (N, 9*cin)
            s_parts.append(jnp.dot(lhs, w1_ref[...],
                                   preferred_element_type=jnp.float32))   # (N, 256)

    # ---- conv2 + AdaptiveAvgPool2d fused into one (N, 2304) @ (2304, 256) matmul ----
    s_flat = jnp.concatenate(s_parts, axis=1).astype(jnp.bfloat16)        # (N, 9*256)
    pooled = jnp.dot(s_flat, w2_ref[...], preferred_element_type=jnp.float32)
    pooled = pooled * (1.0 / hw) + b2_ref[...]                            # (N, 256)

    # ---- fc (256 -> 1): VPU multiply + lane reduction (no degenerate MXU matmul) ----
    out_ref[...] = (jnp.sum(pooled * wfc_ref[...], axis=1, keepdims=True)
                    + bfc_ref[...])                                       # (N, 1)


@jax.jit
def adaptive_scheduler(f1, f2, w1, b1, w2, b2, wfc, bfc):
    """f1, f2: NHWC.  w1: (3,3,cin,256) HWIO, w2: (3,3,256,256) HWIO, wfc: (256,1),
    b2/bfc: (1, C).  b1 cancels algebraically and is unused.  Assumes a small batch
    (the whole batch is processed in one grid step)."""
    del b1  # conv1(f1)+b1 - (conv1(f2)+b1) == conv1(f1-f2): bias cancels exactly
    n, h, w, cin = f1.shape

    # Only wrapper-side work: free reshapes + weight casts (no pad / im2col prologue).
    f1r = f1.reshape(n, h * w, cin)
    f2r = f2.reshape(n, h * w, cin)
    w1_flat = w1.reshape(9 * cin, C_MID).astype(jnp.bfloat16)    # ((k1h*3+k1w)*cin + ci)
    w2_flat = w2.reshape(9 * C_MID, C_MID).astype(jnp.bfloat16)  # ((kh*3+kw)*256 + ci)
    wfc_row = wfc.reshape(1, C_MID).astype(jnp.float32)

    kernel = functools.partial(scheduler_kernel, n=n, h=h, w=w, cin=cin)

    return pl.pallas_call(
        kernel,
        out_shape=jax.ShapeDtypeStruct((n, 1), jnp.float32),
        grid=(1,),  # whole batch in one step: w2 streamed once, no megacore duplication
        in_specs=[
            pl.BlockSpec((n, h * w, cin), lambda i: (0, 0, 0)),   # f1 (flattened pixels)
            pl.BlockSpec((n, h * w, cin), lambda i: (0, 0, 0)),   # f2
            pl.BlockSpec((9 * cin, C_MID), lambda i: (0, 0)),     # w1 (bf16)
            pl.BlockSpec((9 * C_MID, C_MID), lambda i: (0, 0)),   # w2 (bf16)
            pl.BlockSpec((1, C_MID), lambda i: (0, 0)),           # b2
            pl.BlockSpec((1, C_MID), lambda i: (0, 0)),           # wfc (as a row)
            pl.BlockSpec((1, 1), lambda i: (0, 0)),               # bfc
        ],
        out_specs=pl.BlockSpec((n, 1), lambda i: (0, 0)),
        compiler_params=pltpu.CompilerParams(
            dimension_semantics=("arbitrary",)),
    )(f1r, f2r, w1_flat, w2_flat, b2, wfc_row, bfc)


def ref_forward(f1, f2, w1, b1, w2, b2, wfc, bfc):
    """Pure-JAX reference matching the PyTorch forward semantics (f32)."""
    dn = lax.conv_dimension_numbers(f1.shape, w1.shape, ('NHWC', 'HWIO', 'NHWC'))

    def conv(x, wt):
        return lax.conv_general_dilated(x, wt, (1, 1), 'SAME',
                                        dimension_numbers=dn)

    c1a = conv(f1, w1) + b1.reshape(1, 1, 1, -1)
    c1b = conv(f2, w1) + b1.reshape(1, 1, 1, -1)
    diff = c1a - c1b
    out = conv(diff, w2) + b2.reshape(1, 1, 1, -1)
    pooled = out.mean(axis=(1, 2))          # AdaptiveAvgPool2d(1) + squeeze -> (N, 256)
    return pooled @ wfc + bfc               # Linear(256, 1) -> (N, 1)


if __name__ == "__main__":
    # Small shapes consistent with the module: batch=2, in_channels=4, spatial=16.
    N, H, W, CIN = 2, 16, 16, 4
    key = jax.random.PRNGKey(0)
    ks = jax.random.split(key, 8)

    f1 = jax.random.normal(ks[0], (N, H, W, CIN), jnp.float32)
    f2 = jax.random.normal(ks[1], (N, H, W, CIN), jnp.float32)

    # Deterministic synthetic parameters (shapes from the module's __init__).
    w1 = jax.random.normal(ks[2], (3, 3, CIN, C_MID), jnp.float32) * 0.05
    b1 = jax.random.normal(ks[3], (1, C_MID), jnp.float32) * 0.05
    w2 = jax.random.normal(ks[4], (3, 3, C_MID, C_MID), jnp.float32) * 0.02
    b2 = jax.random.normal(ks[5], (1, C_MID), jnp.float32) * 0.05
    wfc = jax.random.normal(ks[6], (C_MID, 1), jnp.float32) * 0.05
    bfc = jax.random.normal(ks[7], (1, 1), jnp.float32) * 0.05

    out = jax.block_until_ready(adaptive_scheduler(f1, f2, w1, b1, w2, b2, wfc, bfc))
    ref = jax.block_until_ready(ref_forward(f1, f2, w1, b1, w2, b2, wfc, bfc))

    assert out.shape == (N, 1), out.shape
    # bf16 MXU operands + pool-through-conv reassociation: error ~1e-4 at this scale.
    assert jnp.allclose(out, ref, rtol=2e-3, atol=2e-3), (out, ref)

    # TODO(synk): PyTorch's .squeeze() drops the batch dim when N == 1; this wrapper
    # assumes N > 1 (output shape (N, 1)). The module's debug print() calls are omitted.
    print("KERNEL_OK")
</pallas_src>

<mosaic_0001>
module attributes {stable_mosaic.version = 11 : i64} {
  func.func @scheduler_kernel(%arg0: i32, %arg1: memref<2x256x4xf32, #tpu.memory_space<vmem>>, %arg2: memref<2x256x4xf32, #tpu.memory_space<vmem>>, %arg3: memref<36x256xbf16, #tpu.memory_space<vmem>>, %arg4: memref<2304x256xbf16, #tpu.memory_space<vmem>>, %arg5: memref<1x256xf32, #tpu.memory_space<vmem>>, %arg6: memref<1x256xf32, #tpu.memory_space<vmem>>, %arg7: memref<1x1xf32, #tpu.memory_space<vmem>>, %arg8: memref<2x1xf32, #tpu.memory_space<vmem>>) attributes {dimension_semantics = [#tpu.dimension_semantics<arbitrary>], iteration_bounds = array<i64: 1>, scalar_prefetch = 0 : i64, scratch_operands = 0 : i64, tpu.core_type = #tpu.core_type<tc>, window_params = [{pipeline_mode = #tpu.pipeline_mode<synchronous>, transform_indices = @transform_0, window_bounds = array<i64: 2, 256, 4>}, {pipeline_mode = #tpu.pipeline_mode<synchronous>, transform_indices = @transform_1, window_bounds = array<i64: 2, 256, 4>}, {pipeline_mode = #tpu.pipeline_mode<synchronous>, transform_indices = @transform_2, window_bounds = array<i64: 36, 256>}, {pipeline_mode = #tpu.pipeline_mode<synchronous>, transform_indices = @transform_3, window_bounds = array<i64: 2304, 256>}, {pipeline_mode = #tpu.pipeline_mode<synchronous>, transform_indices = @transform_4, window_bounds = array<i64: 1, 256>}, {pipeline_mode = #tpu.pipeline_mode<synchronous>, transform_indices = @transform_5, window_bounds = array<i64: 1, 256>}, {pipeline_mode = #tpu.pipeline_mode<synchronous>, transform_indices = @transform_6, window_bounds = array<i64: 1, 1>}, {pipeline_mode = #tpu.pipeline_mode<synchronous>, transform_indices = @transform_7, window_bounds = array<i64: 2, 1>}]} {
    %c0 = arith.constant 0 : index
    %c0_0 = arith.constant 0 : index
    %c0_1 = arith.constant 0 : index
    %0 = vector.load %arg1[%c0, %c0_0, %c0_1] : memref<2x256x4xf32, #tpu.memory_space<vmem>>, vector<1x256x4xf32>
    %1 = vector.shape_cast %0 : vector<1x256x4xf32> to vector<256x4xf32>
    %c0_2 = arith.constant 0 : index
    %c0_3 = arith.constant 0 : index
    %c0_4 = arith.constant 0 : index
    %2 = vector.load %arg2[%c0_2, %c0_3, %c0_4] : memref<2x256x4xf32, #tpu.memory_space<vmem>>, vector<1x256x4xf32>
    %3 = vector.shape_cast %2 : vector<1x256x4xf32> to vector<256x4xf32>
    %4 = arith.subf %1, %3 : vector<256x4xf32>
    %5 = vector.extract_strided_slice %4 {offsets = [0, 0], sizes = [16, 4], strides = [1, 1]} : vector<256x4xf32> to vector<16x4xf32>
    %6 = vector.extract_strided_slice %4 {offsets = [16, 0], sizes = [16, 4], strides = [1, 1]} : vector<256x4xf32> to vector<16x4xf32>
    %7 = arith.addf %5, %6 : vector<16x4xf32>
    %8 = vector.extract_strided_slice %4 {offsets = [32, 0], sizes = [16, 4], strides = [1, 1]} : vector<256x4xf32> to vector<16x4xf32>
    %9 = arith.addf %7, %8 : vector<16x4xf32>
    %10 = vector.extract_strided_slice %4 {offsets = [48, 0], sizes = [16, 4], strides = [1, 1]} : vector<256x4xf32> to vector<16x4xf32>
    %11 = arith.addf %9, %10 : vector<16x4xf32>
    %12 = vector.extract_strided_slice %4 {offsets = [64, 0], sizes = [16, 4], strides = [1, 1]} : vector<256x4xf32> to vector<16x4xf32>
    %13 = arith.addf %11, %12 : vector<16x4xf32>
    %14 = vector.extract_strided_slice %4 {offsets = [80, 0], sizes = [16, 4], strides = [1, 1]} : vector<256x4xf32> to vector<16x4xf32>
    %15 = arith.addf %13, %14 : vector<16x4xf32>
    %16 = vector.extract_strided_slice %4 {offsets = [96, 0], sizes = [16, 4], strides = [1, 1]} : vector<256x4xf32> to vector<16x4xf32>
    %17 = arith.addf %15, %16 : vector<16x4xf32>
    %18 = vector.extract_strided_slice %4 {offsets = [112, 0], sizes = [16, 4], strides = [1, 1]} : vector<256x4xf32> to vector<16x4xf32>
    %19 = arith.addf %17, %18 : vector<16x4xf32>
    %20 = vector.extract_strided_slice %4 {offsets = [128, 0], sizes = [16, 4], strides = [1, 1]} : vector<256x4xf32> to vector<16x4xf32>
    %21 = arith.addf %19, %20 : vector<16x4xf32>
    %22 = vector.extract_strided_slice %4 {offsets = [144, 0], sizes = [16, 4], strides = [1, 1]} : vector<256x4xf32> to vector<16x4xf32>
    %23 = arith.addf %21, %22 : vector<16x4xf32>
    %24 = vector.extract_strided_slice %4 {offsets = [160, 0], sizes = [16, 4], strides = [1, 1]} : vector<256x4xf32> to vector<16x4xf32>
    %25 = arith.addf %23, %24 : vector<16x4xf32>
    %26 = vector.extract_strided_slice %4 {offsets = [176, 0], sizes = [16, 4], strides = [1, 1]} : vector<256x4xf32> to vector<16x4xf32>
    %27 = arith.addf %25, %26 : vector<16x4xf32>
    %28 = vector.extract_strided_slice %4 {offsets = [192, 0], sizes = [16, 4], strides = [1, 1]} : vector<256x4xf32> to vector<16x4xf32>
    %29 = arith.addf %27, %28 : vector<16x4xf32>
    %30 = vector.extract_strided_slice %4 {offsets = [208, 0], sizes = [16, 4], strides = [1, 1]} : vector<256x4xf32> to vector<16x4xf32>
    %31 = arith.addf %29, %30 : vector<16x4xf32>
    %32 = vector.extract_strided_slice %4 {offsets = [224, 0], sizes = [16, 4], strides = [1, 1]} : vector<256x4xf32> to vector<16x4xf32>
    %33 = arith.addf %31, %32 : vector<16x4xf32>
    %34 = vector.extract_strided_slice %4 {offsets = [240, 0], sizes = [16, 4], strides = [1, 1]} : vector<256x4xf32> to vector<16x4xf32>
    %35 = arith.addf %33, %34 : vector<16x4xf32>
    %36 = vector.extract_strided_slice %4 {offsets = [240, 0], sizes = [16, 4], strides = [1, 1]} : vector<256x4xf32> to vector<16x4xf32>
    %37 = arith.subf %35, %36 : vector<16x4xf32>
    %38 = vector.extract_strided_slice %4 {offsets = [224, 0], sizes = [16, 4], strides = [1, 1]} : vector<256x4xf32> to vector<16x4xf32>
    %39 = arith.subf %37, %38 : vector<16x4xf32>
    %40 = vector.extract_strided_slice %4 {offsets = [0, 0], sizes = [16, 4], strides = [1, 1]} : vector<256x4xf32> to vector<16x4xf32>
    %41 = arith.subf %35, %40 : vector<16x4xf32>
    %42 = vector.extract_strided_slice %4 {offsets = [16, 0], sizes = [16, 4], strides = [1, 1]} : vector<256x4xf32> to vector<16x4xf32>
    %43 = arith.subf %41, %42 : vector<16x4xf32>
    %cst = arith.constant dense<0.000000e+00> : vector<4xf32>
    %44 = vector.multi_reduction <add>, %39, %cst [0] : vector<16x4xf32> to vector<4xf32>
    %45 = vector.shape_cast %44 : vector<4xf32> to vector<1x4xf32>
    %46 = vector.extract_strided_slice %39 {offsets = [15, 0], sizes = [1, 4], strides = [1, 1]} : vector<16x4xf32> to vector<1x4xf32>
    %47 = arith.subf %45, %46 : vector<1x4xf32>
    %48 = vector.extract_strided_slice %39 {offsets = [14, 0], sizes = [1, 4], strides = [1, 1]} : vector<16x4xf32> to vector<1x4xf32>
    %49 = arith.subf %47, %48 : vector<1x4xf32>
    %50 = vector.extract_strided_slice %39 {offsets = [0, 0], sizes = [1, 4], strides = [1, 1]} : vector<16x4xf32> to vector<1x4xf32>
    %51 = arith.subf %45, %50 : vector<1x4xf32>
    %52 = vector.extract_strided_slice %39 {offsets = [1, 0], sizes = [1, 4], strides = [1, 1]} : vector<16x4xf32> to vector<1x4xf32>
    %53 = arith.subf %51, %52 : vector<1x4xf32>
    %cst_5 = arith.constant dense<0.000000e+00> : vector<4xf32>
    %54 = vector.multi_reduction <add>, %37, %cst_5 [0] : vector<16x4xf32> to vector<4xf32>
    %55 = vector.shape_cast %54 : vector<4xf32> to vector<1x4xf32>
    %56 = vector.extract_strided_slice %37 {offsets = [15, 0], sizes = [1, 4], strides = [1, 1]} : vector<16x4xf32> to vector<1x4xf32>
    %57 = arith.subf %55, %56 : vector<1x4xf32>
    %58 = vector.extract_strided_slice %37 {offsets = [14, 0], sizes = [1, 4], strides = [1, 1]} : vector<16x4xf32> to vector<1x4xf32>
    %59 = arith.subf %57, %58 : vector<1x4xf32>
    %60 = vector.extract_strided_slice %37 {offsets = [0, 0], sizes = [1, 4], strides = [1, 1]} : vector<16x4xf32> to vector<1x4xf32>
    %61 = arith.subf %55, %60 : vector<1x4xf32>
    %62 = vector.extract_strided_slice %37 {offsets = [1, 0], sizes = [1, 4], strides = [1, 1]} : vector<16x4xf32> to vector<1x4xf32>
    %63 = arith.subf %61, %62 : vector<1x4xf32>
    %cst_6 = arith.constant dense<0.000000e+00> : vector<4xf32>
    %64 = vector.multi_reduction <add>, %35, %cst_6 [0] : vector<16x4xf32> to vector<4xf32>
    %65 = vector.shape_cast %64 : vector<4xf32> to vector<1x4xf32>
    %66 = vector.extract_strided_slice %35 {offsets = [15, 0], sizes = [1, 4], strides = [1, 1]} : vector<16x4xf32> to vector<1x4xf32>
    %67 = arith.subf %65, %66 : vector<1x4xf32>
    %68 = vector.extract_strided_slice %35 {offsets = [14, 0], sizes = [1, 4], strides = [1, 1]} : vector<16x4xf32> to vector<1x4xf32>
    %69 = arith.subf %67, %68 : vector<1x4xf32>
    %70 = vector.extract_strided_slice %35 {offsets = [0, 0], sizes = [1, 4], strides = [1, 1]} : vector<16x4xf32> to vector<1x4xf32>
    %71 = arith.subf %65, %70 : vector<1x4xf32>
    %72 = vector.extract_strided_slice %35 {offsets = [1, 0], sizes = [1, 4], strides = [1, 1]} : vector<16x4xf32> to vector<1x4xf32>
    %73 = arith.subf %71, %72 : vector<1x4xf32>
    %cst_7 = arith.constant dense<0.000000e+00> : vector<4xf32>
    %74 = vector.multi_reduction <add>, %41, %cst_7 [0] : vector<16x4xf32> to vector<4xf32>
    %75 = vector.shape_cast %74 : vector<4xf32> to vector<1x4xf32>
    %76 = vector.extract_strided_slice %41 {offsets = [15, 0], sizes = [1, 4], strides = [1, 1]} : vector<16x4xf32> to vector<1x4xf32>
    %77 = arith.subf %75, %76 : vector<1x4xf32>
    %78 = vector.extract_strided_slice %41 {offsets = [14, 0], sizes = [1, 4], strides = [1, 1]} : vector<16x4xf32> to vector<1x4xf32>
    %79 = arith.subf %77, %78 : vector<1x4xf32>
    %80 = vector.extract_strided_slice %41 {offsets = [0, 0], sizes = [1, 4], strides = [1, 1]} : vector<16x4xf32> to vector<1x4xf32>
    %81 = arith.subf %75, %80 : vector<1x4xf32>
    %82 = vector.extract_strided_slice %41 {offsets = [1, 0], sizes = [1, 4], strides = [1, 1]} : vector<16x4xf32> to vector<1x4xf32>
    %83 = arith.subf %81, %82 : vector<1x4xf32>
    %cst_8 = arith.constant dense<0.000000e+00> : vector<4xf32>
    %84 = vector.multi_reduction <add>, %43, %cst_8 [0] : vector<16x4xf32> to vector<4xf32>
    %85 = vector.shape_cast %84 : vector<4xf32> to vector<1x4xf32>
    %86 = vector.extract_strided_slice %43 {offsets = [15, 0], sizes = [1, 4], strides = [1, 1]} : vector<16x4xf32> to vector<1x4xf32>
    %87 = arith.subf %85, %86 : vector<1x4xf32>
    %88 = vector.extract_strided_slice %43 {offsets = [14, 0], sizes = [1, 4], strides = [1, 1]} : vector<16x4xf32> to vector<1x4xf32>
    %89 = arith.subf %87, %88 : vector<1x4xf32>
    %90 = vector.extract_strided_slice %43 {offsets = [0, 0], sizes = [1, 4], strides = [1, 1]} : vector<16x4xf32> to vector<1x4xf32>
    %91 = arith.subf %85, %90 : vector<1x4xf32>
    %92 = vector.extract_strided_slice %43 {offsets = [1, 0], sizes = [1, 4], strides = [1, 1]} : vector<16x4xf32> to vector<1x4xf32>
    %93 = arith.subf %91, %92 : vector<1x4xf32>
    %c1 = arith.constant 1 : index
    %c0_9 = arith.constant 0 : index
    %c0_10 = arith.constant 0 : index
    %94 = vector.load %arg1[%c1, %c0_9, %c0_10] : memref<2x256x4xf32, #tpu.memory_space<vmem>>, vector<1x256x4xf32>
    %95 = vector.shape_cast %94 : vector<1x256x4xf32> to vector<256x4xf32>
    %c1_11 = arith.constant 1 : index
    %c0_12 = arith.constant 0 : index
    %c0_13 = arith.constant 0 : index
    %96 = vector.load %arg2[%c1_11, %c0_12, %c0_13] : memref<2x256x4xf32, #tpu.memory_space<vmem>>, vector<1x256x4xf32>
    %97 = vector.shape_cast %96 : vector<1x256x4xf32> to vector<256x4xf32>
    %98 = arith.subf %95, %97 : vector<256x4xf32>
    %99 = vector.extract_strided_slice %98 {offsets = [0, 0], sizes = [16, 4], strides = [1, 1]} : vector<256x4xf32> to vector<16x4xf32>
    %100 = vector.extract_strided_slice %98 {offsets = [16, 0], sizes = [16, 4], strides = [1, 1]} : vector<256x4xf32> to vector<16x4xf32>
    %101 = arith.addf %99, %100 : vector<16x4xf32>
    %102 = vector.extract_strided_slice %98 {offsets = [32, 0], sizes = [16, 4], strides = [1, 1]} : vector<256x4xf32> to vector<16x4xf32>
    %103 = arith.addf %101, %102 : vector<16x4xf32>
    %104 = vector.extract_strided_slice %98 {offsets = [48, 0], sizes = [16, 4], strides = [1, 1]} : vector<256x4xf32> to vector<16x4xf32>
    %105 = arith.addf %103, %104 : vector<16x4xf32>
    %106 = vector.extract_strided_slice %98 {offsets = [64, 0], sizes = [16, 4], strides = [1, 1]} : vector<256x4xf32> to vector<16x4xf32>
    %107 = arith.addf %105, %106 : vector<16x4xf32>
    %108 = vector.extract_strided_slice %98 {offsets = [80, 0], sizes = [16, 4], strides = [1, 1]} : vector<256x4xf32> to vector<16x4xf32>
    %109 = arith.addf %107, %108 : vector<16x4xf32>
    %110 = vector.extract_strided_slice %98 {offsets = [96, 0], sizes = [16, 4], strides = [1, 1]} : vector<256x4xf32> to vector<16x4xf32>
    %111 = arith.addf %109, %110 : vector<16x4xf32>
    %112 = vector.extract_strided_slice %98 {offsets = [112, 0], sizes = [16, 4], strides = [1, 1]} : vector<256x4xf32> to vector<16x4xf32>
    %113 = arith.addf %111, %112 : vector<16x4xf32>
    %114 = vector.extract_strided_slice %98 {offsets = [128, 0], sizes = [16, 4], strides = [1, 1]} : vector<256x4xf32> to vector<16x4xf32>
    %115 = arith.addf %113, %114 : vector<16x4xf32>
    %116 = vector.extract_strided_slice %98 {offsets = [144, 0], sizes = [16, 4], strides = [1, 1]} : vector<256x4xf32> to vector<16x4xf32>
    %117 = arith.addf %115, %116 : vector<16x4xf32>
    %118 = vector.extract_strided_slice %98 {offsets = [160, 0], sizes = [16, 4], strides = [1, 1]} : vector<256x4xf32> to vector<16x4xf32>
    %119 = arith.addf %117, %118 : vector<16x4xf32>
    %120 = vector.extract_strided_slice %98 {offsets = [176, 0], sizes = [16, 4], strides = [1, 1]} : vector<256x4xf32> to vector<16x4xf32>
    %121 = arith.addf %119, %120 : vector<16x4xf32>
    %122 = vector.extract_strided_slice %98 {offsets = [192, 0], sizes = [16, 4], strides = [1, 1]} : vector<256x4xf32> to vector<16x4xf32>
    %123 = arith.addf %121, %122 : vector<16x4xf32>
    %124 = vector.extract_strided_slice %98 {offsets = [208, 0], sizes = [16, 4], strides = [1, 1]} : vector<256x4xf32> to vector<16x4xf32>
    %125 = arith.addf %123, %124 : vector<16x4xf32>
    %126 = vector.extract_strided_slice %98 {offsets = [224, 0], sizes = [16, 4], strides = [1, 1]} : vector<256x4xf32> to vector<16x4xf32>
    %127 = arith.addf %125, %126 : vector<16x4xf32>
    %128 = vector.extract_strided_slice %98 {offsets = [240, 0], sizes = [16, 4], strides = [1, 1]} : vector<256x4xf32> to vector<16x4xf32>
    %129 = arith.addf %127, %128 : vector<16x4xf32>
    %130 = vector.extract_strided_slice %98 {offsets = [240, 0], sizes = [16, 4], strides = [1, 1]} : vector<256x4xf32> to vector<16x4xf32>
    %131 = arith.subf %129, %130 : vector<16x4xf32>
    %132 = vector.extract_strided_slice %98 {offsets = [224, 0], sizes = [16, 4], strides = [1, 1]} : vector<256x4xf32> to vector<16x4xf32>
    %133 = arith.subf %131, %132 : vector<16x4xf32>
    %134 = vector.extract_strided_slice %98 {offsets = [0, 0], sizes = [16, 4], strides = [1, 1]} : vector<256x4xf32> to vector<16x4xf32>
    %135 = arith.subf %129, %134 : vector<16x4xf32>
    %136 = vector.extract_strided_slice %98 {offsets = [16, 0], sizes = [16, 4], strides = [1, 1]} : vector<256x4xf32> to vector<16x4xf32>
    %137 = arith.subf %135, %136 : vector<16x4xf32>
    %cst_14 = arith.constant dense<0.000000e+00> : vector<4xf32>
    %138 = vector.multi_reduction <add>, %133, %cst_14 [0] : vector<16x4xf32> to vector<4xf32>
    %139 = vector.shape_cast %138 : vector<4xf32> to vector<1x4xf32>
    %140 = vector.extract_strided_slice %133 {offsets = [15, 0], sizes = [1, 4], strides = [1, 1]} : vector<16x4xf32> to vector<1x4xf32>
    %141 = arith.subf %139, %140 : vector<1x4xf32>
    %142 = vector.extract_strided_slice %133 {offsets = [14, 0], sizes = [1, 4], strides = [1, 1]} : vector<16x4xf32> to vector<1x4xf32>
    %143 = arith.subf %141, %142 : vector<1x4xf32>
    %144 = vector.extract_strided_slice %133 {offsets = [0, 0], sizes = [1, 4], strides = [1, 1]} : vector<16x4xf32> to vector<1x4xf32>
    %145 = arith.subf %139, %144 : vector<1x4xf32>
    %146 = vector.extract_strided_slice %133 {offsets = [1, 0], sizes = [1, 4], strides = [1, 1]} : vector<16x4xf32> to vector<1x4xf32>
    %147 = arith.subf %145, %146 : vector<1x4xf32>
    %cst_15 = arith.constant dense<0.000000e+00> : vector<4xf32>
    %148 = vector.multi_reduction <add>, %131, %cst_15 [0] : vector<16x4xf32> to vector<4xf32>
    %149 = vector.shape_cast %148 : vector<4xf32> to vector<1x4xf32>
    %150 = vector.extract_strided_slice %131 {offsets = [15, 0], sizes = [1, 4], strides = [1, 1]} : vector<16x4xf32> to vector<1x4xf32>
    %151 = arith.subf %149, %150 : vector<1x4xf32>
    %152 = vector.extract_strided_slice %131 {offsets = [14, 0], sizes = [1, 4], strides = [1, 1]} : vector<16x4xf32> to vector<1x4xf32>
    %153 = arith.subf %151, %152 : vector<1x4xf32>
    %154 = vector.extract_strided_slice %131 {offsets = [0, 0], sizes = [1, 4], strides = [1, 1]} : vector<16x4xf32> to vector<1x4xf32>
    %155 = arith.subf %149, %154 : vector<1x4xf32>
    %156 = vector.extract_strided_slice %131 {offsets = [1, 0], sizes = [1, 4], strides = [1, 1]} : vector<16x4xf32> to vector<1x4xf32>
    %157 = arith.subf %155, %156 : vector<1x4xf32>
    %cst_16 = arith.constant dense<0.000000e+00> : vector<4xf32>
    %158 = vector.multi_reduction <add>, %129, %cst_16 [0] : vector<16x4xf32> to vector<4xf32>
    %159 = vector.shape_cast %158 : vector<4xf32> to vector<1x4xf32>
    %160 = vector.extract_strided_slice %129 {offsets = [15, 0], sizes = [1, 4], strides = [1, 1]} : vector<16x4xf32> to vector<1x4xf32>
    %161 = arith.subf %159, %160 : vector<1x4xf32>
    %162 = vector.extract_strided_slice %129 {offsets = [14, 0], sizes = [1, 4], strides = [1, 1]} : vector<16x4xf32> to vector<1x4xf32>
    %163 = arith.subf %161, %162 : vector<1x4xf32>
    %164 = vector.extract_strided_slice %129 {offsets = [0, 0], sizes = [1, 4], strides = [1, 1]} : vector<16x4xf32> to vector<1x4xf32>
    %165 = arith.subf %159, %164 : vector<1x4xf32>
    %166 = vector.extract_strided_slice %129 {offsets = [1, 0], sizes = [1, 4], strides = [1, 1]} : vector<16x4xf32> to vector<1x4xf32>
    %167 = arith.subf %165, %166 : vector<1x4xf32>
    %cst_17 = arith.constant dense<0.000000e+00> : vector<4xf32>
    %168 = vector.multi_reduction <add>, %135, %cst_17 [0] : vector<16x4xf32> to vector<4xf32>
    %169 = vector.shape_cast %168 : vector<4xf32> to vector<1x4xf32>
    %170 = vector.extract_strided_slice %135 {offsets = [15, 0], sizes = [1, 4], strides = [1, 1]} : vector<16x4xf32> to vector<1x4xf32>
    %171 = arith.subf %169, %170 : vector<1x4xf32>
    %172 = vector.extract_strided_slice %135 {offsets = [14, 0], sizes = [1, 4], strides = [1, 1]} : vector<16x4xf32> to vector<1x4xf32>
    %173 = arith.subf %171, %172 : vector<1x4xf32>
    %174 = vector.extract_strided_slice %135 {offsets = [0, 0], sizes = [1, 4], strides = [1, 1]} : vector<16x4xf32> to vector<1x4xf32>
    %175 = arith.subf %169, %174 : vector<1x4xf32>
    %176 = vector.extract_strided_slice %135 {offsets = [1, 0], sizes = [1, 4], strides = [1, 1]} : vector<16x4xf32> to vector<1x4xf32>
    %177 = arith.subf %175, %176 : vector<1x4xf32>
    %cst_18 = arith.constant dense<0.000000e+00> : vector<4xf32>
    %178 = vector.multi_reduction <add>, %137, %cst_18 [0] : vector<16x4xf32> to vector<4xf32>
    %179 = vector.shape_cast %178 : vector<4xf32> to vector<1x4xf32>
    %180 = vector.extract_strided_slice %137 {offsets = [15, 0], sizes = [1, 4], strides = [1, 1]} : vector<16x4xf32> to vector<1x4xf32>
    %181 = arith.subf %179, %180 : vector<1x4xf32>
    %182 = vector.extract_strided_slice %137 {offsets = [14, 0], sizes = [1, 4], strides = [1, 1]} : vector<16x4xf32> to vector<1x4xf32>
    %183 = arith.subf %181, %182 : vector<1x4xf32>
    %184 = vector.extract_strided_slice %137 {offsets = [0, 0], sizes = [1, 4], strides = [1, 1]} : vector<16x4xf32> to vector<1x4xf32>
    %185 = arith.subf %179, %184 : vector<1x4xf32>
    %186 = vector.extract_strided_slice %137 {offsets = [1, 0], sizes = [1, 4], strides = [1, 1]} : vector<16x4xf32> to vector<1x4xf32>
    %187 = arith.subf %185, %186 : vector<1x4xf32>
    %188 = tpu.concatenate %49, %47, %51, %59, %57, %61, %79, %77, %81 in 1 : vector<1x4xf32>, vector<1x4xf32>, vector<1x4xf32>, vector<1x4xf32>, vector<1x4xf32>, vector<1x4xf32>, vector<1x4xf32>, vector<1x4xf32>, vector<1x4xf32> -> vector<1x36xf32>
    %189 = tpu.concatenate %143, %141, %145, %153, %151, %155, %173, %171, %175 in 1 : vector<1x4xf32>, vector<1x4xf32>, vector<1x4xf32>, vector<1x4xf32>, vector<1x4xf32>, vector<1x4xf32>, vector<1x4xf32>, vector<1x4xf32>, vector<1x4xf32> -> vector<1x36xf32>
    %190 = tpu.concatenate %188, %189 in 0 : vector<1x36xf32>, vector<1x36xf32> -> vector<2x36xf32>
    %191 = arith.truncf %190 : vector<2x36xf32> to vector<2x36xbf16>
    %c0_19 = arith.constant 0 : index
    %c0_20 = arith.constant 0 : index
    %192 = vector.load %arg3[%c0_19, %c0_20] : memref<36x256xbf16, #tpu.memory_space<vmem>>, vector<36x256xbf16>
    %cst_21 = arith.constant dense<0.000000e+00> : vector<2x256xf32>
    %193 = tpu.matmul %191, %192, %cst_21 {dimension_numbers = #tpu.dot_dimension_numbers<[1], [0], [0], [1], [0, 0, 1, 1], [], []>} : vector<2x36xbf16>, vector<36x256xbf16>, vector<2x256xf32> -> vector<2x256xf32>
    %194 = tpu.concatenate %47, %45, %51, %57, %55, %61, %77, %75, %81 in 1 : vector<1x4xf32>, vector<1x4xf32>, vector<1x4xf32>, vector<1x4xf32>, vector<1x4xf32>, vector<1x4xf32>, vector<1x4xf32>, vector<1x4xf32>, vector<1x4xf32> -> vector<1x36xf32>
    %195 = tpu.concatenate %141, %139, %145, %151, %149, %155, %171, %169, %175 in 1 : vector<1x4xf32>, vector<1x4xf32>, vector<1x4xf32>, vector<1x4xf32>, vector<1x4xf32>, vector<1x4xf32>, vector<1x4xf32>, vector<1x4xf32>, vector<1x4xf32> -> vector<1x36xf32>
    %196 = tpu.concatenate %194, %195 in 0 : vector<1x36xf32>, vector<1x36xf32> -> vector<2x36xf32>
    %197 = arith.truncf %196 : vector<2x36xf32> to vector<2x36xbf16>
    %c0_22 = arith.constant 0 : index
    %c0_23 = arith.constant 0 : index
    %198 = vector.load %arg3[%c0_22, %c0_23] : memref<36x256xbf16, #tpu.memory_space<vmem>>, vector<36x256xbf16>
    %cst_24 = arith.constant dense<0.000000e+00> : vector<2x256xf32>
    %199 = tpu.matmul %197, %198, %cst_24 {dimension_numbers = #tpu.dot_dimension_numbers<[1], [0], [0], [1], [0, 0, 1, 1], [], []>} : vector<2x36xbf16>, vector<36x256xbf16>, vector<2x256xf32> -> vector<2x256xf32>
    %200 = tpu.concatenate %47, %51, %53, %57, %61, %63, %77, %81, %83 in 1 : vector<1x4xf32>, vector<1x4xf32>, vector<1x4xf32>, vector<1x4xf32>, vector<1x4xf32>, vector<1x4xf32>, vector<1x4xf32>, vector<1x4xf32>, vector<1x4xf32> -> vector<1x36xf32>
    %201 = tpu.concatenate %141, %145, %147, %151, %155, %157, %171, %175, %177 in 1 : vector<1x4xf32>, vector<1x4xf32>, vector<1x4xf32>, vector<1x4xf32>, vector<1x4xf32>, vector<1x4xf32>, vector<1x4xf32>, vector<1x4xf32>, vector<1x4xf32> -> vector<1x36xf32>
    %202 = tpu.concatenate %200, %201 in 0 : vector<1x36xf32>, vector<1x36xf32> -> vector<2x36xf32>
    %203 = arith.truncf %202 : vector<2x36xf32> to vector<2x36xbf16>
    %c0_25 = arith.constant 0 : index
    %c0_26 = arith.constant 0 : index
    %204 = vector.load %arg3[%c0_25, %c0_26] : memref<36x256xbf16, #tpu.memory_space<vmem>>, vector<36x256xbf16>
    %cst_27 = arith.constant dense<0.000000e+00> : vector<2x256xf32>
    %205 = tpu.matmul %203, %204, %cst_27 {dimension_numbers = #tpu.dot_dimension_numbers<[1], [0], [0], [1], [0, 0, 1, 1], [], []>} : vector<2x36xbf16>, vector<36x256xbf16>, vector<2x256xf32> -> vector<2x256xf32>
    %206 = tpu.concatenate %59, %57, %61, %69, %67, %71, %79, %77, %81 in 1 : vector<1x4xf32>, vector<1x4xf32>, vector<1x4xf32>, vector<1x4xf32>, vector<1x4xf32>, vector<1x4xf32>, vector<1x4xf32>, vector<1x4xf32>, vector<1x4xf32> -> vector<1x36xf32>
    %207 = tpu.concatenate %153, %151, %155, %163, %161, %165, %173, %171, %175 in 1 : vector<1x4xf32>, vector<1x4xf32>, vector<1x4xf32>, vector<1x4xf32>, vector<1x4xf32>, vector<1x4xf32>, vector<1x4xf32>, vector<1x4xf32>, vector<1x4xf32> -> vector<1x36xf32>
    %208 = tpu.concatenate %206, %207 in 0 : vector<1x36xf32>, vector<1x36xf32> -> vector<2x36xf32>
    %209 = arith.truncf %208 : vector<2x36xf32> to vector<2x36xbf16>
    %c0_28 = arith.constant 0 : index
    %c0_29 = arith.constant 0 : index
    %210 = vector.load %arg3[%c0_28, %c0_29] : memref<36x256xbf16, #tpu.memory_space<vmem>>, vector<36x256xbf16>
    %cst_30 = arith.constant dense<0.000000e+00> : vector<2x256xf32>
    %211 = tpu.matmul %209, %210, %cst_30 {dimension_numbers = #tpu.dot_dimension_numbers<[1], [0], [0], [1], [0, 0, 1, 1], [], []>} : vector<2x36xbf16>, vector<36x256xbf16>, vector<2x256xf32> -> vector<2x256xf32>
    %212 = tpu.concatenate %57, %55, %61, %67, %65, %71, %77, %75, %81 in 1 : vector<1x4xf32>, vector<1x4xf32>, vector<1x4xf32>, vector<1x4xf32>, vector<1x4xf32>, vector<1x4xf32>, vector<1x4xf32>, vector<1x4xf32>, vector<1x4xf32> -> vector<1x36xf32>
    %213 = tpu.concatenate %151, %149, %155, %161, %159, %165, %171, %169, %175 in 1 : vector<1x4xf32>, vector<1x4xf32>, vector<1x4xf32>, vector<1x4xf32>, vector<1x4xf32>, vector<1x4xf32>, vector<1x4xf32>, vector<1x4xf32>, vector<1x4xf32> -> vector<1x36xf32>
    %214 = tpu.concatenate %212, %213 in 0 : vector<1x36xf32>, vector<1x36xf32> -> vector<2x36xf32>
    %215 = arith.truncf %214 : vector<2x36xf32> to vector<2x36xbf16>
    %c0_31 = arith.constant 0 : index
    %c0_32 = arith.constant 0 : index
    %216 = vector.load %arg3[%c0_31, %c0_32] : memref<36x256xbf16, #tpu.memory_space<vmem>>, vector<36x256xbf16>
    %cst_33 = arith.constant dense<0.000000e+00> : vector<2x256xf32>
    %217 = tpu.matmul %215, %216, %cst_33 {dimension_numbers = #tpu.dot_dimension_numbers<[1], [0], [0], [1], [0, 0, 1, 1], [], []>} : vector<2x36xbf16>, vector<36x256xbf16>, vector<2x256xf32> -> vector<2x256xf32>
    %218 = tpu.concatenate %57, %61, %63, %67, %71, %73, %77, %81, %83 in 1 : vector<1x4xf32>, vector<1x4xf32>, vector<1x4xf32>, vector<1x4xf32>, vector<1x4xf32>, vector<1x4xf32>, vector<1x4xf32>, vector<1x4xf32>, vector<1x4xf32> -> vector<1x36xf32>
    %219 = tpu.concatenate %151, %155, %157, %161, %165, %167, %171, %175, %177 in 1 : vector<1x4xf32>, vector<1x4xf32>, vector<1x4xf32>, vector<1x4xf32>, vector<1x4xf32>, vector<1x4xf32>, vector<1x4xf32>, vector<1x4xf32>, vector<1x4xf32> -> vector<1x36xf32>
    %220 = tpu.concatenate %218, %219 in 0 : vector<1x36xf32>, vector<1x36xf32> -> vector<2x36xf32>
    %221 = arith.truncf %220 : vector<2x36xf32> to vector<2x36xbf16>
    %c0_34 = arith.constant 0 : index
    %c0_35 = arith.constant 0 : index
    %222 = vector.load %arg3[%c0_34, %c0_35] : memref<36x256xbf16, #tpu.memory_space<vmem>>, vector<36x256xbf16>
    %cst_36 = arith.constant dense<0.000000e+00> : vector<2x256xf32>
    %223 = tpu.matmul %221, %222, %cst_36 {dimension_numbers = #tpu.dot_dimension_numbers<[1], [0], [0], [1], [0, 0, 1, 1], [], []>} : vector<2x36xbf16>, vector<36x256xbf16>, vector<2x256xf32> -> vector<2x256xf32>
    %224 = tpu.concatenate %59, %57, %61, %79, %77, %81, %89, %87, %91 in 1 : vector<1x4xf32>, vector<1x4xf32>, vector<1x4xf32>, vector<1x4xf32>, vector<1x4xf32>, vector<1x4xf32>, vector<1x4xf32>, vector<1x4xf32>, vector<1x4xf32> -> vector<1x36xf32>
    %225 = tpu.concatenate %153, %151, %155, %173, %171, %175, %183, %181, %185 in 1 : vector<1x4xf32>, vector<1x4xf32>, vector<1x4xf32>, vector<1x4xf32>, vector<1x4xf32>, vector<1x4xf32>, vector<1x4xf32>, vector<1x4xf32>, vector<1x4xf32> -> vector<1x36xf32>
    %226 = tpu.concatenate %224, %225 in 0 : vector<1x36xf32>, vector<1x36xf32> -> vector<2x36xf32>
    %227 = arith.truncf %226 : vector<2x36xf32> to vector<2x36xbf16>
    %c0_37 = arith.constant 0 : index
    %c0_38 = arith.constant 0 : index
    %228 = vector.load %arg3[%c0_37, %c0_38] : memref<36x256xbf16, #tpu.memory_space<vmem>>, vector<36x256xbf16>
    %cst_39 = arith.constant dense<0.000000e+00> : vector<2x256xf32>
    %229 = tpu.matmul %227, %228, %cst_39 {dimension_numbers = #tpu.dot_dimension_numbers<[1], [0], [0], [1], [0, 0, 1, 1], [], []>} : vector<2x36xbf16>, vector<36x256xbf16>, vector<2x256xf32> -> vector<2x256xf32>
    %230 = tpu.concatenate %57, %55, %61, %77, %75, %81, %87, %85, %91 in 1 : vector<1x4xf32>, vector<1x4xf32>, vector<1x4xf32>, vector<1x4xf32>, vector<1x4xf32>, vector<1x4xf32>, vector<1x4xf32>, vector<1x4xf32>, vector<1x4xf32> -> vector<1x36xf32>
    %231 = tpu.concatenate %151, %149, %155, %171, %169, %175, %181, %179, %185 in 1 : vector<1x4xf32>, vector<1x4xf32>, vector<1x4xf32>, vector<1x4xf32>, vector<1x4xf32>, vector<1x4xf32>, vector<1x4xf32>, vector<1x4xf32>, vector<1x4xf32> -> vector<1x36xf32>
    %232 = tpu.concatenate %230, %231 in 0 : vector<1x36xf32>, vector<1x36xf32> -> vector<2x36xf32>
    %233 = arith.truncf %232 : vector<2x36xf32> to vector<2x36xbf16>
    %c0_40 = arith.constant 0 : index
    %c0_41 = arith.constant 0 : index
    %234 = vector.load %arg3[%c0_40, %c0_41] : memref<36x256xbf16, #tpu.memory_space<vmem>>, vector<36x256xbf16>
    %cst_42 = arith.constant dense<0.000000e+00> : vector<2x256xf32>
    %235 = tpu.matmul %233, %234, %cst_42 {dimension_numbers = #tpu.dot_dimension_numbers<[1], [0], [0], [1], [0, 0, 1, 1], [], []>} : vector<2x36xbf16>, vector<36x256xbf16>, vector<2x256xf32> -> vector<2x256xf32>
    %236 = tpu.concatenate %57, %61, %63, %77, %81, %83, %87, %91, %93 in 1 : vector<1x4xf32>, vector<1x4xf32>, vector<1x4xf32>, vector<1x4xf32>, vector<1x4xf32>, vector<1x4xf32>, vector<1x4xf32>, vector<1x4xf32>, vector<1x4xf32> -> vector<1x36xf32>
    %237 = tpu.concatenate %151, %155, %157, %171, %175, %177, %181, %185, %187 in 1 : vector<1x4xf32>, vector<1x4xf32>, vector<1x4xf32>, vector<1x4xf32>, vector<1x4xf32>, vector<1x4xf32>, vector<1x4xf32>, vector<1x4xf32>, vector<1x4xf32> -> vector<1x36xf32>
    %238 = tpu.concatenate %236, %237 in 0 : vector<1x36xf32>, vector<1x36xf32> -> vector<2x36xf32>
    %239 = arith.truncf %238 : vector<2x36xf32> to vector<2x36xbf16>
    %c0_43 = arith.constant 0 : index
    %c0_44 = arith.constant 0 : index
    %240 = vector.load %arg3[%c0_43, %c0_44] : memref<36x256xbf16, #tpu.memory_space<vmem>>, vector<36x256xbf16>
    %cst_45 = arith.constant dense<0.000000e+00> : vector<2x256xf32>
    %241 = tpu.matmul %239, %240, %cst_45 {dimension_numbers = #tpu.dot_dimension_numbers<[1], [0], [0], [1], [0, 0, 1, 1], [], []>} : vector<2x36xbf16>, vector<36x256xbf16>, vector<2x256xf32> -> vector<2x256xf32>
    %242 = tpu.concatenate %193, %199, %205, %211, %217, %223, %229, %235, %241 in 1 : vector<2x256xf32>, vector<2x256xf32>, vector<2x256xf32>, vector<2x256xf32>, vector<2x256xf32>, vector<2x256xf32>, vector<2x256xf32>, vector<2x256xf32>, vector<2x256xf32> -> vector<2x2304xf32>
    %243 = arith.truncf %242 : vector<2x2304xf32> to vector<2x2304xbf16>
    %c0_46 = arith.constant 0 : index
    %c0_47 = arith.constant 0 : index
    %244 = vector.load %arg4[%c0_46, %c0_47] : memref<2304x256xbf16, #tpu.memory_space<vmem>>, vector<2304x256xbf16>
    %cst_48 = arith.constant dense<0.000000e+00> : vector<2x256xf32>
    %245 = tpu.matmul %243, %244, %cst_48 {dimension_numbers = #tpu.dot_dimension_numbers<[1], [0], [0], [1], [0, 0, 1, 1], [], []>} : vector<2x2304xbf16>, vector<2304x256xbf16>, vector<2x256xf32> -> vector<2x256xf32>
    %cst_49 = arith.constant 3.906250e-03 : f32
    %246 = vector.broadcast %cst_49 : f32 to vector<2x256xf32>
    %247 = arith.mulf %245, %246 : vector<2x256xf32>
    %c0_50 = arith.constant 0 : index
    %c0_51 = arith.constant 0 : index
    %248 = vector.load %arg5[%c0_50, %c0_51] : memref<1x256xf32, #tpu.memory_space<vmem>>, vector<1x256xf32>
    %249 = vector.broadcast %248 : vector<1x256xf32> to vector<2x256xf32>
    %250 = arith.addf %247, %249 : vector<2x256xf32>
    %c0_52 = arith.constant 0 : index
    %c0_53 = arith.constant 0 : index
    %251 = vector.load %arg6[%c0_52, %c0_53] : memref<1x256xf32, #tpu.memory_space<vmem>>, vector<1x256xf32>
    %252 = vector.broadcast %251 : vector<1x256xf32> to vector<2x256xf32>
    %253 = arith.mulf %250, %252 : vector<2x256xf32>
    %cst_54 = arith.constant dense<0.000000e+00> : vector<2xf32>
    %254 = vector.multi_reduction <add>, %253, %cst_54 [1] : vector<2x256xf32> to vector<2xf32>
    %255 = vector.shape_cast %254 : vector<2xf32> to vector<2x1xf32>
    %c0_55 = arith.constant 0 : index
    %c0_56 = arith.constant 0 : index
    %256 = vector.load %arg7[%c0_55, %c0_56] : memref<1x1xf32, #tpu.memory_space<vmem>>, vector<1x1xf32>
    %257 = vector.broadcast %256 : vector<1x1xf32> to vector<2x1xf32>
    %258 = arith.addf %255, %257 : vector<2x1xf32>
    %c0_57 = arith.constant 0 : index
    %c0_58 = arith.constant 0 : index
    %259 = vector.load %arg8[%c0_57, %c0_58] : memref<2x1xf32, #tpu.memory_space<vmem>>, vector<2x1xf32>
    tpu.vector_store %arg8[%c0_57, %c0_58], %258 {strides = array<i32>} : memref<2x1xf32, #tpu.memory_space<vmem>>, vector<2x1xf32>,
    return
  }
  func.func @transform_0(%arg0: i32) -> (i32, i32, i32) {
    %c0_i32 = arith.constant 0 : i32
    %c0_i32_0 = arith.constant 0 : i32
    %c0_i32_1 = arith.constant 0 : i32
    %c0_i32_2 = arith.constant 0 : i32
    return %c0_i32, %c0_i32_0, %c0_i32_1 : i32, i32, i32
  }
  func.func @transform_1(%arg0: i32) -> (i32, i32, i32) {
    %c0_i32 = arith.constant 0 : i32
    %c0_i32_0 = arith.constant 0 : i32
    %c0_i32_1 = arith.constant 0 : i32
    %c0_i32_2 = arith.constant 0 : i32
    return %c0_i32, %c0_i32_0, %c0_i32_1 : i32, i32, i32
  }
  func.func @transform_2(%arg0: i32) -> (i32, i32) {
    %c0_i32 = arith.constant 0 : i32
    %c0_i32_0 = arith.constant 0 : i32
    %c0_i32_1 = arith.constant 0 : i32
    return %c0_i32, %c0_i32_0 : i32, i32
  }
  func.func @transform_3(%arg0: i32) -> (i32, i32) {
    %c0_i32 = arith.constant 0 : i32
    %c0_i32_0 = arith.constant 0 : i32
    %c0_i32_1 = arith.constant 0 : i32
    return %c0_i32, %c0_i32_0 : i32, i32
  }
  func.func @transform_4(%arg0: i32) -> (i32, i32) {
    %c0_i32 = arith.constant 0 : i32
    %c0_i32_0 = arith.constant 0 : i32
    %c0_i32_1 = arith.constant 0 : i32
    return %c0_i32, %c0_i32_0 : i32, i32
  }
  func.func @transform_5(%arg0: i32) -> (i32, i32) {
    %c0_i32 = arith.constant 0 : i32
    %c0_i32_0 = arith.constant 0 : i32
    %c0_i32_1 = arith.constant 0 : i32
    return %c0_i32, %c0_i32_0 : i32, i32
  }
  func.func @transform_6(%arg0: i32) -> (i32, i32) {
    %c0_i32 = arith.constant 0 : i32
    %c0_i32_0 = arith.constant 0 : i32
    %c0_i32_1 = arith.constant 0 : i32
    return %c0_i32, %c0_i32_0 : i32, i32
  }
  func.func @transform_7(%arg0: i32) -> (i32, i32) {
    %c0_i32 = arith.constant 0 : i32
    %c0_i32_0 = arith.constant 0 : i32
    %c0_i32_1 = arith.constant 0 : i32
    return %c0_i32, %c0_i32_0 : i32, i32
  }
}

</mosaic_0001>

<bundles_post_ra>
// kernel: adaptive_scheduler.1
= control target key start
LH: loop header
LB: loop body
LE: loop exit
PB: predicated region body
PF: predicated region fallthrough
CT: control target
= control target key end

     0   :  { %vm163_vm0 = vcmask 31744   ;;  %s4695_s27 = smov 12   ;;  %s4696_s28 = smov 8   ;;  %vm626_vm1 = vcmask 1041408   ;;  %vm526_vm2 = vcmask 64512   ;;  %vm528_vm3 = vcmask 97280   ;;  %s6881_s0 = inlined_call_operand.vmem [shape: f32[2,256,4], index: 0, kind: input, shape index: {}]   ;;  %s6882_s1 = inlined_call_operand.vmem [shape: f32[2,256,4], index: 1, kind: input, shape index: {}]   ;;  %s6883_s2 = inlined_call_operand.vmem [shape: bf16[36,256], index: 2, kind: input, shape index: {}]   ;;  %s6884_s3 = inlined_call_operand.vmem [shape: bf16[2304,256], index: 3, kind: input, shape index: {}]   ;;  %s6885_s6 = inlined_call_operand.<no memory space> [shape: f32[1,1], index: 6, kind: input, shape index: {}]   ;;  %s6886_s4 = inlined_call_operand.vmem [shape: f32[1,256], index: 4, kind: input, shape index: {}]   ;;  %s6887_s5 = inlined_call_operand.vmem [shape: f32[1,256], index: 5, kind: input, shape index: {}]   ;;  %s6888_s7 = inlined_call_operand.vmem [shape: f32[2,1], index: 7, kind: output, shape index: {}]  }
   0x1   :  { %v29_v0 = vld [vmem:[%s6881_s0] sm:$0xff]  ;;  %v30_v1 = vld [vmem:[%s6881_s0 + $0x8] sm:$0xff]  ;;  %v31_v2 = vld [vmem:[%s6881_s0 + $0x10] sm:$0xff]  ;;  %s4697_s8 = smov 24   ;;  %s4698_s9 = smov 20   ;;  %vm530_vm4 = vcmask 130048  }
   0x2   :  { %v32_v3 = vld [vmem:[%s6881_s0 + $0x18] sm:$0xff]  ;;  %v33_v4 = vld [vmem:[%s6881_s0 + $0x20] sm:$0xff]  ;;  %v34_v5 = vld [vmem:[%s6881_s0 + $0x28] sm:$0xff]  ;;  %s4699_s12 = smov 32   ;;  %s4700_s13 = smov 28   ;;  %vm532_vm5 = vcmask 162816  }
   0x3   :  { %v35_v6 = vld [vmem:[%s6881_s0 + $0x30] sm:$0xff]  ;;  %v36_v7 = vld [vmem:[%s6881_s0 + $0x38] sm:$0xff]  ;;  %v61_v8 = vld [vmem:[%s6882_s1] sm:$0xff]  ;;  %vm534_vm6 = vcmask 195584   ;;  %vm536_vm7 = vcmask 228352   ;;  %vm538_vm8 = vcmask 261120  }
   0x4   :  { %v62_v9 = vld [vmem:[%s6882_s1 + $0x8] sm:$0xff]  ;;  %v63_v10 = vld [vmem:[%s6882_s1 + $0x10] sm:$0xff]  ;;  %v64_v11 = vld [vmem:[%s6882_s1 + $0x18] sm:$0xff]  ;;  %v4778_v12 = vsub.f32 %v29_v0, %v61_v8  ;;  %vm589_vm9 = vcmask 1040384   ;;  %vm622_vm10 = vcmask 293888   ;;  %vm3632_vm11 = vcmask 1024  }
   0x5   :  { %v65_v13 = vld [vmem:[%s6882_s1 + $0x20] sm:$0xff]  ;;  %v66_v14 = vld [vmem:[%s6882_s1 + $0x28] sm:$0xff]  ;;  %v67_v15 = vld [vmem:[%s6882_s1 + $0x30] sm:$0xff]  ;;  %v4789_v16 = vsub.f32 %v30_v1, %v62_v9  ;;  %v4791_v17 = vsub.f32 %v31_v2, %v63_v10  ;;  %v4793_v18 = vsub.f32 %v32_v3, %v64_v11 }
   0x6   :  { %v37_v19 = vld [vmem:[%s6881_s0 + $0x40] sm:$0xff]  ;;  %v68_v20 = vld [vmem:[%s6882_s1 + $0x38] sm:$0xff]  ;;  %v97_v22 = vsub.f32 %v33_v4, %v65_v13  ;;  %v98_v23 = vsub.f32 %v34_v5, %v66_v14  ;;  %v38_v24 = vld [vmem:[%s6881_s0 + $0x48] sm:$0xff]  ;;  %v99_v26 = vsub.f32 %v35_v6, %v67_v15 }
   0x7   :  { %v69_v21 = vld [vmem:[%s6882_s1 + $0x40] sm:$0xff]  ;;  %v70_v25 = vld [vmem:[%s6882_s1 + $0x48] sm:$0xff]  ;;  %v125_v27 = vadd.f32 %v4791_v17, %v4778_v12  ;;  %v39_v28 = vld [vmem:[%s6881_s0 + $0x50] sm:$0xff]  ;;  %v100_v30 = vsub.f32 %v36_v7, %v68_v20  ;;  %v126_v31 = vadd.f32 %v4793_v18, %v4789_v16 }
   0x8   :  { %v71_v29 = vld [vmem:[%s6882_s1 + $0x50] sm:$0xff]  ;;  %v40_v32 = vld [vmem:[%s6881_s0 + $0x58] sm:$0xff]  ;;  %v101_v34 = vsub.f32 %v37_v19, %v69_v21  ;;  %v41_v36 = vld [vmem:[%s6881_s0 + $0x60] sm:$0xff]  ;;  %v102_v38 = vsub.f32 %v38_v24, %v70_v25 }
   0x9   :  { %v72_v33 = vld [vmem:[%s6882_s1 + $0x58] sm:$0xff]  ;;  %v127_v35 = vadd.f32 %v125_v27, %v97_v22  ;;  %v73_v37 = vld [vmem:[%s6882_s1 + $0x60] sm:$0xff]  ;;  %v128_v39 = vadd.f32 %v126_v31, %v98_v23  ;;  %v42_v40 = vld [vmem:[%s6881_s0 + $0x68] sm:$0xff]  ;;  %v103_v42 = vsub.f32 %v39_v28, %v71_v29 }
   0xa   :  { %v74_v41 = vld [vmem:[%s6882_s1 + $0x68] sm:$0xff]  ;;  %v43_v44 = vld [vmem:[%s6881_s0 + $0x70] sm:$0xff]  ;;  %v104_v46 = vsub.f32 %v40_v32, %v72_v33  ;;  %v44_v48 = vld [vmem:[%s6881_s0 + $0x78] sm:$0xff]  ;;  %v105_v50 = vsub.f32 %v41_v36, %v73_v37 }
   0xb   :  { %v129_v43 = vadd.f32 %v127_v35, %v99_v26  ;;  %v75_v45 = vld [vmem:[%s6882_s1 + $0x70] sm:$0xff]  ;;  %v130_v47 = vadd.f32 %v128_v39, %v100_v30  ;;  %v76_v49 = vld [vmem:[%s6882_s1 + $0x78] sm:$0xff]  ;;  %v45_v52 = vld [vmem:[%s6881_s0 + $0x80] sm:$0xff]  ;;  %v106_v54 = vsub.f32 %v42_v40, %v74_v41 }
   0xc   :  { %v77_v53 = vld [vmem:[%s6882_s1 + $0x80] sm:$0xff]  ;;  %v46_v56 = vld [vmem:[%s6881_s0 + $0x88] sm:$0xff]  ;;  %v107_v58 = vsub.f32 %v43_v44, %v75_v45  ;;  %v47_v60 = vld [vmem:[%s6881_s0 + $0x90] sm:$0xff]  ;;  %v108_v62 = vsub.f32 %v44_v48, %v76_v49 }
   0xd   :  { %v131_v51 = vadd.f32 %v129_v43, %v101_v34  ;;  %v132_v55 = vadd.f32 %v130_v47, %v102_v38  ;;  %v78_v57 = vld [vmem:[%s6882_s1 + $0x88] sm:$0xff]  ;;  %v79_v61 = vld [vmem:[%s6882_s1 + $0x90] sm:$0xff]  ;;  %v48_v0 = vld [vmem:[%s6881_s0 + $0x98] sm:$0xff]  ;;  %v109_v2 = vsub.f32 %v45_v52, %v77_v53 }
   0xe   :  { %v80_v1 = vld [vmem:[%s6882_s1 + $0x98] sm:$0xff]  ;;  %v49_v4 = vld [vmem:[%s6881_s0 + $0xa0] sm:$0xff]  ;;  %v110_v6 = vsub.f32 %v46_v56, %v78_v57  ;;  %v50_v8 = vld [vmem:[%s6881_s0 + $0xa8] sm:$0xff]  ;;  %v111_v10 = vsub.f32 %v47_v60, %v79_v61 }
   0xf   :  { %v133_v59 = vadd.f32 %v131_v51, %v103_v42  ;;  %v134_v63 = vadd.f32 %v132_v55, %v104_v46  ;;  %v81_v5 = vld [vmem:[%s6882_s1 + $0xa0] sm:$0xff]  ;;  %v82_v9 = vld [vmem:[%s6882_s1 + $0xa8] sm:$0xff]  ;;  %v51_v13 = vld [vmem:[%s6881_s0 + $0xb0] sm:$0xff]  ;;  %v112_v15 = vsub.f32 %v48_v0, %v80_v1 }
  0x10   :  { %v83_v14 = vld [vmem:[%s6882_s1 + $0xb0] sm:$0xff]  ;;  %v52_v20 = vld [vmem:[%s6881_s0 + $0xb8] sm:$0xff]  ;;  %v113_v22 = vsub.f32 %v49_v4, %v81_v5  ;;  %v53_v24 = vld [vmem:[%s6881_s0 + $0xc0] sm:$0xff]  ;;  %v114_v26 = vsub.f32 %v50_v8, %v82_v9 }
  0x11   :  { %v135_v3 = vadd.f32 %v133_v59, %v105_v50  ;;  %v136_v7 = vadd.f32 %v134_v63, %v106_v54  ;;  %v84_v21 = vld [vmem:[%s6882_s1 + $0xb8] sm:$0xff]  ;;  %v85_v25 = vld [vmem:[%s6882_s1 + $0xc0] sm:$0xff]  ;;  %v54_v28 = vld [vmem:[%s6881_s0 + $0xc8] sm:$0xff]  ;;  %v115_v30 = vsub.f32 %v51_v13, %v83_v14 }
  0x12   :  { %v86_v29 = vld [vmem:[%s6882_s1 + $0xc8] sm:$0xff]  ;;  %v55_v32 = vld [vmem:[%s6881_s0 + $0xd0] sm:$0xff]  ;;  %v116_v34 = vsub.f32 %v52_v20, %v84_v21  ;;  %v56_v36 = vld [vmem:[%s6881_s0 + $0xd8] sm:$0xff]  ;;  %v117_v39 = vsub.f32 %v53_v24, %v85_v25 }
  0x13   :  { %v137_v11 = vadd.f32 %v135_v3, %v107_v58  ;;  %v138_v19 = vadd.f32 %v136_v7, %v108_v62  ;;  %v87_v33 = vld [vmem:[%s6882_s1 + $0xd0] sm:$0xff]  ;;  %v57_v37 = vld [vmem:[%s6881_s0 + $0xe0] sm:$0xff]  ;;  %v88_v38 = vld [vmem:[%s6882_s1 + $0xd8] sm:$0xff]  ;;  %v118_v44 = vsub.f32 %v54_v28, %v86_v29 }
  0x14   :  { %v58_v41 = vld [vmem:[%s6881_s0 + $0xe8] sm:$0xff]  ;;  %v59_v42 = vld [vmem:[%s6881_s0 + $0xf0] sm:$0xff]  ;;  %v89_v43 = vld [vmem:[%s6882_s1 + $0xe0] sm:$0xff]  ;;  %v119_v49 = vsub.f32 %v55_v32, %v87_v33  ;;  %v120_v52 = vsub.f32 %v56_v36, %v88_v38 }
  0x15   :  { %v139_v23 = vadd.f32 %v137_v11, %v109_v2  ;;  %v140_v27 = vadd.f32 %v138_v19, %v110_v6  ;;  %v60_v46 = vld [vmem:[%s6881_s0 + $0xf8] sm:$0xff]  ;;  %v90_v47 = vld [vmem:[%s6882_s1 + $0xe8] sm:$0xff]  ;;  %v91_v48 = vld [vmem:[%s6882_s1 + $0xf0] sm:$0xff]  ;;  %v4952_v56 = vsub.f32 %v57_v37, %v89_v43 }
  0x16   :  { %v92_v51 = vld [vmem:[%s6882_s1 + $0xf8] sm:$0xff]  ;;  %v3638_v54 = vld [vmem:[%s6881_s0 + $0x100] sm:$0xff]  ;;  %v3639_v55 = vld [vmem:[%s6881_s0 + $0x108] sm:$0xff]  ;;  %v4963_v61 = vsub.f32 %v58_v41, %v90_v47  ;;  %v123_v2 = vsub.f32 %v59_v42, %v91_v48 }
  0x17   :  { %v141_v31 = vadd.f32 %v139_v23, %v111_v10  ;;  %v142_v35 = vadd.f32 %v140_v27, %v112_v15  ;;  %v3640_v58 = vld [vmem:[%s6881_s0 + $0x110] sm:$0xff]  ;;  %v3670_v59 = vld [vmem:[%s6882_s1 + $0x100] sm:$0xff]  ;;  %v3641_v63 = vld [vmem:[%s6881_s0 + $0x118] sm:$0xff]  ;;  %v124_v6 = vsub.f32 %v60_v46, %v92_v51 }
  0x18   :  { %v3672_v60 = vld [vmem:[%s6882_s1 + $0x110] sm:$0xff]  ;;  %v3671_v0 = vld [vmem:[%s6882_s1 + $0x108] sm:$0xff]  ;;  %v3673_v1 = vld [vmem:[%s6882_s1 + $0x118] sm:$0xff]  ;;  %v4986_v10 = vsub.f32 %v3638_v54, %v3670_v59 }
  0x19   :  { %v143_v40 = vadd.f32 %v141_v31, %v113_v22  ;;  %v144_v45 = vadd.f32 %v142_v35, %v114_v26  ;;  %v3642_v4 = vld [vmem:[%s6881_s0 + $0x120] sm:$0xff]  ;;  %v3643_v8 = vld [vmem:[%s6881_s0 + $0x128] sm:$0xff]  ;;  %v4988_v11 = vsub.f32 %v3640_v58, %v3672_v60  ;;  %v3644_v14 = vld [vmem:[%s6881_s0 + $0x130] sm:$0xff]  ;;  %v4997_v19 = vsub.f32 %v3639_v55, %v3671_v0 }
  0x1a   :  { %v3674_v5 = vld [vmem:[%s6882_s1 + $0x120] sm:$0xff]  ;;  %v3675_v9 = vld [vmem:[%s6882_s1 + $0x128] sm:$0xff]  ;;  %v3676_v15 = vld [vmem:[%s6882_s1 + $0x130] sm:$0xff]  ;;  %v4999_v20 = vsub.f32 %v3641_v63, %v3673_v1 }
  0x1b   :  { %v145_v50 = vadd.f32 %v143_v40, %v115_v30  ;;  %v146_v53 = vadd.f32 %v144_v45, %v116_v34  ;;  %v3645_v22 = vld [vmem:[%s6881_s0 + $0x138] sm:$0xff]  ;;  %v329_v24 = vsub.f32 %v3642_v4, %v3674_v5  ;;  %v3646_v26 = vld [vmem:[%s6881_s0 + $0x140] sm:$0xff]  ;;  %v330_v28 = vsub.f32 %v3643_v8, %v3675_v9  ;;  %v3647_v30 = vld [vmem:[%s6881_s0 + $0x148] sm:$0xff] }
  0x1c   :  { %v3677_v23 = vld [vmem:[%s6882_s1 + $0x138] sm:$0xff]  ;;  %v3678_v27 = vld [vmem:[%s6882_s1 + $0x140] sm:$0xff]  ;;  %v3679_v31 = vld [vmem:[%s6882_s1 + $0x148] sm:$0xff]  ;;  %v331_v32 = vsub.f32 %v3644_v14, %v3676_v15  ;;  %v357_v33 = vadd.f32 %v4988_v11, %v4986_v10  ;;  %v358_v37 = vadd.f32 %v4999_v20, %v4997_v19 }
  0x1d   :  { %v147_v57 = vadd.f32 %v145_v50, %v117_v39  ;;  %v148_v62 = vadd.f32 %v146_v53, %v118_v44  ;;  %v3648_v34 = vld [vmem:[%s6881_s0 + $0x150] sm:$0xff]  ;;  %v332_v36 = vsub.f32 %v3645_v22, %v3677_v23  ;;  %v3649_v38 = vld [vmem:[%s6881_s0 + $0x158] sm:$0xff]  ;;  %v3650_v39 = vld [vmem:[%s6881_s0 + $0x160] sm:$0xff]  ;;  %v333_v41 = vsub.f32 %v3646_v26, %v3678_v27 }
  0x1e   :  { %v3680_v35 = vld [vmem:[%s6882_s1 + $0x150] sm:$0xff]  ;;  %v3681_v40 = vld [vmem:[%s6882_s1 + $0x158] sm:$0xff]  ;;  %v359_v42 = vadd.f32 %v357_v33, %v329_v24  ;;  %v3651_v44 = vld [vmem:[%s6881_s0 + $0x168] sm:$0xff]  ;;  %v334_v47 = vsub.f32 %v3647_v30, %v3679_v31  ;;  %v360_v48 = vadd.f32 %v358_v37, %v330_v28 }
  0x1f   :  { %v149_v3 = vadd.f32 %v147_v57, %v119_v49  ;;  %v150_v7 = vadd.f32 %v148_v62, %v120_v52  ;;  %v3682_v45 = vld [vmem:[%s6882_s1 + $0x160] sm:$0xff]  ;;  %v3683_v46 = vld [vmem:[%s6882_s1 + $0x168] sm:$0xff]  ;;  %v3652_v50 = vld [vmem:[%s6881_s0 + $0x170] sm:$0xff]  ;;  %v335_v52 = vsub.f32 %v3648_v34, %v3680_v35  ;;  %v336_v58 = vsub.f32 %v3649_v38, %v3681_v40 }
  0x20   :  { %v3653_v51 = vld [vmem:[%s6881_s0 + $0x178] sm:$0xff]  ;;  %v361_v53 = vadd.f32 %v359_v42, %v331_v32  ;;  %v3654_v54 = vld [vmem:[%s6881_s0 + $0x180] sm:$0xff]  ;;  %v3655_v55 = vld [vmem:[%s6881_s0 + $0x188] sm:$0xff]  ;;  %v362_v59 = vadd.f32 %v360_v48, %v332_v36  ;;  %v337_v0 = vsub.f32 %v3650_v39, %v3682_v45  ;;  %v338_v1 = vsub.f32 %v3651_v44, %v3683_v46 }
  0x21   :  { %v151_v13 = vadd.f32 %v149_v3, %v4952_v56  ;;  %v152_v21 = vadd.f32 %v150_v7, %v4963_v61  ;;  %v3684_v57 = vld [vmem:[%s6882_s1 + $0x170] sm:$0xff]  ;;  %v3685_v60 = vld [vmem:[%s6882_s1 + $0x178] sm:$0xff]  ;;  %v3686_v62 = vld [vmem:[%s6882_s1 + $0x180] sm:$0xff] }
  0x22   :  { %v3687_v63 = vld [vmem:[%s6882_s1 + $0x188] sm:$0xff]  ;;  %v3656_v4 = vld [vmem:[%s6881_s0 + $0x190] sm:$0xff]  ;;  %v339_v9 = vsub.f32 %v3652_v50, %v3684_v57  ;;  %v3657_v14 = vld [vmem:[%s6881_s0 + $0x198] sm:$0xff]  ;;  %v340_v15 = vsub.f32 %v3653_v51, %v3685_v60 }
  0x23   :  { %v5008_v25 = vadd.f32 %v151_v13, %v123_v2  ;;  %v5016_v29 = vadd.f32 %v152_v21, %v124_v6  ;;  %v3688_v5 = vld [vmem:[%s6882_s1 + $0x190] sm:$0xff]  ;;  %v341_v21 = vsub.f32 %v3654_v54, %v3686_v62  ;;  %v342_v22 = vsub.f32 %v3655_v55, %v3687_v63  ;;  %v3689_v24 = vld [vmem:[%s6882_s1 + $0x198] sm:$0xff]  ;;  %v3690_v26 = vld [vmem:[%s6882_s1 + $0x1a0] sm:$0xff] }
  0x24   :  { %v343_v27 = vsub.f32 %v3656_v4, %v3688_v5  ;;  %v3659_v35 = vld [vmem:[%s6881_s0 + $0x1a8] sm:$0xff]  ;;  %v3692_v42 = vld [vmem:[%s6882_s1 + $0x1b0] sm:$0xff]  ;;  %v344_v44 = vsub.f32 %v3657_v14, %v3689_v24  ;;  %v3694_v55 = vld [vmem:[%s6882_s1 + $0x1c0] sm:$0xff] }
  0x25   :  { %v5044_v43 = vsub.f32 %v5008_v25, %v123_v2  ;;  %v5056_v49 = vsub.f32 %v5016_v29, %v124_v6  ;;  %v363_v2 = vadd.f32 %v361_v53, %v333_v41  ;;  %v364_v6 = vadd.f32 %v362_v59, %v334_v47  ;;  %v3691_v36 = vld [vmem:[%s6882_s1 + $0x1a8] sm:$0xff]  ;;  %v3660_v41 = vld [vmem:[%s6881_s0 + $0x1b0] sm:$0xff]  ;;  %v3693_v47 = vld [vmem:[%s6882_s1 + $0x1b8] sm:$0xff] }
  0x26   :  { %v5094_v7 = vsub.f32 %v5008_v25, %v4778_v12  ;;  %v5098_v8 = vsub.f32 %v5016_v29, %v4789_v16  ;;  %v3663_v54 = vld [vmem:[%s6881_s0 + $0x1c8] sm:$0xff]  ;;  %v347_v60 = vsub.f32 %v3660_v41, %v3692_v42  ;;  %v203_v24 = vsel %vm163_vm0, %v5016_v29, 0.0  ;;  %v3701_v41 = vld [vmem:[%s6882_s1 + $0x1f8] sm:$0xff] }
  0x27   :  { %v5084_v3 = vsub.f32 %v5044_v43, %v4952_v56  ;;  %v5102_v56 = vsub.f32 %v5056_v49, %v4963_v61  ;;  %v365_v13 = vadd.f32 %v363_v2, %v335_v52  ;;  %v366_v23 = vadd.f32 %v364_v6, %v336_v58  ;;  %v3658_v61 = vld [vmem:[%s6881_s0 + $0x1a0] sm:$0xff]  ;;  %v3695_v57 = vld [vmem:[%s6882_s1 + $0x1c8] sm:$0xff]  ;;  %v3696_v2 = vld [vmem:[%s6882_s1 + $0x1d0] sm:$0xff] }
  0x28   :  { %v183_v12 = vsel %vm163_vm0, %v5044_v43, 0.0  ;;  %v184_v16 = vsel %vm163_vm0, %v5056_v49, 0.0  ;;  %v221_v32 = vsel %vm163_vm0, %v5094_v7, 0.0  ;;  %v222_v33 = vsel %vm163_vm0, %v5098_v8, 0.0  ;;  %v3665_v6 = vld [vmem:[%s6881_s0 + $0x1d8] sm:$0xff] }
  0x29   :  { %v367_v28 = vadd.f32 %v365_v13, %v337_v0  ;;  %v164_v30 = vsel %vm163_vm0, %v5084_v3, 0.0  ;;  %v368_v31 = vadd.f32 %v366_v23, %v338_v1  ;;  %v165_v34 = vsel %vm163_vm0, %v5102_v56, 0.0  ;;  %v3664_v1 = vld [vmem:[%s6881_s0 + $0x1d0] sm:$0xff]  ;;  %v3666_v23 = vld [vmem:[%s6881_s0 + $0x1e0] sm:$0xff] }
  0x2a   :  { %v5136_v38 = vsub.f32 %v5094_v7, %v4791_v17  ;;  %v5140_v39 = vsub.f32 %v5098_v8, %v4793_v18  ;;  %v185_v40 = vadd.f32 %v184_v16, %v183_v12  ;;  %v345_v45 = vsub.f32 %v3658_v61, %v3690_v26  ;;  %v3661_v17 = vld [vmem:[%s6881_s0 + $0x1b8] sm:$0xff]  ;;  %v3662_v18 = vld [vmem:[%s6881_s0 + $0x1c0] sm:$0xff]  ;;  %v3667_v26 = vld [vmem:[%s6881_s0 + $0x1e8] sm:$0xff] }
  0x2b   :  { %v369_v37 = vadd.f32 %v367_v28, %v339_v9  ;;  %v370_v46 = vadd.f32 %v368_v31, %v340_v15  ;;  %v223_v50 = vadd.f32 %v222_v33, %v221_v32  ;;  %v166_v53 = vadd.f32 %v165_v34, %v164_v30  ;;  %v3697_v9 = vld [vmem:[%s6882_s1 + $0x1d8] sm:$0xff]  ;;  %v3698_v12 = vld [vmem:[%s6882_s1 + $0x1e0] sm:$0xff]  ;;  %v3668_v31 = vld [vmem:[%s6881_s0 + $0x1f0] sm:$0xff] }
  0x2c   :  { %v240_v51 = vsel %vm163_vm0, %v5136_v38, 0.0  ;;  %v241_v52 = vsel %vm163_vm0, %v5140_v39, 0.0  ;;  %v346_v58 = vsub.f32 %v3659_v35, %v3691_v36  ;;  %v186_v0 = vrot.slane %v185_v40, 4  ;;  %v3700_v32 = vld [vmem:[%s6882_s1 + $0x1f0] sm:$0xff] }
  0x2d   :  { %v371_v48 = vadd.f32 %v369_v37, %v341_v21  ;;  %v372_v59 = vadd.f32 %v370_v46, %v342_v22  ;;  %v242_v63 = vadd.f32 %v241_v52, %v240_v51  ;;  %v348_v4 = vsub.f32 %v3661_v17, %v3693_v47  ;;  %v3669_v37 = vld [vmem:[%s6881_s0 + $0x1f8] sm:$0xff]  ;;  %s4693_s0 = smov 16  }
  0x2e   :  { %v349_v13 = vsub.f32 %v3662_v18, %v3694_v55  ;;  %v350_v14 = vsub.f32 %v3663_v54, %v3695_v57  ;;  %v224_v21 = vrot.slane %v223_v50, 4  ;;  %v167_v22 = vrot.slane %v166_v53, 4 }
  0x2f   :  { %v373_v62 = vadd.f32 %v371_v48, %v343_v27  ;;  %v374_v5 = vadd.f32 %v372_v59, %v344_v44  ;;  %v202_v61 = vsel %vm163_vm0, %v5008_v25, 0.0  ;;  %v3699_v27 = vld [vmem:[%s6882_s1 + $0x1e8] sm:$0xff]  ;;  %v351_v28 = vsub.f32 %v3664_v1, %v3696_v2  ;;  %s4694_s1 = smov 4  }
  0x30   :  { %v352_v33 = vsub.f32 %v3665_v6, %v3697_v9  ;;  %v187_v35 = vadd.f32 %v186_v0, %v185_v40  ;;  %v243_v36 = vrot.slane %v242_v63, 4  ;;  %v353_v42 = vsub.f32 %v3666_v23, %v3698_v12 }
  0x31   :  { %v375_v15 = vadd.f32 %v373_v62, %v345_v45  ;;  %v376_v16 = vadd.f32 %v374_v5, %v346_v58  ;;  %v225_v45 = vadd.f32 %v224_v21, %v223_v50  ;;  %v204_v46 = vadd.f32 %v203_v24, %v202_v61 }
  0x32   :  { %v168_v17 = vadd.f32 %v167_v22, %v166_v53  ;;  %v354_v18 = vsub.f32 %v3667_v26, %v3699_v27  ;;  %v355_v48 = vsub.f32 %v3668_v31, %v3700_v32  ;;  %v356_v52 = vsub.f32 %v3669_v37, %v3701_v41 }
  0x33   :  { %v377_v30 = vadd.f32 %v375_v15, %v347_v60  ;;  %v378_v34 = vadd.f32 %v376_v16, %v348_v4  ;;  %v188_v54 = vrot.slane %v187_v35, 2  ;;  %v244_v55 = vadd.f32 %v243_v36, %v242_v63 }
  0x34   :  { %v226_v58 = vrot.slane %v225_v45, 2  ;;  %v205_v59 = vrot.slane %v204_v46, 4  ;;  %v169_v60 = vrot.slane %v168_v17, 2  ;;  %v194_v53 = vrot.slane %v5056_v49, 7 }
  0x35   :  { %v379_v44 = vadd.f32 %v377_v30, %v349_v13  ;;  %v380_v47 = vadd.f32 %v378_v34, %v350_v14  ;;  %v189_v50 = vadd.f32 %v188_v54, %v187_v35  ;;  %v245_v2 = vrot.slane %v244_v55, 2 }
  0x36   :  { %v227_v5 = vadd.f32 %v226_v58, %v225_v45  ;;  %v206_v6 = vadd.f32 %v205_v59, %v204_v46  ;;  %v170_v9 = vadd.f32 %v169_v60, %v168_v17  ;;  %v251_v37 = vrot.slane %v5140_v39, 7 }
  0x37   :  { %v381_v51 = vadd.f32 %v379_v44, %v351_v28  ;;  %v382_v40 = vadd.f32 %v380_v47, %v352_v33  ;;  %v246_v61 = vadd.f32 %v245_v2, %v244_v55  ;;  %v190_v27 = vrot.slane %v189_v50, 1 }
  0x38   :  { %v228_v31 = vrot.slane %v227_v5, 1  ;;  %v207_v32 = vrot.slane %v206_v6, 2  ;;  %v171_v46 = vrot.slane %v170_v9, 1 }
  0x39   :  { %v383_v57 = vadd.f32 %v381_v51, %v353_v42  ;;  %v384_v62 = vadd.f32 %v382_v40, %v354_v18  ;;  %v5266_v58 = vadd.f32 %v190_v27, %v189_v50 }
  0x3b   :  { %v5210_v0 = vadd.f32 %v383_v57, %v355_v48  ;;  %v5212_v1 = vadd.f32 %v384_v62, %v356_v52 }
  0x3d   :  { %v5216_v4 = vsub.f32 %v5210_v0, %v355_v48  ;;  %v5220_v63 = vsub.f32 %v5210_v0, %v4986_v10  ;;  %v5223_v13 = vsub.f32 %v5212_v1, %v356_v52  ;;  %v5227_v14 = vsub.f32 %v5212_v1, %v4997_v19 }
  0x3e   :  { %v433_v15 = vsel %vm163_vm0, %v5210_v0, 0.0  ;;  %v434_v23 = vsel %vm163_vm0, %v5212_v1, 0.0 }
  0x3f   :  { %v5232_v21 = vsub.f32 %v5216_v4, %v353_v42  ;;  %v414_v22 = vsel %vm163_vm0, %v5216_v4, 0.0  ;;  %v452_v10 = vsel %vm163_vm0, %v5220_v63, 0.0  ;;  %v5241_v12 = vsub.f32 %v5223_v13, %v354_v18 }
  0x40   :  { %v415_v19 = vsel %vm163_vm0, %v5223_v13, 0.0  ;;  %v453_v16 = vsel %vm163_vm0, %v5227_v14, 0.0  ;;  %v435_v33 = vadd.f32 %v434_v23, %v433_v15  ;;  %v247_v42 = vrot.slane %v246_v61, 1 }
  0x41   :  { %v395_v24 = vsel %vm163_vm0, %v5232_v21, 0.0  ;;  %v416_v26 = vadd.f32 %v415_v19, %v414_v22  ;;  %v454_v28 = vadd.f32 %v453_v16, %v452_v10  ;;  %v396_v30 = vsel %vm163_vm0, %v5241_v12, 0.0 }
  0x42   :  { %v397_v34 = vadd.f32 %v396_v30, %v395_v24  ;;  %v436_v41 = vrot.slane %v435_v33, 4  ;;  %v5254_v44 = vsub.f32 %v5220_v63, %v4988_v11  ;;  %v5258_v45 = vsub.f32 %v5227_v14, %v4999_v20 }
  0x43   :  { %v417_v35 = vrot.slane %v416_v26, 4  ;;  %v455_v36 = vrot.slane %v454_v28, 4  ;;  %v5260_v51 = vadd.f32 %v247_v42, %v246_v61  ;;  %v5268_v20 = vadd.f32 %v228_v31, %v227_v5 }
  0x44   :  { %v398_v17 = vrot.slane %v397_v34, 4  ;;  %v437_v48 = vadd.f32 %v436_v41, %v435_v33  ;;  %v471_v52 = vsel %vm163_vm0, %v5254_v44, 0.0  ;;  %v472_v40 = vsel %vm163_vm0, %v5258_v45, 0.0 }
  0x45   :  { %v418_v18 = vadd.f32 %v417_v35, %v416_v26  ;;  %v456_v47 = vadd.f32 %v455_v36, %v454_v28  ;;  %v473_v57 = vadd.f32 %v472_v40, %v471_v52  ;;  %v5272_v59 = vsub.f32 %v5260_v51, %v5140_v39 }
  0x46   :  { %v399_v54 = vadd.f32 %v398_v17, %v397_v34  ;;  %v5276_v60 = vsub.f32 %v5260_v51, %v5136_v38  ;;  %v232_v15 = vrot.slane %v5098_v8, 7  ;;  %v5279_v10 = vadd.f32 %v171_v46, %v170_v9 }
  0x47   :  { %v419_v11 = vrot.slane %v418_v18, 2  ;;  %v457_v55 = vrot.slane %v456_v47, 2  ;;  %v208_v23 = vadd.f32 %v207_v32, %v206_v6  ;;  %v438_v50 = vrot.slane %v437_v48, 2 }
  0x48   :  { %v400_v62 = vrot.slane %v399_v54, 2  ;;  %v5282_v5 = vsub.f32 %v5272_v59, %v251_v37  ;;  %v218_v61 = vrot.slane %v5008_v25, 1  ;;  %v5287_v24 = vsub.f32 %v5266_v58, %v5056_v49 }
  0x49   :  { %v420_v2 = vadd.f32 %v419_v11, %v418_v18  ;;  %v458_v22 = vadd.f32 %v457_v55, %v456_v47  ;;  %v5291_v26 = vsub.f32 %v5279_v10, %v5084_v3  ;;  %v5295_v6 = vsub.f32 %v5266_v58, %v5044_v43 }
  0x4a   :  { %v401_v19 = vadd.f32 %v400_v62, %v399_v54  ;;  %v230_v9 = vsub.f32 %v5268_v20, %v5098_v8  ;;  %v425_v30 = vrot.slane %v5223_v13, 7  ;;  %v5306_v32 = vsub.f32 %v5279_v10, %v5102_v56 }
  0x4b   :  { %v421_v16 = vrot.slane %v420_v2, 1  ;;  %v459_v39 = vrot.slane %v458_v22, 1  ;;  %v5311_v33 = vsub.f32 %v5287_v24, %v194_v53  ;;  %v209_v34 = vrot.slane %v208_v23, 1 }
  0x4c   :  { %v402_v27 = vrot.slane %v401_v19, 1  ;;  %v439_v35 = vadd.f32 %v438_v50, %v437_v48  ;;  %v463_v41 = vrot.slane %v5227_v14, 7  ;;  %v495_v42 = vrot.slane %v5291_v26, 1 }
  0x4d   :  { %v5299_v28 = vadd.f32 %v421_v16, %v420_v2  ;;  %v5302_v31 = vadd.f32 %v459_v39, %v458_v22  ;;  %v5329_v53 = vsub.f32 %v5268_v20, %v5094_v7  ;;  %v474_v46 = vrot.slane %v473_v57, 4 }
  0x4e   :  { %v5313_v36 = vadd.f32 %v402_v27, %v401_v19  ;;  %v234_v47 = vsub.f32 %v230_v9, %v232_v15  ;;  %v5350_v52 = vadd.f32 %v209_v34, %v208_v23  ;;  %v440_v40 = vrot.slane %v439_v35, 1 }
  0x4f   :  { %v5317_v8 = vsub.f32 %v5299_v28, %v5223_v13  ;;  %v461_v37 = vsub.f32 %v5302_v31, %v5227_v14  ;;  %v5325_v49 = vsub.f32 %v5299_v28, %v5216_v4  ;;  %v5348_v48 = vsub.f32 %v5302_v31, %v5220_v63 }
  0x50   :  { %v5333_v13 = vsub.f32 %v5313_v36, %v5241_v12  ;;  %v5341_v14 = vsub.f32 %v5313_v36, %v5232_v21  ;;  %v5361_v2 = vsub.f32 %v5350_v52, %v5008_v25  ;;  %v508_v22 = vrot.slane %v5295_v6, 1 }
  0x51   :  { %v5337_v17 = vpack.i.bf16 %v5317_v8, %v5287_v24  ;;  %v5344_v18 = vsub.f32 %v5317_v8, %v425_v30  ;;  %v465_v62 = vsub.f32 %v461_v37, %v463_v41  ;;  %v558_v23 = vrot.slane %v5325_v49, 1  ;;  %v596_v41 = vld [vmem:[%s6883_s2 + $0x20] sm:$0x33] }
  0x52   :  { %v4029_v54 = vpack.i.bf16 %v5333_v13, %v5306_v32  ;;  %v545_v11 = vrot.slane %v5341_v14, 1  ;;  %v475_v50 = vadd.f32 %v474_v46, %v473_v57  ;;  %v521_v19 = vrot.slane %v5329_v53, 1 }
  0x53   :  { %4025 = vrot.lane.b32.xlu1 %v5337_v17, %s4693_s0  ;;  %v4034_v55 = vpack.i.bf16 %v5344_v18, %v5311_v33  ;;  %v220_v16 = vsub.f32 %v5361_v2, %v218_v61  ;;  %v5371_v39 = vpack.i.bf16 %v465_v62, %v234_v47  ;;  %v571_v25 = vrot.slane %v5348_v48, 1  ;;  %v5403_v62 = vld [vmem:[%s6883_s2 + $0x14] ss:$8 sps:$4 sm:$0xff]  }
  0x54   :  { %4030 = vrot.lane.b32.xlu0 %v4029_v54, %s4694_s1  ;;  %v5364_v15 = vpack.i.bf16 %v545_v11, %v495_v42  ;;  %v5374_v27 = vadd.f32 %v440_v40, %v439_v35  ;;  %v449_v30 = vrot.slane %v5210_v0, 1  ;;  %v5379_v57 = vpack.i.bf16 %v558_v23, %v508_v22 }
  0x55   :  { %v476_v34 = vrot.slane %v475_v50, 2  ;;  %v5390_v35 = vpack.i.bf16 %v571_v25, %v521_v19  ;;  %v1098_v46 = vrot.slane %v220_v16, 1  ;;  %v5393_v47 = vpack.i.bf16 %v461_v37, %v230_v9  ;;  %v5430_v16 = vld [vmem:[%s6883_s2 + $0x10] ss:$8 sps:$4 sm:$0xff]  }
  0x56   :  { %v5383_v61 = vsub.f32 %v5374_v27, %v5210_v0  ;;  %v5395_v40 = vcombine.high %v596_v41, %v596_v41  ;;  %v3706_v0 = vcombine.low %v596_v41, %v596_v41  ;;  %v256_v54 = vrot.slane %v5136_v38, 1 }
  0x57   :  { %4035 = vrot.lane.b32.xlu1 %v4034_v55, %s4695_s27  ;;  %v477_v55 = vadd.f32 %v476_v34, %v475_v50  ;;  %v180_v38 = vrot.slane %v5084_v3, 1  ;;  %v411_v22 = vrot.slane %v5232_v21, 1  ;;  %v4064_v3 = vpack.i.bf16 %v5313_v36, %v5279_v10  ;;  %v5438_v10 = vld [vmem:[%s6883_s2 + $0x4] ss:$8 sps:$4 sm:$0xff]  }
  0x58   :  { %4040 = vrot.lane.b32.xlu0 %v5364_v15, %s4696_s28  ;;  %v451_v42 = vsub.f32 %v5383_v61, %v449_v30  ;;  %3708 = vmatprep.subr.msk.bf16.mxu0 %vm626_vm1, %v5395_v40  ;;  %v5414_v23 = vsel %vm626_vm1, %v3706_v0, 0  ;;  %v258_v50 = vsub.f32 %v5276_v60, %v256_v54  ;;  %v482_v21 = vrot.slane %v5258_v45, 7 }
  0x59   :  { %v478_v37 = vrot.slane %v477_v55, 1  ;;  %3718 = vmatprep.subr.msk.bf16.mxu1 %vm626_vm1, %v5395_v40  ;;  %644 = vmatpush1.bf16.msra.mxu0 %v5414_v23  ;;  %v199_v25 = vrot.slane %v5044_v43, 1  ;;  %v487_v30 = vrot.slane %v5254_v44, 1  ;;  %v4701_v36 = vmov 0  }
  0x5a   :  { %v1120_v11 = vrot.slane %v451_v42, 1  ;;  %645 = vmatprep.subr.bf16.mxu0 %v5403_v62  ;;  %665 = vmatprep.mubr.bf16.mxu0 %v4701_v36  ;;  %v1202_v42 = vrot.slane %v5276_v60, 1  ;;  %v182_v0 = vsub.f32 %v5291_v26, %v180_v38  ;;  %v413_v54 = vsub.f32 %v5341_v14, %v411_v22 }
  0x5b   :  { %4050 = vrot.lane.b32.xlu1 %v5371_v39, %s4697_s8  ;;  %v5423_v19 = vadd.f32 %v478_v37, %v477_v55  ;;  %1154 = vmatpush1.bf16.msra.mxu1 %v5414_v23  ;;  %v1392_v26 = vrot.slane %v258_v50, 1  ;;  %v201_v55 = vsub.f32 %v5295_v6, %v199_v25  ;;  %v237_v37 = vrot.slane %v5094_v7, 1 }
  0x5c   :  { %4045 = vrot.lane.b32.xlu0 %v5379_v57, %s4698_s9  ;;  %v5407_v9 = vpack.i.bf16 %v1120_v11, %v1098_v46  ;;  %v5453_v46 = vpack.i.bf16 %v5299_v28, %v5266_v58  ;;  %1155 = vmatprep.subr.bf16.mxu1 %v5403_v62  ;;  %v5470_v58 = vld [vmem:[%s6883_s2] ss:$8 sps:$4 sm:$0xff]   ;;  %v782_v14 = vrot.slane %v182_v0, 1  ;;  %v4084_v22 = vpack.i.bf16 %v5302_v31, %v5268_v20 }
  0x5d   :  { %v480_v34 = vsub.f32 %v5423_v19, %v5258_v45  ;;  %v4199_v43 = vpack.i.bf16 %v5423_v19, %v5260_v51  ;;  %v485_v41 = vsub.f32 %v5423_v19, %v5254_v44  ;;  %v430_v45 = vrot.slane %v5216_v4, 1  ;;  %1175 = vmatprep.mubr.bf16.mxu1 %v4701_v36  ;;  %646 = vmatpush1.bf16.msra.mxu0 %v5430_v16 }
  0x5e   :  { %647 = vmatprep.subr.bf16.mxu0 %v5438_v10  ;;  %v814_v50 = vrot.slane %v413_v54, 1  ;;  %v239_v7 = vsub.f32 %v5329_v53, %v237_v37  ;;  %v442_v53 = vsub.f32 %v5374_v27, %v5212_v1  ;;  %v444_v25 = vrot.slane %v5212_v1, 7 }
  0x5f   :  { %4060 = vrot.lane.b32.xlu1 %v5390_v35, %s4699_s12  ;;  %v5462_v44 = vpack.i.bf16 %v480_v34, %v5272_v59  ;;  %v1230_v60 = vrot.slane %v485_v41, 1  ;;  %v5464_v11 = vsub.f32 %v480_v34, %v482_v21  ;;  %v489_v4 = vsub.f32 %v485_v41, %v487_v30  ;;  %1156 = vmatpush1.bf16.msra.mxu1 %v5430_v16 }
  0x60   :  { %4055 = vrot.lane.b32.xlu0 %v5393_v47, %s4700_s13  ;;  %1157 = vmatprep.subr.bf16.mxu1 %v5438_v10  ;;  %v468_v21 = vrot.slane %v5220_v63, 1  ;;  %v4099_v20 = vpack.i.bf16 %v814_v50, %v782_v14  ;;  %v790_v63 = vrot.slane %v201_v55, 1  ;;  %v798_v41 = vrot.slane %v239_v7, 1 }
  0x61   :  { %v5475_v28 = vpack.i.bf16 %v1230_v60, %v1202_v42  ;;  %v4219_v59 = vpack.i.bf16 %v5464_v11, %v5282_v5  ;;  %v1412_v38 = vrot.slane %v489_v4, 1  ;;  %648 = vmatpush1.bf16.msra.mxu0 %v5470_v58  ;;  %v446_v0 = vsub.f32 %v442_v53, %v444_v25 }
  0x62   :  { %3710 = vmatprep.subr.msk.bf16.mxu0 %vm626_vm1, %v5395_v40  ;;  %v470_v31 = vsub.f32 %v5348_v48, %v468_v21  ;;  %v936_v1 = vrot.slane %v5383_v61, 1  ;;  %v175_v51 = vrot.slane %v5102_v56, 7  ;;  %v406_v5 = vrot.slane %v5241_v12, 7 }
  0x63   :  { %4070 = vrot.lane.b32.xlu1 %v5337_v17, %s4695_s27  ;;  %v4244_v30 = vpack.i.bf16 %v1412_v38, %v1392_v26  ;;  %1158 = vmatpush1.bf16.msra.mxu1 %v5470_v58 }
  0x64   :  { %4065 = vrot.lane.b32.xlu0 %v4064_v3, %s4694_s1  ;;  %v432_v3 = vsub.f32 %v5325_v49, %v430_v45  ;;  %3722 = vmatprep.subr.msk.bf16.mxu1 %vm626_vm1, %v5395_v40  ;;  %v213_v49 = vrot.slane %v5016_v29, 7  ;;  %v830_v42 = vrot.slane %v470_v31, 1  ;;  %v909_v45 = vrot.slane %v5361_v2, 1 }
  0x65   :  { %v177_v61 = vsub.f32 %v5306_v32, %v175_v51 }
  0x66   :  { %v822_v6 = vrot.slane %v432_v3, 1  ;;  %v4114_v54 = vpack.i.bf16 %v830_v42, %v798_v41  ;;  %v4139_v60 = vpack.i.bf16 %v936_v1, %v909_v45 }
  0x67   :  { %4080 = vrot.lane.b32.xlu1 %v5393_v47, %s4697_s8 }
  0x68   :  { %4075 = vrot.lane.b32.xlu0 %v5453_v46, %s4693_s0  ;;  %v4104_v34 = vpack.i.bf16 %v822_v6, %v790_v63 }
  0x6b   :  { %4090 = vrot.lane.b32.xlu1 %v5364_v15, %s4694_s1  ;;  %v211_v15 = vsub.f32 %v5350_v52, %v5016_v29 }
  0x6c   :  { %4085 = vrot.lane.b32.xlu0 %v4084_v22, %s4700_s13 }
  0x6d   :  { %v215_v48 = vsub.f32 %v211_v15, %v213_v49  ;;  %v4134_v4 = vpack.i.bf16 %v442_v53, %v211_v15 }
  0x6f   :  { %4095 = vrot.lane.b32.xlu1 %v5379_v57, %s4693_s0  ;;  %v4129_v29 = vpack.i.bf16 %v446_v0, %v215_v48 }
  0x70   :  { %4100 = vrot.lane.b32.xlu0 %v4099_v20, %s4696_s28 }
  0x73   :  { %4110 = vrot.lane.b32.xlu1 %v5390_v35, %s4700_s13 }
  0x74   :  { %4105 = vrot.lane.b32.xlu0 %v4104_v34, %s4698_s9 }
  0x77   :  { %4120 = vrot.lane.b32.xlu1 %v5337_v17, %s4694_s1  ;;  %v4174_v17 = vpack.i.bf16 %v5374_v27, %v5350_v52 }
  0x78   :  { %4115 = vrot.lane.b32.xlu0 %v4114_v54, %s4699_s12 }
  0x7b   :  { %4130 = vrot.lane.b32.xlu1 %v4129_v29, %s4695_s27 }
  0x7c   :  { %4125 = vrot.lane.b32.xlu0 %v5379_v57, %s4696_s28 }
  0x7f   :  { %4140 = vrot.lane.b32.xlu1 %v4139_v60, %s4698_s9 }
  0x80   :  { %4135 = vrot.lane.b32.xlu0 %v4134_v4, %s4693_s0 }
  0x83   :  { %4150 = vrot.lane.b32.xlu1 %v4104_v34, %s4696_s28 }
  0x84   :  { %4145 = vrot.lane.b32.xlu0 %v5379_v57, %s4694_s1 }
  0x87   :  { %4160 = vrot.lane.b32.xlu1 %v4139_v60, %s4693_s0 }
  0x88   :  { %4155 = vrot.lane.b32.xlu0 %v4134_v4, %s4695_s27 }
  0x8b   :  { %4170 = vrot.lane.b32.xlu1 %v5453_v46, %s4694_s1 }
  0x8c   :  { %4165 = vrot.lane.b32.xlu0 %v5407_v9, %s4698_s9 }
  0x8f   :  { %4180 = vrot.lane.b32.xlu1 %v5393_v47, %s4695_s27 }
  0x90   :  { %4175 = vrot.lane.b32.xlu0 %v4174_v17, %s4693_s0 }
  0x93   :  { %4190 = vrot.lane.b32.xlu1 %v5390_v35, %s4698_s9 }
  0x94   :  { %4185 = vrot.lane.b32.xlu0 %v4084_v22, %s4693_s0 }
  0x97   :  { %4200 = vrot.lane.b32.xlu1 %v4199_v43, %s4700_s13 }
  0x98   :  { %4195 = vrot.lane.b32.xlu0 %v5462_v44, %s4697_s8 }
  0x9b   :  { %4210 = vrot.lane.b32.xlu1 %v5371_v39, %s4695_s27  ;;  %v408_v39 = vsub.f32 %v5333_v13, %v406_v5 }
  0x9c   :  { %4205 = vrot.lane.b32.xlu0 %v5475_v28, %s4699_s12 }
  0x9f   :  { %4220 = vrot.lane.b32.xlu1 %v4219_v59, %s4697_s8 }
  0xa0   :  { %4215 = vrot.lane.b32.xlu0 %v5393_v47, %s4693_s0 }
  0xa3   :  { %4230 = vrot.lane.b32.xlu1 %v5390_v35, %s4693_s0 }
  0xa4   :  { %4225 = vrot.lane.b32.xlu0 %v5462_v44, %s4700_s13 }
  0xa7   :  { %4240 = vrot.lane.b32.xlu1 %v5475_v28, %s4700_s13 }
  0xa8   :  { %4235 = vrot.lane.b32.xlu0 %v4114_v54, %s4698_s9 }
  0xac   :  { %4245 = vrot.lane.b32.xlu0 %v4244_v30, %s4699_s12 }
  0xc5   :  { %v4026_v52 = vpop.permute.xlu1 %4025 }
  0xc6   :  { %v4031_v2 = vpop.permute.xlu0 %4030  ;;  %v4028_v11 = vunpack.i.h.bf16 %v4026_v52  ;;  %v4027_v26 = vunpack.i.l.bf16 %v4026_v52 }
  0xc7   :  { %v4033_v27 = vunpack.i.h.bf16 %v4031_v2  ;;  %v4032_v57 = vunpack.i.l.bf16 %v4031_v2 }
  0xc9   :  { %v4036_v35 = vpop.permute.xlu1 %4035  ;;  %v575_v56 = vsel %vm163_vm0, %v408_v39, %v4033_v27  ;;  %v525_v12 = vsel %vm163_vm0, %v177_v61, %v4032_v57 }
  0xca   :  { %v4041_v47 = vpop.permute.xlu0 %4040  ;;  %v4038_v9 = vunpack.i.h.bf16 %v4036_v35  ;;  %v4037_v19 = vunpack.i.l.bf16 %v4036_v35 }
  0xcb   :  { %v4043_v43 = vunpack.i.h.bf16 %v4041_v47  ;;  %v4042_v46 = vunpack.i.l.bf16 %v4041_v47 }
  0xcd   :  { %v5569_v44 = vpop.permute.xlu1 %4050  ;;  %v527_v28 = vsel %vm526_vm2, %v525_v12, %v4042_v46  ;;  %v576_v59 = vsel %vm526_vm2, %v575_v56, %v4043_v43 }
  0xce   :  { %v529_v14 = vsel %vm528_vm3, %v527_v28, %v4037_v19  ;;  %v577_v55 = vsel %vm528_vm3, %v576_v59, %v4038_v9  ;;  %v4046_v37 = vpop.permute.xlu0 %4045  ;;  %v4053_v21 = vunpack.i.h.bf16 %v5569_v44  ;;  %v4052_v30 = vunpack.i.l.bf16 %v5569_v44 }
  0xcf   :  { %v4048_v38 = vunpack.i.h.bf16 %v4046_v37  ;;  %v4047_v22 = vunpack.i.l.bf16 %v4046_v37  ;;  %v531_v50 = vsel %vm530_vm4, %v529_v14, %v4027_v26  ;;  %v578_v3 = vsel %vm530_vm4, %v577_v55, %v4028_v11 }
  0xd1   :  { %v4061_v7 = vpop.permute.xlu1 %4060  ;;  %v533_v20 = vsel %vm532_vm5, %v531_v50, %v4047_v22  ;;  %v579_v63 = vsel %vm532_vm5, %v578_v3, %v4048_v38 }
  0xd2   :  { %v5581_v6 = vpop.permute.xlu0 %4055  ;;  %v5583_v31 = vunpack.i.h.bf16 %v4061_v7  ;;  %v5585_v49 = vunpack.i.l.bf16 %v4061_v7  ;;  %v535_v25 = vsel %vm534_vm6, %v533_v20, %v4052_v30  ;;  %v580_v34 = vsel %vm534_vm6, %v579_v63, %v4053_v21 }
  0xd3   :  { %v4058_v15 = vunpack.i.h.bf16 %v5581_v6  ;;  %v4057_v53 = vunpack.i.l.bf16 %v5581_v6 }
  0xd5   :  { %v5595_v41 = vpop.permute.xlu1 %4070  ;;  %v537_v42 = vsel %vm536_vm7, %v535_v25, %v4057_v53  ;;  %v581_v48 = vsel %vm536_vm7, %v580_v34, %v4058_v15 }
  0xd6   :  { %v539_v0 = vsel %vm538_vm8, %v537_v42, %v5585_v49  ;;  %v582_v54 = vsel %vm538_vm8, %v581_v48, %v5583_v31  ;;  %v4066_v29 = vpop.permute.xlu0 %4065  ;;  %v4073_v45 = vunpack.i.h.bf16 %v5595_v41  ;;  %v4072_v1 = vunpack.i.l.bf16 %v5595_v41 }
  0xd7   :  { %v584_v60 = vrot.slane %v539_v0, 7  ;;  %v587_v4 = vrot.slane %v582_v54, 6  ;;  %v4068_v17 = vunpack.i.h.bf16 %v4066_v29  ;;  %v4067_v51 = vunpack.i.l.bf16 %v4066_v29 }
  0xd9   :  { %v4081_v5 = vpop.permute.xlu1 %4080  ;;  %v718_v52 = vsel %vm163_vm0, %v5333_v13, %v4068_v17  ;;  %v692_v2 = vsel %vm163_vm0, %v5306_v32, %v4067_v51  ;;  %v590_v47 = vsel %vm589_vm9, %v584_v60, %v587_v4 }
  0xda   :  { %v5613_v39 = vunpack.i.h.bf16 %v4081_v5  ;;  %v693_v27 = vsel %vm526_vm2, %v692_v2, %v4042_v46  ;;  %v719_v57 = vsel %vm526_vm2, %v718_v52, %v4043_v43  ;;  %v4076_v61 = vpop.permute.xlu0 %4075  ;;  %v5617_v35 = vunpack.i.l.bf16 %v4081_v5 }
  0xdb   :  { %v694_v9 = vsel %vm528_vm3, %v693_v27, %v4072_v1  ;;  %v720_v19 = vsel %vm528_vm3, %v719_v57, %v4073_v45  ;;  %v4078_v56 = vunpack.i.h.bf16 %v4076_v61  ;;  %v4077_v12 = vunpack.i.l.bf16 %v4076_v61 }
  0xdc   :  { %v591_v11 = vpack.c.bf16 %v590_v47, %v590_v47 }
  0xdd   :  { %v4091_v26 = vpop.permute.xlu1 %4090  ;;  %v695_v28 = vsel %vm530_vm4, %v694_v9, %v4077_v12  ;;  %v721_v59 = vsel %vm530_vm4, %v720_v19, %v4078_v56 }
  0xde   :  { %v4093_v46 = vunpack.i.h.bf16 %v4091_v26  ;;  %v4092_v14 = vunpack.i.l.bf16 %v4091_v26  ;;  %v696_v43 = vsel %vm532_vm5, %v695_v28, %v4047_v22  ;;  %v722_v55 = vsel %vm532_vm5, %v721_v59, %v4048_v38  ;;  %3709 = vmatmul.mubr.msk.bf16.vlgmr.msra.gmra.mxu0 %vm622_vm10, %v591_v11  ;;  %v5627_v37 = vpop.permute.xlu0 %4085 }
  0xdf   :  { %748 = vmatpush1.bf16.msra.mxu0 %v5414_v23  ;;  %v4088_v50 = vunpack.i.h.bf16 %v5627_v37  ;;  %v4087_v3 = vunpack.i.l.bf16 %v5627_v37  ;;  %v697_v7 = vsel %vm534_vm6, %v696_v43, %v5617_v35  ;;  %v723_v20 = vsel %vm534_vm6, %v722_v55, %v5613_v39  ;;  %769 = vmatprep.mubr.bf16.mxu0 %v4701_v36 }
  0xe0   :  { %749 = vmatprep.subr.bf16.mxu0 %v5403_v62  ;;  %v834_v25 = vsel %vm163_vm0, %v5333_v13, %v4093_v46  ;;  %v802_v34 = vsel %vm163_vm0, %v5306_v32, %v4092_v14 }
  0xe1   :  { %v4096_v38 = vpop.permute.xlu1 %4095  ;;  %v698_v22 = vsel %vm536_vm7, %v697_v7, %v4087_v3  ;;  %v724_v63 = vsel %vm536_vm7, %v723_v20, %v4088_v50 }
  0xe2   :  { %v699_v41 = vsel %vm538_vm8, %v698_v22, %v5585_v49  ;;  %v725_v42 = vsel %vm538_vm8, %v724_v63, %v5583_v31  ;;  %v4101_v48 = vpop.permute.xlu0 %4100  ;;  %v4098_v0 = vunpack.i.h.bf16 %v4096_v38  ;;  %v4097_v54 = vunpack.i.l.bf16 %v4096_v38 }
  0xe3   :  { %v727_v29 = vrot.slane %v699_v41, 7  ;;  %v730_v60 = vrot.slane %v725_v42, 6  ;;  %750 = vmatpush1.bf16.msra.mxu0 %v5430_v16  ;;  %v4103_v4 = vunpack.i.h.bf16 %v4101_v48  ;;  %v4102_v17 = vunpack.i.l.bf16 %v4101_v48 }
  0xe4   :  { %751 = vmatprep.subr.bf16.mxu0 %v5438_v10 }
  0xe5   :  { %v5654_v13 = vpop.permute.xlu1 %4110  ;;  %v835_v32 = vsel %vm526_vm2, %v834_v25, %v4103_v4  ;;  %v803_v51 = vsel %vm526_vm2, %v802_v34, %v4102_v17  ;;  %v732_v61 = vsel %vm589_vm9, %v727_v29, %v730_v60 }
  0xe6   :  { %v4113_v5 = vunpack.i.h.bf16 %v5654_v13  ;;  %v804_v52 = vsel %vm528_vm3, %v803_v51, %v4072_v1  ;;  %v836_v2 = vsel %vm528_vm3, %v835_v32, %v4073_v45  ;;  %v4106_v27 = vpop.permute.xlu0 %4105  ;;  %v4112_v57 = vunpack.i.l.bf16 %v5654_v13 }
  0xe7   :  { %v805_v47 = vsel %vm530_vm4, %v804_v52, %v4097_v54  ;;  %v837_v9 = vsel %vm530_vm4, %v836_v2, %v4098_v0  ;;  %752 = vmatpush1.bf16.msra.mxu0 %v5470_v58  ;;  %v4108_v19 = vunpack.i.h.bf16 %v4106_v27  ;;  %v4107_v56 = vunpack.i.l.bf16 %v4106_v27 }
  0xe8   :  { %3712 = vmatprep.subr.msk.bf16.mxu0 %vm626_vm1, %v5395_v40  ;;  %v733_v12 = vpack.c.bf16 %v732_v61, %v732_v61 }
  0xe9   :  { %v4121_v1 = vpop.permute.xlu1 %4120  ;;  %v806_v45 = vsel %vm532_vm5, %v805_v47, %v4107_v56  ;;  %v838_v11 = vsel %vm532_vm5, %v837_v9, %v4108_v19 }
  0xea   :  { %v4123_v26 = vunpack.i.h.bf16 %v4121_v1  ;;  %v4122_v28 = vunpack.i.l.bf16 %v4121_v1  ;;  %v807_v59 = vsel %vm534_vm6, %v806_v45, %v5617_v35  ;;  %v839_v46 = vsel %vm534_vm6, %v838_v11, %v5613_v39  ;;  %3711 = vmatmul.mubr.msk.bf16.vlgmr.msra.gmra.mxu0 %vm622_vm10, %v733_v12  ;;  %v5675_v14 = vpop.permute.xlu0 %4115 }
  0xeb   :  { %v808_v43 = vsel %vm536_vm7, %v807_v59, %v4112_v57  ;;  %v840_v55 = vsel %vm536_vm7, %v839_v46, %v4113_v5  ;;  %864 = vmatpush1.bf16.msra.mxu0 %v5414_v23  ;;  %v4118_v7 = vunpack.i.h.bf16 %v5675_v14  ;;  %v4117_v20 = vunpack.i.l.bf16 %v5675_v14  ;;  %885 = vmatprep.mubr.bf16.mxu0 %v4701_v36 }
  0xec   :  { %865 = vmatprep.subr.bf16.mxu0 %v5403_v62  ;;  %v940_v25 = vsel %vm163_vm0, %v5344_v18, %v4123_v26  ;;  %v913_v34 = vsel %vm163_vm0, %v5311_v33, %v4122_v28 }
  0xed   :  { %v4131_v38 = vpop.permute.xlu1 %4130  ;;  %v809_v22 = vsel %vm538_vm8, %v808_v43, %v4117_v20  ;;  %v841_v63 = vsel %vm538_vm8, %v840_v55, %v4118_v7 }
  0xee   :  { %v843_v41 = vrot.slane %v809_v22, 7  ;;  %v846_v42 = vrot.slane %v841_v63, 6  ;;  %v5698_v48 = vpop.permute.xlu0 %4125  ;;  %v4133_v0 = vunpack.i.h.bf16 %v4131_v38  ;;  %v4132_v54 = vunpack.i.l.bf16 %v4131_v38 }
  0xef   :  { %866 = vmatpush1.bf16.msra.mxu0 %v5430_v16  ;;  %v4128_v29 = vunpack.i.h.bf16 %v5698_v48  ;;  %v4127_v60 = vunpack.i.l.bf16 %v5698_v48 }
  0xf0   :  { %v848_v4 = vsel %vm589_vm9, %v843_v41, %v846_v42  ;;  %867 = vmatprep.subr.bf16.mxu0 %v5438_v10 }
  0xf1   :  { %v5705_v18 = vpop.permute.xlu1 %4140  ;;  %v849_v17 = vpack.c.bf16 %v848_v4, %v848_v4  ;;  %v5710_v33 = vsel %vm526_vm2, %v940_v25, %v4128_v29  ;;  %v5715_v32 = vsel %vm526_vm2, %v913_v34, %v4127_v60 }
  0xf2   :  { %v915_v51 = vsel %vm528_vm3, %v5715_v32, %v4132_v54  ;;  %v942_v52 = vsel %vm528_vm3, %v5710_v33, %v4133_v0  ;;  %v4136_v2 = vpop.permute.xlu0 %4135  ;;  %v4143_v27 = vunpack.i.h.bf16 %v5705_v18  ;;  %v4142_v61 = vunpack.i.l.bf16 %v5705_v18  ;;  %v5842_v18 = vld [vmem:[%s6883_s2 + $0x10] ss:$8 sps:$4 sm:$0xff]  }
  0xf3   :  { %868 = vmatpush1.bf16.msra.mxu0 %v5470_v58  ;;  %v4138_v47 = vunpack.i.h.bf16 %v4136_v2  ;;  %v4137_v9 = vunpack.i.l.bf16 %v4136_v2 }
  0xf4   :  { %3714 = vmatprep.subr.msk.bf16.mxu0 %vm626_vm1, %v5395_v40 }
  0xf5   :  { %v4151_v19 = vpop.permute.xlu1 %4150  ;;  %v916_v56 = vsel %vm530_vm4, %v915_v51, %v4137_v9  ;;  %v943_v12 = vsel %vm530_vm4, %v942_v52, %v4138_v47 }
  0xf6   :  { %v917_v1 = vsel %vm532_vm5, %v916_v56, %v4142_v61  ;;  %v944_v45 = vsel %vm532_vm5, %v943_v12, %v4143_v27  ;;  %3713 = vmatmul.mubr.msk.bf16.vlgmr.msra.gmra.mxu0 %vm622_vm10, %v849_v17  ;;  %v4146_v11 = vpop.permute.xlu0 %4145  ;;  %v4153_v26 = vunpack.i.h.bf16 %v4151_v19  ;;  %v4152_v28 = vunpack.i.l.bf16 %v4151_v19 }
  0xf7   :  { %v918_v59 = vsel %vm534_vm6, %v917_v1, %v4052_v30  ;;  %v945_v46 = vsel %vm534_vm6, %v944_v45, %v4053_v21  ;;  %970 = vmatpush1.bf16.msra.mxu0 %v5414_v23  ;;  %v4148_v43 = vunpack.i.h.bf16 %v4146_v11  ;;  %v4147_v55 = vunpack.i.l.bf16 %v4146_v11  ;;  %991 = vmatprep.mubr.bf16.mxu0 %v4701_v36 }
  0xf8   :  { %v919_v38 = vsel %vm536_vm7, %v918_v59, %v4057_v53  ;;  %v946_v22 = vsel %vm536_vm7, %v945_v46, %v4058_v15  ;;  %971 = vmatprep.subr.bf16.mxu0 %v5403_v62 }
  0xf9   :  { %v4161_v30 = vpop.permute.xlu1 %4160  ;;  %v920_v44 = vsel %vm538_vm8, %v919_v38, %v5585_v49  ;;  %v947_v21 = vsel %vm538_vm8, %v946_v22, %v5583_v31  ;;  %v1124_v63 = vsel %vm163_vm0, %v5317_v8, %v4148_v43  ;;  %v1102_v25 = vsel %vm163_vm0, %v5287_v24, %v4147_v55 }
  0xfa   :  { %v949_v53 = vrot.slane %v920_v44, 7  ;;  %v952_v34 = vrot.slane %v947_v21, 6  ;;  %v5759_v6 = vsel %vm526_vm2, %v1102_v25, %v4152_v28  ;;  %v5762_v62 = vsel %vm526_vm2, %v1124_v63, %v4153_v26  ;;  %v4156_v15 = vpop.permute.xlu0 %4155  ;;  %v5810_v44 = vld [vmem:[%s6883_s2 + $0x14] ss:$8 sps:$4 sm:$0xff]  }
  0xfb   :  { %972 = vmatpush1.bf16.msra.mxu0 %v5430_v16  ;;  %v4158_v41 = vunpack.i.h.bf16 %v4156_v15  ;;  %v4157_v42 = vunpack.i.l.bf16 %v4156_v15  ;;  %v4163_v0 = vunpack.i.h.bf16 %v4161_v30  ;;  %v4162_v54 = vunpack.i.l.bf16 %v4161_v30 }
  0xfc   :  { %973 = vmatprep.subr.bf16.mxu0 %v5438_v10  ;;  %v954_v17 = vsel %vm589_vm9, %v949_v53, %v952_v34 }
  0xfd   :  { %v4171_v4 = vpop.permute.xlu1 %4170  ;;  %v1104_v51 = vsel %vm528_vm3, %v5759_v6, %v4157_v42  ;;  %v1126_v52 = vsel %vm528_vm3, %v5762_v62, %v4158_v41  ;;  %v955_v56 = vpack.c.bf16 %v954_v17, %v954_v17 }
  0xfe   :  { %v4173_v2 = vunpack.i.h.bf16 %v4171_v4  ;;  %v4172_v47 = vunpack.i.l.bf16 %v4171_v4  ;;  %v1105_v9 = vsel %vm530_vm4, %v1104_v51, %v4162_v54  ;;  %v1127_v16 = vsel %vm530_vm4, %v1126_v52, %v4163_v0  ;;  %v4166_v19 = vpop.permute.xlu0 %4165 }
  0xff   :  { %974 = vmatpush1.bf16.msra.mxu0 %v5470_v58  ;;  %v4168_v10 = vunpack.i.h.bf16 %v4166_v19  ;;  %v4167_v12 = vunpack.i.l.bf16 %v4166_v19 }
 0x100   :  { %v1028_v1 = vsel %vm163_vm0, %v5317_v8, %v4173_v2  ;;  %v1010_v45 = vsel %vm163_vm0, %v5287_v24, %v4172_v47  ;;  %3716 = vmatprep.subr.msk.bf16.mxu0 %vm626_vm1, %v5395_v40 }
 0x101   :  { %v1011_v11 = vsel %vm526_vm2, %v1010_v45, %v4127_v60  ;;  %v1029_v26 = vsel %vm526_vm2, %v1028_v1, %v4128_v29  ;;  %v5786_v58 = vpop.permute.xlu1 %4180  ;;  %v1106_v28 = vsel %vm532_vm5, %v1105_v9, %v4167_v12  ;;  %v1128_v8 = vsel %vm532_vm5, %v1127_v16, %v4168_v10 }
 0x102   :  { %v1012_v59 = vsel %vm528_vm3, %v1011_v11, %v4157_v42  ;;  %v1030_v24 = vsel %vm528_vm3, %v1029_v26, %v4158_v41  ;;  %v1107_v60 = vsel %vm534_vm6, %v1106_v28, %v5617_v35  ;;  %v1129_v48 = vsel %vm534_vm6, %v1128_v8, %v5613_v39  ;;  %3715 = vmatmul.mubr.msk.bf16.vlgmr.msra.gmra.mxu0 %vm622_vm10, %v955_v56  ;;  %v4176_v29 = vpop.permute.xlu0 %4175 }
 0x103   :  { %v4183_v46 = vunpack.i.h.bf16 %v5786_v58  ;;  %v4182_v43 = vunpack.i.l.bf16 %v5786_v58  ;;  %v1108_v55 = vsel %vm536_vm7, %v1107_v60, %v4112_v57  ;;  %v1130_v38 = vsel %vm536_vm7, %v1129_v48, %v4113_v5  ;;  %1058 = vmatpush1.bf16.msra.mxu0 %v5414_v23  ;;  %1079 = vmatprep.mubr.bf16.mxu0 %v4701_v36 }
 0x104   :  { %v4178_v22 = vunpack.i.h.bf16 %v4176_v29  ;;  %v4177_v30 = vunpack.i.l.bf16 %v4176_v29  ;;  %1059 = vmatprep.subr.bf16.mxu0 %v5810_v44  ;;  %v1109_v57 = vsel %vm538_vm8, %v1108_v55, %v4117_v20  ;;  %v1131_v13 = vsel %vm538_vm8, %v1130_v38, %v4118_v7  ;;  %v4259_v55 = vld [vmem:[%s6884_s3 + $0x74] ss:$8 sps:$4 sm:$0xff]  }
 0x105   :  { %v5819_v5 = vpop.permute.xlu1 %4190  ;;  %v1133_v25 = vrot.slane %v1109_v57, 7  ;;  %v1136_v53 = vrot.slane %v1131_v13, 6  ;;  %v1305_v14 = vsel %vm528_vm3, %v1011_v11, %v4182_v43  ;;  %v1324_v7 = vsel %vm528_vm3, %v1029_v26, %v4183_v46 }
 0x106   :  { %v1013_v21 = vsel %vm530_vm4, %v1012_v59, %v4177_v30  ;;  %v1031_v63 = vsel %vm530_vm4, %v1030_v24, %v4178_v22  ;;  %v4186_v15 = vpop.permute.xlu0 %4185  ;;  %v4192_v9 = vunpack.i.l.bf16 %v5819_v5 }
 0x107   :  { %v1014_v34 = vsel %vm532_vm5, %v1013_v21, %v4142_v61  ;;  %v1032_v20 = vsel %vm532_vm5, %v1031_v63, %v4143_v27  ;;  %1060 = vmatpush1.bf16.msra.mxu0 %v5842_v18  ;;  %v1138_v27 = vsel %vm589_vm9, %v1133_v25, %v1136_v53  ;;  %v4188_v61 = vunpack.i.h.bf16 %v4186_v15 }
 0x108   :  { %v1015_v41 = vsel %vm534_vm6, %v1014_v34, %v5617_v35  ;;  %v1033_v42 = vsel %vm534_vm6, %v1032_v20, %v5613_v39  ;;  %v5855_v39 = vld [vmem:[%s6883_s2 + $0x4] ss:$8 sps:$4 sm:$0xff]   ;;  %v1139_v54 = vpack.c.bf16 %v1138_v27, %v1138_v27  ;;  %v4187_v4 = vunpack.i.l.bf16 %v4186_v15  ;;  %v4257_v20 = vld [vmem:[%s6884_s3 + $0x70] ss:$8 sps:$4 sm:$0xff]  }
 0x109   :  { %v1016_v0 = vsel %vm536_vm7, %v1015_v41, %v4087_v3  ;;  %v1034_v35 = vsel %vm536_vm7, %v1033_v42, %v4088_v50  ;;  %1061 = vmatprep.subr.bf16.mxu0 %v5855_v39  ;;  %v4201_v17 = vpop.permute.xlu1 %4200  ;;  %v1325_v37 = vsel %vm530_vm4, %v1324_v7, %v4188_v61  ;;  %v4193_v50 = vunpack.i.h.bf16 %v5819_v5  ;;  %v4262_v42 = vld [vmem:[%s6884_s3 + $0x64] ss:$8 sps:$4 sm:$0xff]  }
 0x10a   :  { %v1017_v51 = vsel %vm538_vm8, %v1016_v0, %v5585_v49  ;;  %v1035_v3 = vsel %vm538_vm8, %v1034_v35, %v5583_v31  ;;  %3719 = vmatmul.mubr.msk.bf16.vlgmr.msra.gmra.mxu1 %vm622_vm10, %v1139_v54  ;;  %v1306_v47 = vsel %vm530_vm4, %v1305_v14, %v4187_v4  ;;  %v5867_v16 = vpop.permute.xlu0 %4195  ;;  %v5872_v49 = vld [vmem:[%s6883_s2] ss:$8 sps:$4 sm:$0xff]   ;;  %v4203_v10 = vunpack.i.h.bf16 %v4201_v17 }
 0x10b   :  { %v1037_v52 = vrot.slane %v1017_v51, 7  ;;  %v1040_v2 = vrot.slane %v1035_v3, 6  ;;  %1062 = vmatpush1.bf16.msra.mxu0 %v5872_v49  ;;  %v1326_v31 = vsel %vm532_vm5, %v1325_v37, %v4193_v50  ;;  %v4198_v19 = vunpack.i.h.bf16 %v5867_v16  ;;  %1352 = vmatpush1.bf16.msra.mxu1 %v5414_v23  ;;  %v4260_v3 = vld [vmem:[%s6884_s3 + $0x60] ss:$8 sps:$4 sm:$0xff]  }
 0x10c   :  { %v4197_v56 = vunpack.i.l.bf16 %v5867_v16  ;;  %v1307_v1 = vsel %vm532_vm5, %v1306_v47, %v4192_v9  ;;  %v4202_v45 = vunpack.i.l.bf16 %v4201_v17  ;;  %3720 = vmatprep.subr.msk.bf16.mxu0 %vm626_vm1, %v5395_v40  ;;  %1353 = vmatprep.subr.bf16.mxu1 %v5810_v44  ;;  %v1416_v4 = vsel %vm528_vm3, %v5762_v62, %v4183_v46  ;;  %v4265_v62 = vld [vmem:[%s6884_s3 + $0x54] ss:$8 sps:$4 sm:$0xff]   ;;  %v4266_v16 = vld [vmem:[%s6884_s3 + $0x40] ss:$8 sps:$4 sm:$0xff]  }
 0x10d   :  { %v1042_v12 = vsel %vm589_vm9, %v1037_v52, %v1040_v2  ;;  %v4211_v11 = vpop.permute.xlu1 %4210  ;;  %v1327_v8 = vsel %vm534_vm6, %v1326_v31, %v4198_v19  ;;  %1373 = vmatprep.mubr.bf16.mxu1 %v4701_v36 }
 0x10e   :  { %v1043_v26 = vpack.c.bf16 %v1042_v12, %v1042_v12  ;;  %v1308_v28 = vsel %vm534_vm6, %v1307_v1, %v4197_v56  ;;  %v1328_v24 = vsel %vm536_vm7, %v1327_v8, %v4203_v10  ;;  %v4206_v60 = vpop.permute.xlu0 %4205  ;;  %v4213_v48 = vunpack.i.h.bf16 %v4211_v11 }
 0x10f   :  { %v1309_v59 = vsel %vm536_vm7, %v1308_v28, %v4202_v45  ;;  %v4212_v29 = vunpack.i.l.bf16 %v4211_v11  ;;  %v4208_v38 = vunpack.i.h.bf16 %v4206_v60  ;;  %v4207_v22 = vunpack.i.l.bf16 %v4206_v60  ;;  %1354 = vmatpush1.bf16.msra.mxu1 %v5842_v18  ;;  %v4263_v11 = vld [vmem:[%s6884_s3 + $0x50] ss:$8 sps:$4 sm:$0xff]  }
 0x110   :  { %3717 = vmatmul.mubr.msk.bf16.vlgmr.msra.gmra.mxu0 %vm622_vm10, %v1043_v26  ;;  %1355 = vmatprep.subr.bf16.mxu1 %v5855_v39  ;;  %v1234_v53 = vsel %vm528_vm3, %v5710_v33, %v4213_v48  ;;  %v1396_v33 = vsel %vm528_vm3, %v5759_v6, %v4182_v43 }
 0x111   :  { %1262 = vmatpush1.bf16.msra.mxu0 %v5414_v23  ;;  %v4221_v30 = vpop.permute.xlu1 %4220  ;;  %v1310_v57 = vsel %vm538_vm8, %v1309_v59, %v4207_v22  ;;  %v1329_v13 = vsel %vm538_vm8, %v1328_v24, %v4208_v38  ;;  %1283 = vmatprep.mubr.bf16.mxu0 %v4701_v36  ;;  %v1206_v25 = vsel %vm528_vm3, %v5715_v32, %v4212_v29 }
 0x112   :  { %1263 = vmatprep.subr.bf16.mxu0 %v5810_v44  ;;  %v1331_v21 = vrot.slane %v1310_v57, 7  ;;  %v1334_v63 = vrot.slane %v1329_v13, 6  ;;  %v4216_v34 = vpop.permute.xlu0 %4215  ;;  %v4223_v15 = vunpack.i.h.bf16 %v4221_v30  ;;  %v4222_v41 = vunpack.i.l.bf16 %v4221_v30 }
 0x113   :  { %v4218_v14 = vunpack.i.h.bf16 %v4216_v34  ;;  %v4217_v7 = vunpack.i.l.bf16 %v4216_v34  ;;  %1356 = vmatpush1.bf16.msra.mxu1 %v5872_v49 }
 0x114   :  { %v1336_v32 = vsel %vm589_vm9, %v1331_v21, %v1334_v63  ;;  %3220 = vmatprep.subr.bf16.mxu1 %v4259_v55  ;;  %v4274_v63 = vld [vmem:[%s6884_s3 + $0x34] ss:$8 sps:$4 sm:$0xff]  }
 0x115   :  { %1264 = vmatpush1.bf16.msra.mxu0 %v5842_v18  ;;  %v4231_v27 = vpop.permute.xlu1 %4230  ;;  %v1337_v61 = vpack.c.bf16 %v1336_v32, %v1336_v32  ;;  %v1207_v0 = vsel %vm530_vm4, %v1206_v25, %v4217_v7  ;;  %v1235_v35 = vsel %vm530_vm4, %v1234_v53, %v4218_v14  ;;  %v4278_v14 = vld [vmem:[%s6884_s3 + $0x20] ss:$8 sps:$4 sm:$0xff]   ;;  %v4277_v7 = vld [vmem:[%s6884_s3 + $0x164] ss:$8 sps:$4 sm:$0xff]   ;;  %v4281_v32 = vld [vmem:[%s6884_s3 + $0x150] ss:$8 sps:$4 sm:$0xff]  }
 0x116   :  { %1265 = vmatprep.subr.bf16.mxu0 %v5855_v39  ;;  %v4233_v54 = vunpack.i.h.bf16 %v4231_v27  ;;  %v1208_v6 = vsel %vm532_vm5, %v1207_v0, %v4192_v9  ;;  %v1236_v43 = vsel %vm532_vm5, %v1235_v35, %v4193_v50  ;;  %v4226_v17 = vpop.permute.xlu0 %4225  ;;  %v4232_v51 = vunpack.i.l.bf16 %v4231_v27  ;;  %v4298_v27 = vld [vmem:[%s6884_s3 + $0xf4] ss:$8 sps:$4 sm:$0xff]   ;;  %v4296_v0 = vld [vmem:[%s6884_s3 + $0xf0] ss:$8 sps:$4 sm:$0xff]   ;;  %v4287_v35 = vld [vmem:[%s6884_s3 + $0x140] ss:$8 sps:$4 sm:$0xff]  }
 0x117   :  { %v1209_v37 = vsel %vm534_vm6, %v1208_v6, %v4222_v41  ;;  %v1237_v52 = vsel %vm534_vm6, %v1236_v43, %v4223_v15  ;;  %v4228_v58 = vunpack.i.h.bf16 %v4226_v17  ;;  %v4227_v2 = vunpack.i.l.bf16 %v4226_v17  ;;  %3723 = vmatmul.mubr.msk.bf16.vlgmr.msra.gmra.mxu1 %vm622_vm10, %v1337_v61  ;;  %v4275_v15 = vld [vmem:[%s6884_s3 + $0x160] ss:$8 sps:$4 sm:$0xff]   ;;  %v4292_v41 = vld [vmem:[%s6884_s3 + $0x4] ss:$8 sps:$4 sm:$0xff]   ;;  %v4293_v43 = vld [vmem:[%s6884_s3 + $0x130] ss:$8 sps:$4 sm:$0xff]  }
 0x118   :  { %v1397_v46 = vsel %vm530_vm4, %v1396_v33, %v4232_v51  ;;  %3221 = vmatpush1.bf16.msra.mxu1 %v4257_v20  ;;  %v1417_v9 = vsel %vm530_vm4, %v1416_v4, %v4233_v54  ;;  %v4290_v33 = vld [vmem:[%s6884_s3] ss:$8 sps:$4 sm:$0xff]   ;;  %v4289_v61 = vld [vmem:[%s6884_s3 + $0x144] ss:$8 sps:$4 sm:$0xff]   ;;  %v4295_v4 = vld [vmem:[%s6884_s3 + $0x134] ss:$8 sps:$4 sm:$0xff]  }
 0x119   :  { %1266 = vmatpush1.bf16.msra.mxu0 %v5872_v49  ;;  %v4241_v5 = vpop.permute.xlu1 %4240  ;;  %v1210_v50 = vsel %vm536_vm7, %v1209_v37, %v4227_v2  ;;  %v1238_v47 = vsel %vm536_vm7, %v1237_v52, %v4228_v58  ;;  %3222 = vmatprep.subr.bf16.mxu1 %v4262_v42  ;;  %v4283_v42 = vld [vmem:[%s6884_s3 + $0x154] ss:$8 sps:$4 sm:$0xff]   ;;  %v4304_v54 = vld [vmem:[%s6884_s3 + $0xe4] ss:$8 sps:$4 sm:$0xff]   ;;  %v4302_v6 = vld [vmem:[%s6884_s3 + $0xe0] ss:$8 sps:$4 sm:$0xff]  }
 0x11a   :  { %3724 = vmatprep.subr.msk.bf16.mxu0 %vm626_vm1, %v5395_v40  ;;  %v1211_v31 = vsel %vm538_vm8, %v1210_v50, %v4207_v22  ;;  %v1239_v10 = vsel %vm538_vm8, %v1238_v47, %v4208_v38  ;;  %v4236_v12 = vpop.permute.xlu0 %4235  ;;  %v4243_v1 = vunpack.i.h.bf16 %v4241_v5  ;;  %v4242_v45 = vunpack.i.l.bf16 %v4241_v5  ;;  %v4268_v22 = vld [vmem:[%s6884_s3 + $0x44] ss:$8 sps:$4 sm:$0xff]   ;;  %v4310_v17 = vld [vmem:[%s6884_s3 + $0xd4] ss:$8 sps:$4 sm:$0xff]   ;;  %v4299_v37 = vld [vmem:[%s6884_s3 + $0x120] ss:$8 sps:$4 sm:$0xff]  }
 0x11b   :  { %v1241_v26 = vrot.slane %v1211_v31, 7  ;;  %v1244_v28 = vrot.slane %v1239_v10, 6  ;;  %v4238_v8 = vunpack.i.h.bf16 %v4236_v12  ;;  %v4237_v59 = vunpack.i.l.bf16 %v4236_v12  ;;  %v4301_v51 = vld [vmem:[%s6884_s3 + $0x124] ss:$8 sps:$4 sm:$0xff]   ;;  %v4307_v58 = vld [vmem:[%s6884_s3 + $0x114] ss:$8 sps:$4 sm:$0xff]  }
 0x11c   :  { %3223 = vmatpush1.bf16.msra.mxu1 %v4260_v3  ;;  %v4308_v3 = vld [vmem:[%s6884_s3 + $0xd0] ss:$8 sps:$4 sm:$0xff]   ;;  %v4316_v52 = vld [vmem:[%s6884_s3 + $0xc4] ss:$8 sps:$4 sm:$0xff]   ;;  %v4314_v2 = vld [vmem:[%s6884_s3 + $0xc0] ss:$8 sps:$4 sm:$0xff]  }
 0x11d   :  { %v1398_v24 = vsel %vm532_vm5, %v1397_v46, %v4237_v59  ;;  %v1418_v40 = vsel %vm532_vm5, %v1417_v9, %v4238_v8  ;;  %v1246_v60 = vsel %vm589_vm9, %v1241_v26, %v1244_v28  ;;  %3224 = vmatprep.subr.bf16.mxu1 %v4265_v62  ;;  %v4305_v62 = vld [vmem:[%s6884_s3 + $0x110] ss:$8 sps:$4 sm:$0xff]   ;;  %v4322_v46 = vld [vmem:[%s6884_s3 + $0xb4] ss:$8 sps:$4 sm:$0xff]   ;;  %v4313_v5 = vld [vmem:[%s6884_s3 + $0x104] ss:$8 sps:$4 sm:$0xff]  }
 0x11e   :  { %v1247_v48 = vpack.c.bf16 %v1246_v60, %v1246_v60  ;;  %v1399_v29 = vsel %vm534_vm6, %v1398_v24, %v4197_v56  ;;  %v1419_v55 = vsel %vm534_vm6, %v1418_v40, %v4198_v19  ;;  %v4246_v38 = vpop.permute.xlu0 %4245  ;;  %v4320_v50 = vld [vmem:[%s6884_s3 + $0xb0] ss:$8 sps:$4 sm:$0xff]   ;;  %v4311_v47 = vld [vmem:[%s6884_s3 + $0x100] ss:$8 sps:$4 sm:$0xff]   ;;  %v4328_v9 = vld [vmem:[%s6884_s3 + $0xa4] ss:$8 sps:$4 sm:$0xff]  }
 0x11f   :  { %v1400_v30 = vsel %vm536_vm7, %v1399_v29, %v4242_v45  ;;  %v1420_v57 = vsel %vm536_vm7, %v1419_v55, %v4243_v1  ;;  %v4248_v13 = vunpack.i.h.bf16 %v4246_v38  ;;  %v4247_v21 = vunpack.i.l.bf16 %v4246_v38  ;;  %v4319_v31 = vld [vmem:[%s6884_s3 + $0x1f4] ss:$8 sps:$4 sm:$0xff]   ;;  %v4326_v10 = vld [vmem:[%s6884_s3 + $0xa0] ss:$8 sps:$4 sm:$0xff]   ;;  %v4317_v12 = vld [vmem:[%s6884_s3 + $0x1f0] ss:$8 sps:$4 sm:$0xff]  }
 0x120   :  { %3721 = vmatmul.mubr.msk.bf16.vlgmr.msra.gmra.mxu0 %vm622_vm10, %v1247_v48  ;;  %3225 = vmatpush1.bf16.msra.mxu1 %v4263_v11  ;;  %v4334_v1 = vld [vmem:[%s6884_s3 + $0x94] ss:$8 sps:$4 sm:$0xff]   ;;  %v4325_v45 = vld [vmem:[%s6884_s3 + $0x1e4] ss:$8 sps:$4 sm:$0xff]   ;;  %v4332_v11 = vld [vmem:[%s6884_s3 + $0x90] ss:$8 sps:$4 sm:$0xff]  }
 0x121   :  { %1444 = vmatpush1.bf16.msra.mxu0 %v5414_v23  ;;  %v1401_v19 = vsel %vm538_vm8, %v1400_v30, %v4247_v21  ;;  %v1421_v56 = vsel %vm538_vm8, %v1420_v57, %v4248_v13  ;;  %1465 = vmatprep.mubr.bf16.mxu0 %v4701_v36  ;;  %v4272_v23 = vld [vmem:[%s6884_s3 + $0x30] ss:$8 sps:$4 sm:$0xff]   ;;  %v4280_v36 = vld [vmem:[%s6884_s3 + $0x24] ss:$8 sps:$4 sm:$0xff]   ;;  %v4323_v26 = vld [vmem:[%s6884_s3 + $0x1e0] ss:$8 sps:$4 sm:$0xff]  }
 0x122   :  { %v1423_v25 = vrot.slane %v1401_v19, 7  ;;  %v1426_v53 = vrot.slane %v1421_v56, 6  ;;  %1445 = vmatprep.subr.bf16.mxu0 %v5810_v44  ;;  %3226 = vmatprep.subr.bf16.mxu1 %v4268_v22  ;;  %v4271_v44 = vld [vmem:[%s6884_s3 + $0x174] ss:$8 sps:$4 sm:$0xff]   ;;  %v4340_v28 = vld [vmem:[%s6884_s3 + $0x84] ss:$8 sps:$4 sm:$0xff]  }
 0x123   :  { %v4331_v8 = vld [vmem:[%s6884_s3 + $0x1d4] ss:$8 sps:$4 sm:$0xff]   ;;  %v4338_v59 = vld [vmem:[%s6884_s3 + $0x80] ss:$8 sps:$4 sm:$0xff]   ;;  %v4329_v24 = vld [vmem:[%s6884_s3 + $0x1d0] ss:$8 sps:$4 sm:$0xff]  }
 0x124   :  { %3227 = vmatpush1.bf16.msra.mxu1 %v4266_v16  ;;  %v1428_v34 = vsel %vm589_vm9, %v1423_v25, %v1426_v53  ;;  %v4349_v40 = vld [vmem:[%s6884_s3 + $0x274] ss:$8 sps:$4 sm:$0xff]   ;;  %v4337_v60 = vld [vmem:[%s6884_s3 + $0x1c4] ss:$8 sps:$4 sm:$0xff]   ;;  %v4335_v48 = vld [vmem:[%s6884_s3 + $0x1c0] ss:$8 sps:$4 sm:$0xff]  }
 0x125   :  { %1446 = vmatpush1.bf16.msra.mxu0 %v5842_v18  ;;  %3228 = vmatprep.subr.bf16.mxu1 %v4274_v63  ;;  %v1429_v20 = vpack.c.bf16 %v1428_v34, %v1428_v34  ;;  %v4269_v18 = vld [vmem:[%s6884_s3 + $0x170] ss:$8 sps:$4 sm:$0xff]   ;;  %v4343_v29 = vld [vmem:[%s6884_s3 + $0x1b4] ss:$8 sps:$4 sm:$0xff]   ;;  %v4346_v38 = vld [vmem:[%s6884_s3 + $0x1a4] ss:$8 sps:$4 sm:$0xff]  }
 0x126   :  { %1447 = vmatprep.subr.bf16.mxu0 %v5855_v39  ;;  %v4286_v39 = vld [vmem:[%s6884_s3 + $0x14] ss:$8 sps:$4 sm:$0xff]   ;;  %v4341_v55 = vld [vmem:[%s6884_s3 + $0x1b0] ss:$8 sps:$4 sm:$0xff]   ;;  %v4344_v22 = vld [vmem:[%s6884_s3 + $0x1a0] ss:$8 sps:$4 sm:$0xff]  }
 0x127   :  { %v4352_v30 = vld [vmem:[%s6884_s3 + $0x194] ss:$8 sps:$4 sm:$0xff]   ;;  %v4350_v57 = vld [vmem:[%s6884_s3 + $0x190] ss:$8 sps:$4 sm:$0xff]   ;;  %v4358_v13 = vld [vmem:[%s6884_s3 + $0x184] ss:$8 sps:$4 sm:$0xff]  }
 0x128   :  { %3229 = vmatpush1.bf16.msra.mxu1 %v4272_v23  ;;  %v4356_v21 = vld [vmem:[%s6884_s3 + $0x180] ss:$8 sps:$4 sm:$0xff]   ;;  %v4367_v16 = vld [vmem:[%s6884_s3 + $0x374] ss:$8 sps:$4 sm:$0xff]   ;;  %v4347_v25 = vld [vmem:[%s6884_s3 + $0x270] ss:$8 sps:$4 sm:$0xff]  }
 0x129   :  { %1448 = vmatpush1.bf16.msra.mxu0 %v5872_v49  ;;  %3230 = vmatprep.subr.bf16.mxu1 %v4280_v36  ;;  %v4284_v49 = vld [vmem:[%s6884_s3 + $0x10] ss:$8 sps:$4 sm:$0xff]   ;;  %v4355_v34 = vld [vmem:[%s6884_s3 + $0x264] ss:$8 sps:$4 sm:$0xff]  }
 0x12a   :  { %3261 = vmatprep.subr.bf16.mxu0 %v4271_v44  ;;  %v4353_v44 = vld [vmem:[%s6884_s3 + $0x260] ss:$8 sps:$4 sm:$0xff]  }
 0x12c   :  { %3725 = vmatmul.mubr.msk.bf16.vlgmr.msra.gmra.mxu0 %vm622_vm10, %v1429_v20  ;;  %3231 = vmatpush1.bf16.msra.mxu1 %v4278_v14  ;;  %v4361_v20 = vld [vmem:[%s6884_s3 + $0x254] ss:$8 sps:$4 sm:$0xff]   ;;  %v4359_v14 = vld [vmem:[%s6884_s3 + $0x250] ss:$8 sps:$4 sm:$0xff]  }
 0x12d   :  { %3262 = vmatpush1.bf16.msra.mxu0 %v4269_v18  ;;  %3232 = vmatprep.subr.bf16.mxu1 %v4286_v39  ;;  %v4364_v39 = vld [vmem:[%s6884_s3 + $0x244] ss:$8 sps:$4 sm:$0xff]  }
 0x12e   :  { %3263 = vmatprep.subr.bf16.mxu0 %v4277_v7 }
 0x130   :  { %3233 = vmatpush1.bf16.msra.mxu1 %v4284_v49 }
 0x131   :  { %3264 = vmatpush1.bf16.msra.mxu0 %v4275_v15  ;;  %3234 = vmatprep.subr.bf16.mxu1 %v4292_v41  ;;  %v4362_v15 = vld [vmem:[%s6884_s3 + $0x240] ss:$8 sps:$4 sm:$0xff]   ;;  %v4365_v41 = vld [vmem:[%s6884_s3 + $0x370] ss:$8 sps:$4 sm:$0xff]  }
 0x132   :  { %3265 = vmatprep.subr.bf16.mxu0 %v4283_v42 }
 0x134   :  { %3235 = vmatpush1.bf16.msra.mxu1 %v4290_v33 }
 0x135   :  { %3266 = vmatpush1.bf16.msra.mxu0 %v4281_v32  ;;  %3236 = vmatprep.subr.bf16.mxu1 %v4298_v27  ;;  %v4370_v32 = vld [vmem:[%s6884_s3 + $0x234] ss:$8 sps:$4 sm:$0xff]   ;;  %v4373_v27 = vld [vmem:[%s6884_s3 + $0x364] ss:$8 sps:$4 sm:$0xff]  }
 0x136   :  { %3267 = vmatprep.subr.bf16.mxu0 %v4289_v61 }
 0x138   :  { %3237 = vmatpush2.bf16.msra.mxu1 %v4296_v0  ;;  %v4368_v0 = vld [vmem:[%s6884_s3 + $0x230] ss:$8 sps:$4 sm:$0xff]  }
 0x139   :  { %3268 = vmatpush1.bf16.msra.mxu0 %v4287_v35  ;;  %3238 = vmatprep.subr.bf16.mxu1 %v4304_v54  ;;  %v4371_v35 = vld [vmem:[%s6884_s3 + $0x360] ss:$8 sps:$4 sm:$0xff]   ;;  %v4376_v54 = vld [vmem:[%s6884_s3 + $0x224] ss:$8 sps:$4 sm:$0xff]  }
 0x13a   :  { %3269 = vmatprep.subr.bf16.mxu0 %v4295_v4  ;;  %v4379_v4 = vld [vmem:[%s6884_s3 + $0x354] ss:$8 sps:$4 sm:$0xff]  }
 0x13c   :  { %3239 = vmatpush2.bf16.msra.mxu1 %v4302_v6  ;;  %v4374_v6 = vld [vmem:[%s6884_s3 + $0x220] ss:$8 sps:$4 sm:$0xff]  }
 0x13d   :  { %3270 = vmatpush1.bf16.msra.mxu0 %v4293_v43  ;;  %3240 = vmatprep.subr.bf16.mxu1 %v4310_v17  ;;  %v4377_v43 = vld [vmem:[%s6884_s3 + $0x350] ss:$8 sps:$4 sm:$0xff]  }
 0x13e   :  { %3271 = vmatprep.subr.bf16.mxu0 %v4301_v51  ;;  %v4382_v51 = vld [vmem:[%s6884_s3 + $0x214] ss:$8 sps:$4 sm:$0xff]  }
 0x140   :  { %3241 = vmatpush2.bf16.msra.mxu1 %v4308_v3  ;;  %v4385_v3 = vld [vmem:[%s6884_s3 + $0x344] ss:$8 sps:$4 sm:$0xff]  }
 0x141   :  { %3272 = vmatpush1.bf16.msra.mxu0 %v4299_v37  ;;  %3242 = vmatprep.subr.bf16.mxu1 %v4316_v52 }
 0x142   :  { %3273 = vmatprep.subr.bf16.mxu0 %v4307_v58  ;;  %v4380_v58 = vld [vmem:[%s6884_s3 + $0x210] ss:$8 sps:$4 sm:$0xff]  }
 0x144   :  { %3243 = vmatpush2.bf16.msra.mxu1 %v4314_v2  ;;  %v4383_v2 = vld [vmem:[%s6884_s3 + $0x340] ss:$8 sps:$4 sm:$0xff]  }
 0x145   :  { %3274 = vmatpush1.bf16.msra.mxu0 %v4305_v62  ;;  %3244 = vmatprep.subr.bf16.mxu1 %v4322_v46  ;;  %v4388_v46 = vld [vmem:[%s6884_s3 + $0x204] ss:$8 sps:$4 sm:$0xff]  }
 0x146   :  { %3275 = vmatprep.subr.bf16.mxu0 %v4313_v5  ;;  %v4391_v5 = vld [vmem:[%s6884_s3 + $0x334] ss:$8 sps:$4 sm:$0xff]  }
 0x148   :  { %3245 = vmatpush2.bf16.msra.mxu1 %v4320_v50 }
 0x149   :  { %3276 = vmatpush1.bf16.msra.mxu0 %v4311_v47  ;;  %3246 = vmatprep.subr.bf16.mxu1 %v4328_v9  ;;  %v4386_v47 = vld [vmem:[%s6884_s3 + $0x200] ss:$8 sps:$4 sm:$0xff]   ;;  %v4389_v9 = vld [vmem:[%s6884_s3 + $0x330] ss:$8 sps:$4 sm:$0xff]  }
 0x14a   :  { %3277 = vmatprep.subr.bf16.mxu0 %v4319_v31  ;;  %v4394_v31 = vld [vmem:[%s6884_s3 + $0x2f4] ss:$8 sps:$4 sm:$0xff]  }
 0x14c   :  { %3247 = vmatpush2.bf16.msra.mxu1 %v4326_v10  ;;  %v4397_v10 = vld [vmem:[%s6884_s3 + $0x324] ss:$8 sps:$4 sm:$0xff]  }
 0x14d   :  { %3278 = vmatpush2.bf16.msra.mxu0 %v4317_v12  ;;  %3248 = vmatprep.subr.bf16.mxu1 %v4334_v1  ;;  %v4392_v12 = vld [vmem:[%s6884_s3 + $0x2f0] ss:$8 sps:$4 sm:$0xff]   ;;  %v4395_v1 = vld [vmem:[%s6884_s3 + $0x320] ss:$8 sps:$4 sm:$0xff]  }
 0x14e   :  { %3279 = vmatprep.subr.bf16.mxu0 %v4325_v45 }
 0x150   :  { %3249 = vmatpush2.bf16.msra.mxu1 %v4332_v11  ;;  %v4400_v11 = vld [vmem:[%s6884_s3 + $0x2e4] ss:$8 sps:$4 sm:$0xff]  }
 0x151   :  { %3280 = vmatpush2.bf16.msra.mxu0 %v4323_v26  ;;  %3250 = vmatprep.subr.bf16.mxu1 %v4340_v28  ;;  %v4403_v26 = vld [vmem:[%s6884_s3 + $0x314] ss:$8 sps:$4 sm:$0xff]  }
 0x152   :  { %3281 = vmatprep.subr.bf16.mxu0 %v4331_v8 }
 0x154   :  { %3251 = vmatpush2.bf16.msra.mxu1 %v4338_v59  ;;  %v4398_v59 = vld [vmem:[%s6884_s3 + $0x2e0] ss:$8 sps:$4 sm:$0xff]  }
 0x155   :  { %3282 = vmatpush2.bf16.msra.mxu0 %v4329_v24  ;;  %3302 = vmatprep.subr.bf16.mxu1 %v4349_v40  ;;  %v4401_v24 = vld [vmem:[%s6884_s3 + $0x310] ss:$8 sps:$4 sm:$0xff]  }
 0x156   :  { %3283 = vmatprep.subr.bf16.mxu0 %v4337_v60  ;;  %v4406_v60 = vld [vmem:[%s6884_s3 + $0x2d4] ss:$8 sps:$4 sm:$0xff]  }
 0x159   :  { %3284 = vmatpush2.bf16.msra.mxu0 %v4335_v48  ;;  %v4409_v48 = vld [vmem:[%s6884_s3 + $0x304] ss:$8 sps:$4 sm:$0xff]  }
 0x15a   :  { %3285 = vmatprep.subr.bf16.mxu0 %v4343_v29 }
 0x15d   :  { %3286 = vmatpush2.bf16.msra.mxu0 %v4341_v55  ;;  %v4404_v55 = vld [vmem:[%s6884_s3 + $0x2d0] ss:$8 sps:$4 sm:$0xff]  }
 0x15e   :  { %3287 = vmatprep.subr.bf16.mxu0 %v4346_v38  ;;  %v4407_v38 = vld [vmem:[%s6884_s3 + $0x300] ss:$8 sps:$4 sm:$0xff]  }
 0x161   :  { %3288 = vmatpush2.bf16.msra.mxu0 %v4344_v22 }
 0x162   :  { %3289 = vmatprep.subr.bf16.mxu0 %v4352_v30  ;;  %v4412_v30 = vld [vmem:[%s6884_s3 + $0x2c4] ss:$8 sps:$4 sm:$0xff]  }
 0x165   :  { %3290 = vmatpush2.bf16.msra.mxu0 %v4350_v57  ;;  %v4415_v57 = vld [vmem:[%s6884_s3 + $0x3f4] ss:$8 sps:$4 sm:$0xff]  }
 0x166   :  { %3291 = vmatprep.subr.bf16.mxu0 %v4358_v13 }
 0x169   :  { %3292 = vmatpush2.bf16.msra.mxu0 %v4356_v21  ;;  %v4410_v21 = vld [vmem:[%s6884_s3 + $0x2c0] ss:$8 sps:$4 sm:$0xff]  }
 0x16a   :  { %3343 = vmatprep.subr.bf16.mxu0 %v4367_v16  ;;  %v4413_v16 = vld [vmem:[%s6884_s3 + $0x3f0] ss:$8 sps:$4 sm:$0xff]  }
 0x19e   :  { %v667_v19 = vpop.f32.mrf.mxu0 }
 0x19f   :  { %v1474_v53 = vpack.c.bf16 %v667_v19, %v667_v19 }
 0x1a0   :  { %v669_v56 = vpop.f32.mrf.mxu0 }
 0x1a1   :  { %v1475_v63 = vpack.c.bf16 %v669_v56, %v669_v56  ;;  %v4418_v56 = vld [vmem:[%s6884_s3 + $0x2b4] ss:$8 sps:$4 sm:$0xff]  }
 0x1a2   :  { %v671_v23 = vpop.f32.mrf.mxu0 }
 0x1a3   :  { %3252 = vmatprep.mubr.bf16.mxu1 %v1475_v63  ;;  %v4421_v63 = vld [vmem:[%s6884_s3 + $0x3e4] ss:$8 sps:$4 sm:$0xff]  }
 0x1a4   :  { %v672_v36 = vpop.f32.mrf.mxu0  ;;  %3253 = vmatmul.mubr.bf16.vlgmr.msra.gmra.mxu1 %v1474_v53 }
 0x1a5   :  { %3303 = vmatpush1.bf16.msra.mxu1 %v4347_v25  ;;  %v4419_v36 = vld [vmem:[%s6884_s3 + $0x3e0] ss:$8 sps:$4 sm:$0xff]  }
 0x1a6   :  { %3304 = vmatprep.subr.bf16.mxu1 %v4355_v34  ;;  %v4416_v34 = vld [vmem:[%s6884_s3 + $0x2b0] ss:$8 sps:$4 sm:$0xff]  }
 0x1a9   :  { %3305 = vmatpush1.bf16.msra.mxu1 %v4353_v44  ;;  %v4424_v44 = vld [vmem:[%s6884_s3 + $0x2a4] ss:$8 sps:$4 sm:$0xff]  }
 0x1aa   :  { %v771_v18 = vpop.f32.mrf.mxu0  ;;  %3306 = vmatprep.subr.bf16.mxu1 %v4361_v20  ;;  %v4427_v20 = vld [vmem:[%s6884_s3 + $0x3d4] ss:$8 sps:$4 sm:$0xff]  }
 0x1ab   :  { %v1476_v42 = vpack.c.bf16 %v771_v18, %v771_v18 }
 0x1ac   :  { %v773_v7 = vpop.f32.mrf.mxu0 }
 0x1ad   :  { %v1477_v49 = vpack.c.bf16 %v773_v7, %v773_v7  ;;  %3307 = vmatpush1.bf16.msra.mxu1 %v4359_v14  ;;  %v4425_v7 = vld [vmem:[%s6884_s3 + $0x3d0] ss:$8 sps:$4 sm:$0xff]  }
 0x1ae   :  { %v775_v33 = vpop.f32.mrf.mxu0  ;;  %3308 = vmatprep.subr.bf16.mxu1 %v4364_v39  ;;  %v4422_v39 = vld [vmem:[%s6884_s3 + $0x2a0] ss:$8 sps:$4 sm:$0xff]  }
 0x1af   :  { %3293 = vmatprep.mubr.bf16.mxu0 %v1477_v49  ;;  %v4430_v49 = vld [vmem:[%s6884_s3 + $0x294] ss:$8 sps:$4 sm:$0xff]   ;;  %v4431_v33 = vld [vmem:[%s6884_s3 + $0x3c0] ss:$8 sps:$4 sm:$0xff]  }
 0x1b0   :  { %v776_v61 = vpop.f32.mrf.mxu0  ;;  %3294 = vmatmul.mubr.bf16.vlgmr.msra.gmra.mxu0 %v1476_v42  ;;  %v4428_v42 = vld [vmem:[%s6884_s3 + $0x290] ss:$8 sps:$4 sm:$0xff]  }
 0x1b1   :  { %3309 = vmatpush1.bf16.msra.mxu1 %v4362_v15  ;;  %3344 = vmatpush1.bf16.msra.mxu0 %v4365_v41  ;;  %v4433_v15 = vld [vmem:[%s6884_s3 + $0x3c4] ss:$8 sps:$4 sm:$0xff]   ;;  %v4439_v61 = vld [vmem:[%s6884_s3 + $0x3b4] ss:$8 sps:$4 sm:$0xff]  }
 0x1b2   :  { %3310 = vmatprep.subr.bf16.mxu1 %v4370_v32  ;;  %3345 = vmatprep.subr.bf16.mxu0 %v4373_v27  ;;  %v4436_v27 = vld [vmem:[%s6884_s3 + $0x284] ss:$8 sps:$4 sm:$0xff]  }
 0x1b5   :  { %3311 = vmatpush1.bf16.msra.mxu1 %v4368_v0  ;;  %3346 = vmatpush1.bf16.msra.mxu0 %v4371_v35  ;;  %v4434_v35 = vld [vmem:[%s6884_s3 + $0x280] ss:$8 sps:$4 sm:$0xff]  }
 0x1b6   :  { %3312 = vmatprep.subr.bf16.mxu1 %v4376_v54  ;;  %3347 = vmatprep.subr.bf16.mxu0 %v4379_v4  ;;  %v6205_v17 = vpop.f32.mrf.mxu0  ;;  %v4437_v54 = vld [vmem:[%s6884_s3 + $0x3b0] ss:$8 sps:$4 sm:$0xff]  }
 0x1b8   :  { %v889_v37 = vpop.f32.mrf.mxu0 }
 0x1b9   :  { %3313 = vmatpush1.bf16.msra.mxu1 %v4374_v6  ;;  %3348 = vmatpush1.bf16.msra.mxu0 %v4377_v43  ;;  %v1479_v52 = vpack.c.bf16 %v889_v37, %v889_v37  ;;  %v4442_v6 = vld [vmem:[%s6884_s3 + $0x3a4] ss:$8 sps:$4 sm:$0xff]   ;;  %v4445_v43 = vld [vmem:[%s6884_s3 + $0x474] ss:$8 sps:$4 sm:$0xff]   ;;  %v4443_v37 = vld [vmem:[%s6884_s3 + $0x470] ss:$8 sps:$4 sm:$0xff]  }
 0x1ba   :  { %3314 = vmatprep.subr.bf16.mxu1 %v4382_v51  ;;  %3349 = vmatprep.subr.bf16.mxu0 %v4385_v3  ;;  %v891_v62 = vpop.f32.mrf.mxu0  ;;  %v4440_v3 = vld [vmem:[%s6884_s3 + $0x3a0] ss:$8 sps:$4 sm:$0xff]  }
 0x1bb   :  { %3334 = vmatprep.mubr.bf16.mxu1 %v1479_v52  ;;  %v1478_v52 = vpack.c.bf16 %v6205_v17, %v6205_v17  ;;  %v4451_v62 = vld [vmem:[%s6884_s3 + $0x464] ss:$8 sps:$4 sm:$0xff]   ;;  %v4446_v17 = vld [vmem:[%s6884_s3 + $0x390] ss:$8 sps:$4 sm:$0xff]  }
 0x1bc   :  { %v892_v50 = vpop.f32.mrf.mxu0 }
 0x1bd   :  { %3315 = vmatpush1.bf16.msra.mxu1 %v4380_v58  ;;  %3350 = vmatpush1.bf16.msra.mxu0 %v4383_v2  ;;  %v4448_v58 = vld [vmem:[%s6884_s3 + $0x394] ss:$8 sps:$4 sm:$0xff]   ;;  %v4449_v50 = vld [vmem:[%s6884_s3 + $0x460] ss:$8 sps:$4 sm:$0xff]  }
 0x1be   :  { %3316 = vmatprep.subr.bf16.mxu1 %v4388_v46  ;;  %3351 = vmatprep.subr.bf16.mxu0 %v4391_v5 }
 0x1c1   :  { %3317 = vmatpush1.bf16.msra.mxu1 %v4386_v47  ;;  %3352 = vmatpush1.bf16.msra.mxu0 %v4389_v9  ;;  %v4454_v47 = vld [vmem:[%s6884_s3 + $0x384] ss:$8 sps:$4 sm:$0xff]   ;;  %v4457_v9 = vld [vmem:[%s6884_s3 + $0x454] ss:$8 sps:$4 sm:$0xff]  }
 0x1c2   :  { %v6243_v45 = vpop.f32.mrf.mxu0  ;;  %3318 = vmatprep.subr.bf16.mxu1 %v4394_v31  ;;  %3353 = vmatprep.subr.bf16.mxu0 %v4397_v10  ;;  %v4452_v10 = vld [vmem:[%s6884_s3 + $0x380] ss:$8 sps:$4 sm:$0xff]  }
 0x1c4   :  { %v995_v28 = vpop.f32.mrf.mxu0 }
 0x1c5   :  { %v1481_v8 = vpack.c.bf16 %v995_v28, %v995_v28  ;;  %3319 = vmatpush2.bf16.msra.mxu1 %v4392_v12  ;;  %3354 = vmatpush1.bf16.msra.mxu0 %v4395_v1  ;;  %v4455_v12 = vld [vmem:[%s6884_s3 + $0x450] ss:$8 sps:$4 sm:$0xff]   ;;  %v4460_v1 = vld [vmem:[%s6884_s3 + $0x444] ss:$8 sps:$4 sm:$0xff]   ;;  %v4458_v28 = vld [vmem:[%s6884_s3 + $0x440] ss:$8 sps:$4 sm:$0xff]  }
 0x1c6   :  { %v997_v40 = vpop.f32.mrf.mxu0  ;;  %3320 = vmatprep.subr.bf16.mxu1 %v4400_v11  ;;  %3355 = vmatprep.subr.bf16.mxu0 %v4403_v26  ;;  %v4463_v11 = vld [vmem:[%s6884_s3 + $0x574] ss:$8 sps:$4 sm:$0xff]  }
 0x1c7   :  { %3375 = vmatprep.mubr.bf16.mxu0 %v1481_v8  ;;  %v4461_v8 = vld [vmem:[%s6884_s3 + $0x570] ss:$8 sps:$4 sm:$0xff]  }
 0x1c8   :  { %v998_v29 = vpop.f32.mrf.mxu0 }
 0x1c9   :  { %3321 = vmatpush2.bf16.msra.mxu1 %v4398_v59  ;;  %3356 = vmatpush1.bf16.msra.mxu0 %v4401_v24  ;;  %v1480_v59 = vpack.c.bf16 %v6243_v45, %v6243_v45  ;;  %v4466_v24 = vld [vmem:[%s6884_s3 + $0x434] ss:$8 sps:$4 sm:$0xff]   ;;  %v4464_v45 = vld [vmem:[%s6884_s3 + $0x430] ss:$8 sps:$4 sm:$0xff]  }
 0x1ca   :  { %3322 = vmatprep.subr.bf16.mxu1 %v4406_v60  ;;  %3357 = vmatprep.subr.bf16.mxu0 %v4409_v48  ;;  %v6269_v22 = vpop.f32.mrf.mxu1  ;;  %v4469_v60 = vld [vmem:[%s6884_s3 + $0x564] ss:$8 sps:$4 sm:$0xff]  }
 0x1cc   :  { %v6277_v13 = vpop.f32.mrf.mxu1 }
 0x1cd   :  { %3323 = vmatpush2.bf16.msra.mxu1 %v4404_v55  ;;  %3358 = vmatpush1.bf16.msra.mxu0 %v4407_v38  ;;  %v1485_v48 = vpack.c.bf16 %v6277_v13, %v6277_v13  ;;  %v4467_v55 = vld [vmem:[%s6884_s3 + $0x560] ss:$8 sps:$4 sm:$0xff]   ;;  %v4472_v38 = vld [vmem:[%s6884_s3 + $0x424] ss:$8 sps:$4 sm:$0xff]  }
 0x1ce   :  { %3324 = vmatprep.subr.bf16.mxu1 %v4412_v30  ;;  %3359 = vmatprep.subr.bf16.mxu0 %v4415_v57  ;;  %v1181_v19 = vpop.f32.mrf.mxu1  ;;  %v4475_v30 = vld [vmem:[%s6884_s3 + $0x554] ss:$8 sps:$4 sm:$0xff]   ;;  %v4470_v13 = vld [vmem:[%s6884_s3 + $0x420] ss:$8 sps:$4 sm:$0xff]  }
 0x1cf   :  { %v4481_v19 = vld [vmem:[%s6884_s3 + $0x544] ss:$8 sps:$4 sm:$0xff]  }
 0x1d0   :  { %v6291_v25 = vpop.f32.mrf.mxu0  ;;  %v1182_v53 = vpop.f32.mrf.mxu1 }
 0x1d1   :  { %3325 = vmatpush2.bf16.msra.mxu1 %v4410_v21  ;;  %3360 = vmatpush2.bf16.msra.mxu0 %v4413_v16  ;;  %v4473_v21 = vld [vmem:[%s6884_s3 + $0x550] ss:$8 sps:$4 sm:$0xff]   ;;  %v4478_v16 = vld [vmem:[%s6884_s3 + $0x414] ss:$8 sps:$4 sm:$0xff]   ;;  %v4484_v53 = vld [vmem:[%s6884_s3 + $0x404] ss:$8 sps:$4 sm:$0xff]  }
 0x1d2   :  { %v1083_v23 = vpop.f32.mrf.mxu0  ;;  %3326 = vmatprep.subr.bf16.mxu1 %v4418_v56  ;;  %3361 = vmatprep.subr.bf16.mxu0 %v4421_v63  ;;  %v4476_v56 = vld [vmem:[%s6884_s3 + $0x410] ss:$8 sps:$4 sm:$0xff]   ;;  %v4479_v63 = vld [vmem:[%s6884_s3 + $0x540] ss:$8 sps:$4 sm:$0xff]  }
 0x1d3   :  { %v1483_v46 = vpack.c.bf16 %v1083_v23, %v1083_v23  ;;  %v4487_v23 = vld [vmem:[%s6884_s3 + $0x534] ss:$8 sps:$4 sm:$0xff]  }
 0x1d4   :  { %v1085_v14 = vpop.f32.mrf.mxu0 }
 0x1d5   :  { %3327 = vmatpush2.bf16.msra.mxu1 %v4416_v34  ;;  %3362 = vmatpush2.bf16.msra.mxu0 %v4419_v36  ;;  %v4482_v34 = vld [vmem:[%s6884_s3 + $0x400] ss:$8 sps:$4 sm:$0xff]   ;;  %v4485_v36 = vld [vmem:[%s6884_s3 + $0x530] ss:$8 sps:$4 sm:$0xff]  }
 0x1d6   :  { %v1086_v18 = vpop.f32.mrf.mxu0  ;;  %3328 = vmatprep.subr.bf16.mxu1 %v4424_v44  ;;  %3363 = vmatprep.subr.bf16.mxu0 %v4427_v20  ;;  %v4490_v44 = vld [vmem:[%s6884_s3 + $0x4f4] ss:$8 sps:$4 sm:$0xff]   ;;  %v4493_v20 = vld [vmem:[%s6884_s3 + $0x524] ss:$8 sps:$4 sm:$0xff]   ;;  %v4488_v14 = vld [vmem:[%s6884_s3 + $0x4f0] ss:$8 sps:$4 sm:$0xff]  }
 0x1d7   :  { %v6317_v41 = vpop.f32.mrf.mxu1  ;;  %v4491_v18 = vld [vmem:[%s6884_s3 + $0x520] ss:$8 sps:$4 sm:$0xff]  }
 0x1d9   :  { %3329 = vmatpush2.bf16.msra.mxu1 %v4422_v39  ;;  %3364 = vmatpush2.bf16.msra.mxu0 %v4425_v7  ;;  %v6325_v32 = vpop.f32.mrf.mxu1  ;;  %v4496_v39 = vld [vmem:[%s6884_s3 + $0x4e4] ss:$8 sps:$4 sm:$0xff]   ;;  %v4499_v7 = vld [vmem:[%s6884_s3 + $0x514] ss:$8 sps:$4 sm:$0xff]  }
 0x1da   :  { %3330 = vmatprep.subr.bf16.mxu1 %v4430_v49  ;;  %3365 = vmatprep.subr.bf16.mxu0 %v4433_v15  ;;  %v4494_v49 = vld [vmem:[%s6884_s3 + $0x4e0] ss:$8 sps:$4 sm:$0xff]   ;;  %v4497_v15 = vld [vmem:[%s6884_s3 + $0x510] ss:$8 sps:$4 sm:$0xff]  }
 0x1db   :  { %v1379_v0 = vpop.f32.mrf.mxu1 }
 0x1dc   :  { %v4508_v0 = vld [vmem:[%s6884_s3 + $0x4c4] ss:$8 sps:$4 sm:$0xff]  }
 0x1dd   :  { %3331 = vmatpush2.bf16.msra.mxu1 %v4428_v42  ;;  %3366 = vmatpush2.bf16.msra.mxu0 %v4431_v33  ;;  %v1380_v4 = vpop.f32.mrf.mxu1  ;;  %v4502_v42 = vld [vmem:[%s6884_s3 + $0x4d4] ss:$8 sps:$4 sm:$0xff]   ;;  %v4505_v33 = vld [vmem:[%s6884_s3 + $0x504] ss:$8 sps:$4 sm:$0xff]  }
 0x1de   :  { %3332 = vmatprep.subr.bf16.mxu1 %v4436_v27  ;;  %3367 = vmatprep.subr.bf16.mxu0 %v4439_v61  ;;  %v4500_v27 = vld [vmem:[%s6884_s3 + $0x4d0] ss:$8 sps:$4 sm:$0xff]   ;;  %v4503_v61 = vld [vmem:[%s6884_s3 + $0x500] ss:$8 sps:$4 sm:$0xff]  }
 0x1df   :  { %v4509_v4 = vld [vmem:[%s6884_s3 + $0x5f0] ss:$8 sps:$4 sm:$0xff]  }
 0x1e0   :  { %v6345_v51 = vpop.f32.mrf.mxu0 }
 0x1e1   :  { %3333 = vmatpush2.bf16.msra.mxu1 %v4434_v35  ;;  %3368 = vmatpush2.bf16.msra.mxu0 %v4437_v54  ;;  %v4511_v35 = vld [vmem:[%s6884_s3 + $0x5f4] ss:$8 sps:$4 sm:$0xff]   ;;  %v4506_v54 = vld [vmem:[%s6884_s3 + $0x4c0] ss:$8 sps:$4 sm:$0xff]  }
 0x1e2   :  { %3369 = vmatprep.subr.bf16.mxu0 %v4442_v6  ;;  %3384 = vmatprep.subr.bf16.mxu1 %v4445_v43  ;;  %v6358_v2 = vpop.f32.mrf.mxu0  ;;  %v4514_v6 = vld [vmem:[%s6884_s3 + $0x4b4] ss:$8 sps:$4 sm:$0xff]   ;;  %v4517_v43 = vld [vmem:[%s6884_s3 + $0x5e4] ss:$8 sps:$4 sm:$0xff]  }
 0x1e4   :  { %3335 = vmatmul.mubr.bf16.vlgmr.msra.gmra.mxu1 %v1478_v52  ;;  %v1289_v5 = vpop.f32.mrf.mxu0  ;;  %v4520_v52 = vld [vmem:[%s6884_s3 + $0x4a4] ss:$8 sps:$4 sm:$0xff]  }
 0x1e5   :  { %3370 = vmatpush2.bf16.msra.mxu0 %v4440_v3  ;;  %3385 = vmatpush1.bf16.msra.mxu1 %v4443_v37  ;;  %v4512_v3 = vld [vmem:[%s6884_s3 + $0x4b0] ss:$8 sps:$4 sm:$0xff]   ;;  %v4515_v37 = vld [vmem:[%s6884_s3 + $0x5e0] ss:$8 sps:$4 sm:$0xff]   ;;  %v4526_v5 = vld [vmem:[%s6884_s3 + $0x494] ss:$8 sps:$4 sm:$0xff]  }
 0x1e6   :  { %3416 = vmatprep.mubr.bf16.mxu1 %v1483_v46  ;;  %3371 = vmatprep.subr.bf16.mxu0 %v4448_v58  ;;  %v1290_v31 = vpop.f32.mrf.mxu0  ;;  %v4523_v58 = vld [vmem:[%s6884_s3 + $0x5d4] ss:$8 sps:$4 sm:$0xff]   ;;  %v4521_v46 = vld [vmem:[%s6884_s3 + $0x5d0] ss:$8 sps:$4 sm:$0xff]  }
 0x1e7   :  { %3386 = vmatprep.subr.bf16.mxu1 %v4451_v62  ;;  %v4518_v62 = vld [vmem:[%s6884_s3 + $0x4a0] ss:$8 sps:$4 sm:$0xff]   ;;  %v4535_v31 = vld [vmem:[%s6884_s3 + $0x5b4] ss:$8 sps:$4 sm:$0xff]  }
 0x1e9   :  { %3372 = vmatpush2.bf16.msra.mxu0 %v4446_v17  ;;  %3387 = vmatpush1.bf16.msra.mxu1 %v4449_v50  ;;  %v4529_v17 = vld [vmem:[%s6884_s3 + $0x5c4] ss:$8 sps:$4 sm:$0xff]   ;;  %v4524_v50 = vld [vmem:[%s6884_s3 + $0x490] ss:$8 sps:$4 sm:$0xff]  }
 0x1ea   :  { %3373 = vmatprep.subr.bf16.mxu0 %v4454_v47  ;;  %3388 = vmatprep.subr.bf16.mxu1 %v4457_v9  ;;  %v4527_v47 = vld [vmem:[%s6884_s3 + $0x5c0] ss:$8 sps:$4 sm:$0xff]   ;;  %v4532_v9 = vld [vmem:[%s6884_s3 + $0x484] ss:$8 sps:$4 sm:$0xff]  }
 0x1ec   :  { %v6387_v26 = vpop.f32.mrf.mxu0 }
 0x1ed   :  { %3374 = vmatpush2.bf16.msra.mxu0 %v4452_v10  ;;  %3389 = vmatpush1.bf16.msra.mxu1 %v4455_v12  ;;  %v4530_v10 = vld [vmem:[%s6884_s3 + $0x480] ss:$8 sps:$4 sm:$0xff]   ;;  %v4533_v12 = vld [vmem:[%s6884_s3 + $0x5b0] ss:$8 sps:$4 sm:$0xff]  }
 0x1ee   :  { %3390 = vmatprep.subr.bf16.mxu1 %v4460_v1  ;;  %3425 = vmatprep.subr.bf16.mxu0 %v4463_v11  ;;  %v6400_v40 = vpop.f32.mrf.mxu0  ;;  %v4538_v1 = vld [vmem:[%s6884_s3 + $0x5a4] ss:$8 sps:$4 sm:$0xff]   ;;  %v4541_v11 = vld [vmem:[%s6884_s3 + $0x674] ss:$8 sps:$4 sm:$0xff]  }
 0x1f0   :  { %3376 = vmatmul.mubr.bf16.vlgmr.msra.gmra.mxu0 %v1480_v59  ;;  %v1471_v29 = vpop.f32.mrf.mxu0  ;;  %v1482_v59 = vpack.c.bf16 %v6291_v25, %v6291_v25  ;;  %v4542_v25 = vld [vmem:[%s6884_s3 + $0x590] ss:$8 sps:$4 sm:$0xff]  }
 0x1f1   :  { %3391 = vmatpush1.bf16.msra.mxu1 %v4458_v28  ;;  %3426 = vmatpush1.bf16.msra.mxu0 %v4461_v8  ;;  %v4536_v28 = vld [vmem:[%s6884_s3 + $0x5a0] ss:$8 sps:$4 sm:$0xff]   ;;  %v4539_v8 = vld [vmem:[%s6884_s3 + $0x670] ss:$8 sps:$4 sm:$0xff]  }
 0x1f2   :  { %3457 = vmatprep.mubr.bf16.mxu0 %v1485_v48  ;;  %3392 = vmatprep.subr.bf16.mxu1 %v4466_v24  ;;  %v1472_v57 = vpop.f32.mrf.mxu0  ;;  %v4544_v24 = vld [vmem:[%s6884_s3 + $0x594] ss:$8 sps:$4 sm:$0xff]   ;;  %v1487_v48 = vpack.c.bf16 %v6358_v2, %v6358_v2  ;;  %v4545_v29 = vld [vmem:[%s6884_s3 + $0x660] ss:$8 sps:$4 sm:$0xff]  }
 0x1f3   :  { %3427 = vmatprep.subr.bf16.mxu0 %v4469_v60  ;;  %v4547_v60 = vld [vmem:[%s6884_s3 + $0x664] ss:$8 sps:$4 sm:$0xff]   ;;  %v4553_v2 = vld [vmem:[%s6884_s3 + $0x654] ss:$8 sps:$4 sm:$0xff]  }
 0x1f4   :  { %v4559_v57 = vld [vmem:[%s6884_s3 + $0x774] ss:$8 sps:$4 sm:$0xff]  }
 0x1f5   :  { %3393 = vmatpush1.bf16.msra.mxu1 %v4464_v45  ;;  %3428 = vmatpush1.bf16.msra.mxu0 %v4467_v55  ;;  %v4550_v45 = vld [vmem:[%s6884_s3 + $0x584] ss:$8 sps:$4 sm:$0xff]   ;;  %v4548_v55 = vld [vmem:[%s6884_s3 + $0x580] ss:$8 sps:$4 sm:$0xff]  }
 0x1f6   :  { %3394 = vmatprep.subr.bf16.mxu1 %v4472_v38  ;;  %3429 = vmatprep.subr.bf16.mxu0 %v4475_v30  ;;  %v4551_v38 = vld [vmem:[%s6884_s3 + $0x650] ss:$8 sps:$4 sm:$0xff]   ;;  %v4556_v30 = vld [vmem:[%s6884_s3 + $0x644] ss:$8 sps:$4 sm:$0xff]  }
 0x1f9   :  { %3395 = vmatpush1.bf16.msra.mxu1 %v4470_v13  ;;  %3430 = vmatpush1.bf16.msra.mxu0 %v4473_v21  ;;  %v4554_v13 = vld [vmem:[%s6884_s3 + $0x640] ss:$8 sps:$4 sm:$0xff]   ;;  %v4557_v21 = vld [vmem:[%s6884_s3 + $0x770] ss:$8 sps:$4 sm:$0xff]  }
 0x1fa   :  { %3396 = vmatprep.subr.bf16.mxu1 %v4478_v16  ;;  %3431 = vmatprep.subr.bf16.mxu0 %v4481_v19  ;;  %v1484_v16 = vpack.c.bf16 %v6269_v22, %v6269_v22  ;;  %v4562_v19 = vld [vmem:[%s6884_s3 + $0x634] ss:$8 sps:$4 sm:$0xff]   ;;  %v4560_v22 = vld [vmem:[%s6884_s3 + $0x630] ss:$8 sps:$4 sm:$0xff]  }
 0x1fd   :  { %3397 = vmatpush1.bf16.msra.mxu1 %v4476_v56  ;;  %3432 = vmatpush1.bf16.msra.mxu0 %v4479_v63  ;;  %v4565_v56 = vld [vmem:[%s6884_s3 + $0x764] ss:$8 sps:$4 sm:$0xff]   ;;  %v1489_v63 = vpack.c.bf16 %v6325_v32, %v6325_v32  ;;  %v4571_v32 = vld [vmem:[%s6884_s3 + $0x754] ss:$8 sps:$4 sm:$0xff]  }
 0x1fe   :  { %3398 = vmatprep.subr.bf16.mxu1 %v4484_v53  ;;  %3433 = vmatprep.subr.bf16.mxu0 %v4487_v23  ;;  %v4563_v53 = vld [vmem:[%s6884_s3 + $0x760] ss:$8 sps:$4 sm:$0xff]   ;;  %v4568_v23 = vld [vmem:[%s6884_s3 + $0x624] ss:$8 sps:$4 sm:$0xff]  }
 0x201   :  { %3399 = vmatpush1.bf16.msra.mxu1 %v4482_v34  ;;  %3434 = vmatpush1.bf16.msra.mxu0 %v4485_v36  ;;  %v4566_v34 = vld [vmem:[%s6884_s3 + $0x620] ss:$8 sps:$4 sm:$0xff]   ;;  %v4569_v36 = vld [vmem:[%s6884_s3 + $0x750] ss:$8 sps:$4 sm:$0xff]  }
 0x202   :  { %3400 = vmatprep.subr.bf16.mxu1 %v4490_v44  ;;  %3435 = vmatprep.subr.bf16.mxu0 %v4493_v20  ;;  %v4574_v44 = vld [vmem:[%s6884_s3 + $0x614] ss:$8 sps:$4 sm:$0xff]   ;;  %v4577_v20 = vld [vmem:[%s6884_s3 + $0x744] ss:$8 sps:$4 sm:$0xff]  }
 0x205   :  { %3401 = vmatpush2.bf16.msra.mxu1 %v4488_v14  ;;  %3436 = vmatpush1.bf16.msra.mxu0 %v4491_v18  ;;  %v4572_v14 = vld [vmem:[%s6884_s3 + $0x610] ss:$8 sps:$4 sm:$0xff]   ;;  %v4575_v18 = vld [vmem:[%s6884_s3 + $0x740] ss:$8 sps:$4 sm:$0xff]  }
 0x206   :  { %3402 = vmatprep.subr.bf16.mxu1 %v4496_v39  ;;  %3437 = vmatprep.subr.bf16.mxu0 %v4499_v7  ;;  %v4580_v39 = vld [vmem:[%s6884_s3 + $0x604] ss:$8 sps:$4 sm:$0xff]   ;;  %v4583_v7 = vld [vmem:[%s6884_s3 + $0x734] ss:$8 sps:$4 sm:$0xff]  }
 0x209   :  { %3403 = vmatpush2.bf16.msra.mxu1 %v4494_v49  ;;  %3438 = vmatpush1.bf16.msra.mxu0 %v4497_v15  ;;  %v4578_v49 = vld [vmem:[%s6884_s3 + $0x600] ss:$8 sps:$4 sm:$0xff]   ;;  %v4581_v15 = vld [vmem:[%s6884_s3 + $0x730] ss:$8 sps:$4 sm:$0xff]  }
 0x20a   :  { %3404 = vmatprep.subr.bf16.mxu1 %v4502_v42  ;;  %3439 = vmatprep.subr.bf16.mxu0 %v4505_v33  ;;  %v4586_v42 = vld [vmem:[%s6884_s3 + $0x6f4] ss:$8 sps:$4 sm:$0xff]   ;;  %v4589_v33 = vld [vmem:[%s6884_s3 + $0x724] ss:$8 sps:$4 sm:$0xff]  }
 0x20d   :  { %3405 = vmatpush2.bf16.msra.mxu1 %v4500_v27  ;;  %3440 = vmatpush1.bf16.msra.mxu0 %v4503_v61  ;;  %v4584_v27 = vld [vmem:[%s6884_s3 + $0x6f0] ss:$8 sps:$4 sm:$0xff]   ;;  %v4587_v61 = vld [vmem:[%s6884_s3 + $0x720] ss:$8 sps:$4 sm:$0xff]  }
 0x20e   :  { %3406 = vmatprep.subr.bf16.mxu1 %v4508_v0  ;;  %3441 = vmatprep.subr.bf16.mxu0 %v4511_v35  ;;  %v4592_v0 = vld [vmem:[%s6884_s3 + $0x6e4] ss:$8 sps:$4 sm:$0xff]   ;;  %v4595_v35 = vld [vmem:[%s6884_s3 + $0x714] ss:$8 sps:$4 sm:$0xff]  }
 0x211   :  { %3407 = vmatpush2.bf16.msra.mxu1 %v4506_v54  ;;  %3442 = vmatpush2.bf16.msra.mxu0 %v4509_v4  ;;  %v4590_v54 = vld [vmem:[%s6884_s3 + $0x6e0] ss:$8 sps:$4 sm:$0xff]   ;;  %v4593_v4 = vld [vmem:[%s6884_s3 + $0x710] ss:$8 sps:$4 sm:$0xff]  }
 0x212   :  { %3408 = vmatprep.subr.bf16.mxu1 %v4514_v6  ;;  %3443 = vmatprep.subr.bf16.mxu0 %v4517_v43  ;;  %v4598_v6 = vld [vmem:[%s6884_s3 + $0x6d4] ss:$8 sps:$4 sm:$0xff]   ;;  %v4601_v43 = vld [vmem:[%s6884_s3 + $0x704] ss:$8 sps:$4 sm:$0xff]  }
 0x215   :  { %3409 = vmatpush2.bf16.msra.mxu1 %v4512_v3  ;;  %3444 = vmatpush2.bf16.msra.mxu0 %v4515_v37  ;;  %v4596_v3 = vld [vmem:[%s6884_s3 + $0x6d0] ss:$8 sps:$4 sm:$0xff]   ;;  %v4599_v37 = vld [vmem:[%s6884_s3 + $0x700] ss:$8 sps:$4 sm:$0xff]  }
 0x216   :  { %3410 = vmatprep.subr.bf16.mxu1 %v4520_v52  ;;  %3445 = vmatprep.subr.bf16.mxu0 %v4523_v58  ;;  %v4604_v52 = vld [vmem:[%s6884_s3 + $0x6c4] ss:$8 sps:$4 sm:$0xff]   ;;  %v4607_v58 = vld [vmem:[%s6884_s3 + $0x7f4] ss:$8 sps:$4 sm:$0xff]  }
 0x219   :  { %3411 = vmatpush2.bf16.msra.mxu1 %v4518_v62  ;;  %3446 = vmatpush2.bf16.msra.mxu0 %v4521_v46  ;;  %v4602_v62 = vld [vmem:[%s6884_s3 + $0x6c0] ss:$8 sps:$4 sm:$0xff]   ;;  %v4605_v46 = vld [vmem:[%s6884_s3 + $0x7f0] ss:$8 sps:$4 sm:$0xff]  }
 0x21a   :  { %3412 = vmatprep.subr.bf16.mxu1 %v4526_v5  ;;  %3447 = vmatprep.subr.bf16.mxu0 %v4529_v17  ;;  %v4610_v5 = vld [vmem:[%s6884_s3 + $0x6b4] ss:$8 sps:$4 sm:$0xff]   ;;  %v4613_v17 = vld [vmem:[%s6884_s3 + $0x7e4] ss:$8 sps:$4 sm:$0xff]  }
 0x21d   :  { %3413 = vmatpush2.bf16.msra.mxu1 %v4524_v50  ;;  %3448 = vmatpush2.bf16.msra.mxu0 %v4527_v47  ;;  %v4608_v50 = vld [vmem:[%s6884_s3 + $0x6b0] ss:$8 sps:$4 sm:$0xff]   ;;  %v4611_v47 = vld [vmem:[%s6884_s3 + $0x7e0] ss:$8 sps:$4 sm:$0xff]  }
 0x21e   :  { %3414 = vmatprep.subr.bf16.mxu1 %v4532_v9  ;;  %3449 = vmatprep.subr.bf16.mxu0 %v4535_v31  ;;  %v4616_v9 = vld [vmem:[%s6884_s3 + $0x6a4] ss:$8 sps:$4 sm:$0xff]   ;;  %v4619_v31 = vld [vmem:[%s6884_s3 + $0x7d4] ss:$8 sps:$4 sm:$0xff]  }
 0x221   :  { %3415 = vmatpush2.bf16.msra.mxu1 %v4530_v10  ;;  %3450 = vmatpush2.bf16.msra.mxu0 %v4533_v12  ;;  %v4614_v10 = vld [vmem:[%s6884_s3 + $0x6a0] ss:$8 sps:$4 sm:$0xff]   ;;  %v4617_v12 = vld [vmem:[%s6884_s3 + $0x7d0] ss:$8 sps:$4 sm:$0xff]  }
 0x222   :  { %3451 = vmatprep.subr.bf16.mxu0 %v4538_v1  ;;  %3466 = vmatprep.subr.bf16.mxu1 %v4541_v11  ;;  %v4622_v1 = vld [vmem:[%s6884_s3 + $0x694] ss:$8 sps:$4 sm:$0xff]   ;;  %v4625_v11 = vld [vmem:[%s6884_s3 + $0x7c4] ss:$8 sps:$4 sm:$0xff]  }
 0x224   :  { %3417 = vmatmul.mubr.bf16.vlgmr.msra.gmra.mxu1 %v1482_v59  ;;  %v4628_v59 = vld [vmem:[%s6884_s3 + $0x684] ss:$8 sps:$4 sm:$0xff]  }
 0x225   :  { %3452 = vmatpush2.bf16.msra.mxu0 %v4536_v28  ;;  %3467 = vmatpush1.bf16.msra.mxu1 %v4539_v8  ;;  %v4620_v28 = vld [vmem:[%s6884_s3 + $0x690] ss:$8 sps:$4 sm:$0xff]   ;;  %v4623_v8 = vld [vmem:[%s6884_s3 + $0x7c0] ss:$8 sps:$4 sm:$0xff]  }
 0x226   :  { %3498 = vmatprep.mubr.bf16.mxu1 %v1487_v48  ;;  %3453 = vmatprep.subr.bf16.mxu0 %v4544_v24  ;;  %v4631_v24 = vld [vmem:[%s6884_s3 + $0x7b4] ss:$8 sps:$4 sm:$0xff]   ;;  %v4629_v48 = vld [vmem:[%s6884_s3 + $0x7b0] ss:$8 sps:$4 sm:$0xff]  }
 0x227   :  { %3468 = vmatprep.subr.bf16.mxu1 %v4547_v60  ;;  %v4626_v60 = vld [vmem:[%s6884_s3 + $0x680] ss:$8 sps:$4 sm:$0xff]  }
 0x229   :  { %3454 = vmatpush2.bf16.msra.mxu0 %v4542_v25  ;;  %3469 = vmatpush1.bf16.msra.mxu1 %v4545_v29  ;;  %v4634_v25 = vld [vmem:[%s6884_s3 + $0x7a4] ss:$8 sps:$4 sm:$0xff]   ;;  %v4637_v29 = vld [vmem:[%s6884_s3 + $0x874] ss:$8 sps:$4 sm:$0xff]  }
 0x22a   :  { %3455 = vmatprep.subr.bf16.mxu0 %v4550_v45  ;;  %3470 = vmatprep.subr.bf16.mxu1 %v4553_v2  ;;  %v4632_v45 = vld [vmem:[%s6884_s3 + $0x7a0] ss:$8 sps:$4 sm:$0xff]   ;;  %v4635_v2 = vld [vmem:[%s6884_s3 + $0x870] ss:$8 sps:$4 sm:$0xff]  }
 0x22d   :  { %3456 = vmatpush2.bf16.msra.mxu0 %v4548_v55  ;;  %3471 = vmatpush1.bf16.msra.mxu1 %v4551_v38  ;;  %v1486_v55 = vpack.c.bf16 %v6345_v51, %v6345_v51  ;;  %v4640_v38 = vld [vmem:[%s6884_s3 + $0x794] ss:$8 sps:$4 sm:$0xff]   ;;  %v4638_v51 = vld [vmem:[%s6884_s3 + $0x790] ss:$8 sps:$4 sm:$0xff]  }
 0x22e   :  { %3472 = vmatprep.subr.bf16.mxu1 %v4556_v30  ;;  %3507 = vmatprep.subr.bf16.mxu0 %v4559_v57  ;;  %v4643_v30 = vld [vmem:[%s6884_s3 + $0x864] ss:$8 sps:$4 sm:$0xff]   ;;  %v1491_v57 = vpack.c.bf16 %v6400_v40, %v6400_v40  ;;  %v4649_v40 = vld [vmem:[%s6884_s3 + $0x854] ss:$8 sps:$4 sm:$0xff]  }
 0x230   :  { %3458 = vmatmul.mubr.bf16.vlgmr.msra.gmra.mxu0 %v1484_v16 }
 0x231   :  { %3473 = vmatpush1.bf16.msra.mxu1 %v4554_v13  ;;  %3508 = vmatpush1.bf16.msra.mxu0 %v4557_v21  ;;  %v4641_v21 = vld [vmem:[%s6884_s3 + $0x860] ss:$8 sps:$4 sm:$0xff]  }
 0x232   :  { %3539 = vmatprep.mubr.bf16.mxu0 %v1489_v63  ;;  %3474 = vmatprep.subr.bf16.mxu1 %v4562_v19  ;;  %v4646_v19 = vld [vmem:[%s6884_s3 + $0x784] ss:$8 sps:$4 sm:$0xff]   ;;  %v4644_v63 = vld [vmem:[%s6884_s3 + $0x780] ss:$8 sps:$4 sm:$0xff]  }
 0x233   :  { %3509 = vmatprep.subr.bf16.mxu0 %v4565_v56 }
 0x235   :  { %3475 = vmatpush1.bf16.msra.mxu1 %v4560_v22  ;;  %3510 = vmatpush1.bf16.msra.mxu0 %v4563_v53  ;;  %v4647_v22 = vld [vmem:[%s6884_s3 + $0x850] ss:$8 sps:$4 sm:$0xff]  }
 0x236   :  { %3476 = vmatprep.subr.bf16.mxu1 %v4568_v23  ;;  %3511 = vmatprep.subr.bf16.mxu0 %v4571_v32  ;;  %v4652_v23 = vld [vmem:[%s6884_s3 + $0x844] ss:$8 sps:$4 sm:$0xff]   ;;  %v4650_v32 = vld [vmem:[%s6884_s3 + $0x840] ss:$8 sps:$4 sm:$0xff]  }
 0x239   :  { %3477 = vmatpush1.bf16.msra.mxu1 %v4566_v34  ;;  %3512 = vmatpush1.bf16.msra.mxu0 %v4569_v36  ;;  %v1488_v34 = vpack.c.bf16 %v6317_v41, %v6317_v41  ;;  %v4655_v36 = vld [vmem:[%s6884_s3 + $0x834] ss:$8 sps:$4 sm:$0xff]  }
 0x23a   :  { %3478 = vmatprep.subr.bf16.mxu1 %v4574_v44  ;;  %3513 = vmatprep.subr.bf16.mxu0 %v4577_v20 }
 0x23d   :  { %3479 = vmatpush1.bf16.msra.mxu1 %v4572_v14  ;;  %3514 = vmatpush1.bf16.msra.mxu0 %v4575_v18  ;;  %v4653_v14 = vld [vmem:[%s6884_s3 + $0x830] ss:$8 sps:$4 sm:$0xff]  }
 0x23e   :  { %3480 = vmatprep.subr.bf16.mxu1 %v4580_v39  ;;  %3515 = vmatprep.subr.bf16.mxu0 %v4583_v7  ;;  %v4658_v39 = vld [vmem:[%s6884_s3 + $0x824] ss:$8 sps:$4 sm:$0xff]  }
 0x241   :  { %3481 = vmatpush1.bf16.msra.mxu1 %v4578_v49  ;;  %3516 = vmatpush1.bf16.msra.mxu0 %v4581_v15  ;;  %v4656_v49 = vld [vmem:[%s6884_s3 + $0x820] ss:$8 sps:$4 sm:$0xff]  }
 0x242   :  { %3482 = vmatprep.subr.bf16.mxu1 %v4586_v42  ;;  %3517 = vmatprep.subr.bf16.mxu0 %v4589_v33  ;;  %v4661_v42 = vld [vmem:[%s6884_s3 + $0x814] ss:$8 sps:$4 sm:$0xff]   ;;  %v4659_v33 = vld [vmem:[%s6884_s3 + $0x810] ss:$8 sps:$4 sm:$0xff]  }
 0x245   :  { %3483 = vmatpush2.bf16.msra.mxu1 %v4584_v27  ;;  %3518 = vmatpush1.bf16.msra.mxu0 %v4587_v61  ;;  %v4664_v27 = vld [vmem:[%s6884_s3 + $0x804] ss:$8 sps:$4 sm:$0xff]   ;;  %v4662_v61 = vld [vmem:[%s6884_s3 + $0x800] ss:$8 sps:$4 sm:$0xff]  }
 0x246   :  { %3484 = vmatprep.subr.bf16.mxu1 %v4592_v0  ;;  %3519 = vmatprep.subr.bf16.mxu0 %v4595_v35  ;;  %v4667_v0 = vld [vmem:[%s6884_s3 + $0x8f4] ss:$8 sps:$4 sm:$0xff]   ;;  %v4665_v35 = vld [vmem:[%s6884_s3 + $0x8f0] ss:$8 sps:$4 sm:$0xff]  }
 0x249   :  { %3485 = vmatpush2.bf16.msra.mxu1 %v4590_v54  ;;  %3520 = vmatpush1.bf16.msra.mxu0 %v4593_v4  ;;  %v4670_v54 = vld [vmem:[%s6884_s3 + $0x8e4] ss:$8 sps:$4 sm:$0xff]   ;;  %v4668_v4 = vld [vmem:[%s6884_s3 + $0x8e0] ss:$8 sps:$4 sm:$0xff]  }
 0x24a   :  { %3486 = vmatprep.subr.bf16.mxu1 %v4598_v6  ;;  %3521 = vmatprep.subr.bf16.mxu0 %v4601_v43  ;;  %v4673_v6 = vld [vmem:[%s6884_s3 + $0x8d4] ss:$8 sps:$4 sm:$0xff]   ;;  %v4671_v43 = vld [vmem:[%s6884_s3 + $0x8d0] ss:$8 sps:$4 sm:$0xff]  }
 0x24d   :  { %3487 = vmatpush2.bf16.msra.mxu1 %v4596_v3  ;;  %3522 = vmatpush1.bf16.msra.mxu0 %v4599_v37  ;;  %v4676_v3 = vld [vmem:[%s6884_s3 + $0x8c4] ss:$8 sps:$4 sm:$0xff]   ;;  %v4674_v37 = vld [vmem:[%s6884_s3 + $0x8c0] ss:$8 sps:$4 sm:$0xff]  }
 0x24e   :  { %3488 = vmatprep.subr.bf16.mxu1 %v4604_v52  ;;  %3523 = vmatprep.subr.bf16.mxu0 %v4607_v58  ;;  %v4679_v52 = vld [vmem:[%s6884_s3 + $0x8b4] ss:$8 sps:$4 sm:$0xff]   ;;  %v4677_v58 = vld [vmem:[%s6884_s3 + $0x8b0] ss:$8 sps:$4 sm:$0xff]  }
 0x251   :  { %3489 = vmatpush2.bf16.msra.mxu1 %v4602_v62  ;;  %3524 = vmatpush2.bf16.msra.mxu0 %v4605_v46  ;;  %v4682_v62 = vld [vmem:[%s6884_s3 + $0x8a4] ss:$8 sps:$4 sm:$0xff]   ;;  %v4680_v46 = vld [vmem:[%s6884_s3 + $0x8a0] ss:$8 sps:$4 sm:$0xff]  }
 0x252   :  { %3490 = vmatprep.subr.bf16.mxu1 %v4610_v5  ;;  %3525 = vmatprep.subr.bf16.mxu0 %v4613_v17  ;;  %v4685_v5 = vld [vmem:[%s6884_s3 + $0x894] ss:$8 sps:$4 sm:$0xff]   ;;  %v4683_v17 = vld [vmem:[%s6884_s3 + $0x890] ss:$8 sps:$4 sm:$0xff]  }
 0x255   :  { %3491 = vmatpush2.bf16.msra.mxu1 %v4608_v50  ;;  %3526 = vmatpush2.bf16.msra.mxu0 %v4611_v47  ;;  %v4688_v50 = vld [vmem:[%s6884_s3 + $0x884] ss:$8 sps:$4 sm:$0xff]   ;;  %v4686_v47 = vld [vmem:[%s6884_s3 + $0x880] ss:$8 sps:$4 sm:$0xff]  }
 0x256   :  { %3492 = vmatprep.subr.bf16.mxu1 %v4616_v9  ;;  %3527 = vmatprep.subr.bf16.mxu0 %v4619_v31  ;;  %v1490_v9 = vpack.c.bf16 %v6387_v26, %v6387_v26 }
 0x259   :  { %3493 = vmatpush2.bf16.msra.mxu1 %v4614_v10  ;;  %3528 = vmatpush2.bf16.msra.mxu0 %v4617_v12 }
 0x25a   :  { %3494 = vmatprep.subr.bf16.mxu1 %v4622_v1  ;;  %3529 = vmatprep.subr.bf16.mxu0 %v4625_v11 }
 0x25d   :  { %3495 = vmatpush2.bf16.msra.mxu1 %v4620_v28  ;;  %3530 = vmatpush2.bf16.msra.mxu0 %v4623_v8 }
 0x25e   :  { %3496 = vmatprep.subr.bf16.mxu1 %v4628_v59  ;;  %3531 = vmatprep.subr.bf16.mxu0 %v4631_v24 }
 0x261   :  { %3497 = vmatpush2.bf16.msra.mxu1 %v4626_v60  ;;  %3532 = vmatpush2.bf16.msra.mxu0 %v4629_v48 }
 0x262   :  { %3533 = vmatprep.subr.bf16.mxu0 %v4634_v25  ;;  %3548 = vmatprep.subr.bf16.mxu1 %v4637_v29 }
 0x264   :  { %3499 = vmatmul.mubr.bf16.vlgmr.msra.gmra.mxu1 %v1486_v55  ;;  %v3254_v13 = vpop.f32.mrf.mxu1 }
 0x265   :  { %3534 = vmatpush2.bf16.msra.mxu0 %v4632_v45  ;;  %3549 = vmatpush1.bf16.msra.mxu1 %v4635_v2 }
 0x266   :  { %3580 = vmatprep.mubr.bf16.mxu1 %v1491_v57  ;;  %v3256_v16 = vpop.f32.mrf.mxu1  ;;  %3535 = vmatprep.subr.bf16.mxu0 %v4640_v38 }
 0x267   :  { %3550 = vmatprep.subr.bf16.mxu1 %v4643_v30 }
 0x268   :  { %v3258_v56 = vpop.f32.mrf.mxu1 }
 0x269   :  { %3536 = vmatpush2.bf16.msra.mxu0 %v4638_v51  ;;  %3551 = vmatpush1.bf16.msra.mxu1 %v4641_v21  ;;  %v12_v21 = vstv %s6885_s6 }
 0x26a   :  { %v3259_v53 = vpop.f32.mrf.mxu1  ;;  %3537 = vmatprep.subr.bf16.mxu0 %v4646_v19  ;;  %3552 = vmatprep.subr.bf16.mxu1 %v4649_v40  ;;  %13 = vst [vmem:[#allocation2] sm:$0x1] %v12_v21 }
 0x26d   :  { %3538 = vmatpush2.bf16.msra.mxu0 %v4644_v63  ;;  %3553 = vmatpush1.bf16.msra.mxu1 %v4647_v22 }
 0x26e   :  { %3554 = vmatprep.subr.bf16.mxu1 %v4652_v23 }
 0x270   :  { %3540 = vmatmul.mubr.bf16.vlgmr.msra.gmra.mxu0 %v1488_v34  ;;  %v3295_v44 = vpop.f32.mrf.mxu0 }
 0x271   :  { %v3296_v20 = vadd.f32 %v3295_v44, %v3254_v13  ;;  %3555 = vmatpush1.bf16.msra.mxu1 %v4650_v32 }
 0x272   :  { %v3297_v18 = vpop.f32.mrf.mxu0  ;;  %3556 = vmatprep.subr.bf16.mxu1 %v4655_v36  ;;  %v3593_v36 = vlaneseq }
 0x273   :  { %v3298_v41 = vadd.f32 %v3297_v18, %v3256_v16  ;;  %v3591_v18 = vld [vmem:[%s6886_s4] sm:$0x3] }
 0x274   :  { %v3299_v7 = vpop.f32.mrf.mxu0  ;;  %v3594_v44 = vshrl.u32 %v3593_v36, 7 }
 0x275   :  { %3557 = vmatpush1.bf16.msra.mxu1 %v4653_v14 }
 0x276   :  { %v3300_v15 = vpop.f32.mrf.mxu0  ;;  %3558 = vmatprep.subr.bf16.mxu1 %v4658_v39  ;;  %v3595_v14 = vsub.s32 0, %v3594_v44  ;;  %v3599_v7 = vsub.s32 1, %v3594_v44 }
 0x277   :  { %v3605_v15 = vld [vmem:[%s6887_s5] sm:$0x3] }
 0x279   :  { %3559 = vmatpush1.bf16.msra.mxu1 %v4656_v49 }
 0x27a   :  { %3560 = vmatprep.subr.bf16.mxu1 %v4661_v42 }
 0x27d   :  { %3561 = vmatpush1.bf16.msra.mxu1 %v4659_v33 }
 0x27e   :  { %3562 = vmatprep.subr.bf16.mxu1 %v4664_v27  ;;  %v3596_v27 = vrot.slane %v3591_v18, %v3595_v14 }
 0x281   :  { %3563 = vmatpush1.bf16.msra.mxu1 %v4662_v61 }
 0x282   :  { %3564 = vmatprep.subr.bf16.mxu1 %v4667_v0 }
 0x285   :  { %3565 = vmatpush2.bf16.msra.mxu1 %v4665_v35 }
 0x286   :  { %3566 = vmatprep.subr.bf16.mxu1 %v4670_v54  ;;  %v3600_v54 = vrot.slane %v3591_v18, %v3599_v7 }
 0x289   :  { %3567 = vmatpush2.bf16.msra.mxu1 %v4668_v4  ;;  %v3610_v4 = vrot.slane %v3605_v15, %v3595_v14 }
 0x28a   :  { %3568 = vmatprep.subr.bf16.mxu1 %v4673_v6 }
 0x28d   :  { %3569 = vmatpush2.bf16.msra.mxu1 %v4671_v43 }
 0x28e   :  { %3570 = vmatprep.subr.bf16.mxu1 %v4676_v3 }
 0x291   :  { %3571 = vmatpush2.bf16.msra.mxu1 %v4674_v37  ;;  %v3614_v37 = vrot.slane %v3605_v15, %v3599_v7 }
 0x292   :  { %3572 = vmatprep.subr.bf16.mxu1 %v4679_v52 }
 0x295   :  { %3573 = vmatpush2.bf16.msra.mxu1 %v4677_v58 }
 0x296   :  { %3574 = vmatprep.subr.bf16.mxu1 %v4682_v62 }
 0x299   :  { %3575 = vmatpush2.bf16.msra.mxu1 %v4680_v46 }
 0x29a   :  { %3576 = vmatprep.subr.bf16.mxu1 %v4685_v5 }
 0x29d   :  { %3577 = vmatpush2.bf16.msra.mxu1 %v4683_v17 }
 0x29e   :  { %3578 = vmatprep.subr.bf16.mxu1 %v4688_v50 }
 0x2a1   :  { %3579 = vmatpush2.bf16.msra.mxu1 %v4686_v47  ;;  %v4014_v47 = vld [vmem:[#allocation2] ss:$0 sm:$0xff] }
 0x2a4   :  { %v3336_v31 = vpop.f32.mrf.mxu1  ;;  %3581 = vmatmul.mubr.bf16.vlgmr.msra.gmra.mxu1 %v1490_v9 }
 0x2a5   :  { %v3337_v10 = vadd.f32 %v3336_v31, %v3296_v20 }
 0x2a6   :  { %v3338_v12 = vpop.f32.mrf.mxu1 }
 0x2a7   :  { %v3339_v1 = vadd.f32 %v3338_v12, %v3298_v41 }
 0x2a8   :  { %v3340_v11 = vpop.f32.mrf.mxu1 }
 0x2aa   :  { %v3341_v28 = vpop.f32.mrf.mxu1 }
 0x2b0   :  { %v3377_v8 = vpop.f32.mrf.mxu0 }
 0x2b1   :  { %v3378_v59 = vadd.f32 %v3377_v8, %v3337_v10 }
 0x2b2   :  { %v3379_v24 = vpop.f32.mrf.mxu0 }
 0x2b3   :  { %v3380_v60 = vadd.f32 %v3379_v24, %v3339_v1 }
 0x2b4   :  { %v3381_v48 = vpop.f32.mrf.mxu0 }
 0x2b6   :  { %v3382_v25 = vpop.f32.mrf.mxu0 }
 0x2e4   :  { %v3418_v29 = vpop.f32.mrf.mxu1 }
 0x2e5   :  { %v3419_v45 = vadd.f32 %v3418_v29, %v3378_v59 }
 0x2e6   :  { %v3420_v2 = vpop.f32.mrf.mxu1 }
 0x2e7   :  { %v3421_v55 = vadd.f32 %v3420_v2, %v3380_v60 }
 0x2e8   :  { %v3422_v38 = vpop.f32.mrf.mxu1 }
 0x2ea   :  { %v3423_v30 = vpop.f32.mrf.mxu1 }
 0x2f0   :  { %v3459_v26 = vpop.f32.mrf.mxu0 }
 0x2f1   :  { %v3460_v57 = vadd.f32 %v3459_v26, %v3419_v45 }
 0x2f2   :  { %v3461_v13 = vpop.f32.mrf.mxu0 }
 0x2f3   :  { %v3462_v51 = vadd.f32 %v3461_v13, %v3421_v55 }
 0x2f4   :  { %v3463_v16 = vpop.f32.mrf.mxu0 }
 0x2f6   :  { %v3464_v19 = vpop.f32.mrf.mxu0 }
 0x324   :  { %v3500_v40 = vpop.f32.mrf.mxu1 }
 0x325   :  { %v3501_v20 = vadd.f32 %v3500_v40, %v3460_v57 }
 0x326   :  { %v3502_v56 = vpop.f32.mrf.mxu1 }
 0x327   :  { %v3503_v39 = vadd.f32 %v3502_v56, %v3462_v51 }
 0x328   :  { %v3504_v63 = vpop.f32.mrf.mxu1 }
 0x32a   :  { %v3505_v22 = vpop.f32.mrf.mxu1 }
 0x330   :  { %v3541_v53 = vpop.f32.mrf.mxu0 }
 0x331   :  { %v3542_v41 = vadd.f32 %v3541_v53, %v3501_v20 }
 0x332   :  { %v3543_v23 = vpop.f32.mrf.mxu0 }
 0x333   :  { %v3544_v42 = vadd.f32 %v3543_v23, %v3503_v39 }
 0x334   :  { %v3545_v32 = vpop.f32.mrf.mxu0 }
 0x336   :  { %v3546_v34 = vpop.f32.mrf.mxu0 }
 0x364   :  { %v3582_v49 = vpop.f32.mrf.mxu1 }
 0x365   :  { %v3583_v33 = vadd.f32 %v3582_v49, %v3542_v41 }
 0x366   :  { %v3584_v61 = vpop.f32.mrf.mxu1 }
 0x367   :  { %v3589_v0 = vmul.f32 0.00390625, %v3583_v33  ;;  %v3585_v35 = vadd.f32 %v3584_v61, %v3544_v42 }
 0x368   :  { %v3586_v6 = vpop.f32.mrf.mxu1 }
 0x369   :  { %v3603_v43 = vadd.f32 %v3596_v27, %v3589_v0  ;;  %v3590_v3 = vmul.f32 0.00390625, %v3585_v35 }
 0x36a   :  { %v3587_v52 = vpop.f32.mrf.mxu1 }
 0x36b   :  { %v3604_v58 = vadd.f32 %v3600_v54, %v3590_v3  ;;  %v3617_v62 = vmul.f32 %v3610_v4, %v3603_v43 }
 0x36d   :  { %v3618_v46 = vmul.f32 %v3614_v37, %v3604_v58  ;;  %v3619_v5 = vsel %vm626_vm1, %v3617_v62, 0.0 }
 0x36f   :  { %v3620_v17 = vsel %vm626_vm1, %v3618_v46, 0.0 }
 0x370   :  { %v3621_v50 = vadd.f32 %v3620_v17, %v3619_v5 }
 0x372   :  { %3622 = vadd.xlane.f32.xlu1 %v3621_v50 }
 0x3fb   :  { %v3623_v9 = vpop.xlane.xlu1 %3622 }
 0x3fc   :  { %v3631_v31 = vadd.f32 %v4014_v47, %v3623_v9 }
 0x3fe   :  { %3633 = vst.msk [vmem:[%s6888_s7] sm:$0x3] %vm3632_vm11, %v3631_v31 }

</bundles_post_ra>
